<compile_context>
chip_gen: v6e
topology: v6e:2x2x1
jax: 0.10.0
libtpu: 0.0.40
codegen_flags: <defaults>
</compile_context>

<pallas_src>
import math

import jax
import jax.numpy as jnp
from jax.experimental import pallas as pl
from jax.experimental.pallas import tpu as pltpu

NHEAD = 4
DIM_FEEDFORWARD = 2048   # nn.TransformerEncoderLayer default
N_LAYERS = 2
LN_EPS = 1e-5
MATMUL_DTYPE = jnp.bfloat16   # MXU operand dtype; accumulation is always f32
PARAMS_PER_LAYER = 12


# ---------------------------------------------------------------------------
# In-kernel building blocks (operate on VMEM-resident jnp values)
# ---------------------------------------------------------------------------
def _layernorm(z, gamma, beta):
    # torch LayerNorm: biased variance, affine, eps=1e-5. All f32.
    mean = jnp.mean(z, axis=-1, keepdims=True)
    var = jnp.mean(jnp.square(z - mean), axis=-1, keepdims=True)
    return (z - mean) * jax.lax.rsqrt(var + LN_EPS) * gamma + beta


def _mha(tok, wqkv, bqkv, wo, bo):
    # tok: (S, E) for one batch element. Single fused QKV matmul, then per-head
    # attention on static lane slices (torch head order: head h = channels h*Dh:(h+1)*Dh).
    S, E = tok.shape
    Dh = E // NHEAD
    scale = 1.0 / math.sqrt(Dh)

    qkv = jnp.dot(tok.astype(MATMUL_DTYPE), wqkv.astype(MATMUL_DTYPE),
                  preferred_element_type=jnp.float32) + bqkv       # (S, 3E) f32
    q = qkv[:, :E] * scale       # fold 1/sqrt(Dh) into q (smaller tensor than scores)
    k = qkv[:, E:2 * E]
    v = qkv[:, 2 * E:]

    heads = []
    for h in range(NHEAD):       # static unroll; data never leaves VMEM/vregs
        sl = slice(h * Dh, (h + 1) * Dh)
        qh, kh, vh = q[:, sl], k[:, sl], v[:, sl]
        # Tiny (S,Dh)x(Dh,S) dots; kept as plain dots for robust lowering -- they
        # stay entirely in VMEM, only the MXU push/drain latency remains.
        s = jnp.dot(qh, kh.T, preferred_element_type=jnp.float32)   # (S, S)
        m = jnp.max(s, axis=-1, keepdims=True)
        p = jnp.exp(s - m)
        denom = jnp.sum(p, axis=-1, keepdims=True)
        p = p * pl.reciprocal(denom, approx=True)                   # EUP, ~free
        heads.append(jnp.dot(p, vh, preferred_element_type=jnp.float32))
    attn = jnp.concatenate(heads, axis=-1)                          # (S, E)

    return jnp.dot(attn.astype(MATMUL_DTYPE), wo.astype(MATMUL_DTYPE),
                   preferred_element_type=jnp.float32) + bo


def _fused_transformer_kernel(*refs):
    # refs = [x_ref, <12 param refs per layer> * N_LAYERS, fc_w_ref, fc_b_ref, o_ref]
    x_ref = refs[0]
    o_ref = refs[-1]
    p = refs[1:-1]

    tok = x_ref[0]                                   # (S, E): one batch element
    for li in range(N_LAYERS):
        (wqkv, bqkv, wo, bo, w1, b1, w2, b2, g1, be1, g2, be2) = [
            r[...] for r in p[li * PARAMS_PER_LAYER:(li + 1) * PARAMS_PER_LAYER]
        ]
        # --- self-attention block (post-norm) ---
        attn = _mha(tok, wqkv, bqkv, wo, bo)
        x1 = _layernorm(tok + attn, g1, be1)
        # --- feed-forward block ---
        h = jnp.dot(x1.astype(MATMUL_DTYPE), w1.astype(MATMUL_DTYPE),
                    preferred_element_type=jnp.float32) + b1        # (S, 2048) in VMEM
        h = jnp.maximum(h, 0.0)
        ff = jnp.dot(h.astype(MATMUL_DTYPE), w2.astype(MATMUL_DTYPE),
                     preferred_element_type=jnp.float32) + b2
        tok = _layernorm(x1 + ff, g2, be2)

    wfc = p[-2][...]
    bfc = p[-1][...]
    out = jnp.dot(tok.astype(MATMUL_DTYPE), wfc.astype(MATMUL_DTYPE),
                  preferred_element_type=jnp.float32) + bfc
    o_ref[0] = out.astype(o_ref.dtype)


# ---------------------------------------------------------------------------
# Parameters: torch-layout init + one-time conversion to matmul-ready layout
# ---------------------------------------------------------------------------
def init_params(key, input_dim, output_dim):
    """Deterministic synthetic init with torch parameter shapes/layout."""
    E, F = input_dim, DIM_FEEDFORWARD

    def nrm(k, shape, scale=0.05):
        return (scale * jax.random.normal(k, shape)).astype(jnp.float32)

    layers = []
    keys = jax.random.split(key, N_LAYERS + 1)
    for li in range(N_LAYERS):
        ks = jax.random.split(keys[li], 8)
        layers.append(dict(
            in_proj_weight=nrm(ks[0], (3 * E, E)),   # torch (3E, E)
            in_proj_bias=nrm(ks[1], (3 * E,)),
            out_proj_weight=nrm(ks[2], (E, E)),      # torch (E, E)
            out_proj_bias=nrm(ks[3], (E,)),
            linear1_weight=nrm(ks[4], (F, E)),       # torch (F, E)
            linear1_bias=nrm(ks[5], (F,)),
            linear2_weight=nrm(ks[6], (E, F)),       # torch (E, F)
            linear2_bias=nrm(ks[7], (E,)),
            ln1_weight=jnp.ones((E,), jnp.float32),
            ln1_bias=jnp.zeros((E,), jnp.float32),
            ln2_weight=jnp.ones((E,), jnp.float32),
            ln2_bias=jnp.zeros((E,), jnp.float32),
        ))
    kf = jax.random.split(keys[-1], 2)
    return dict(layers=layers,
                fc_weight=nrm(kf[0], (output_dim, E)),   # torch (out, in)
                fc_bias=nrm(kf[1], (output_dim,)))


def prepare_params(params):
    """One-time (outside the forward path) pre-transpose / concat into the layout
    the fused kernel consumes: y = x @ W + b, biases as (1, dim) rows."""
    flat = []
    for p in params["layers"]:
        flat += [
            p["in_proj_weight"].T,            # (E, 3E) = [Wq.T | Wk.T | Wv.T]
            p["in_proj_bias"].reshape(1, -1),
            p["out_proj_weight"].T,           # (E, E)
            p["out_proj_bias"].reshape(1, -1),
            p["linear1_weight"].T,            # (E, F)
            p["linear1_bias"].reshape(1, -1),
            p["linear2_weight"].T,            # (F, E)
            p["linear2_bias"].reshape(1, -1),
            p["ln1_weight"].reshape(1, -1),
            p["ln1_bias"].reshape(1, -1),
            p["ln2_weight"].reshape(1, -1),
            p["ln2_bias"].reshape(1, -1),
        ]
    flat += [params["fc_weight"].T,           # (E, out)
             params["fc_bias"].reshape(1, -1)]
    return tuple(flat)


# ---------------------------------------------------------------------------
# Forward: single pallas_call, grid over batch (parallel -> v7x megacore)
# ---------------------------------------------------------------------------
@jax.jit
def transformer_model_forward(x, flat_params):
    """x: (S, N, input_dim) torch layout -> (S, N, output_dim)."""
    S, N, E = x.shape
    output_dim = flat_params[-1].shape[-1]

    # One tiny (2 KiB) relayout so each grid step owns a contiguous (S, E) slab.
    x_b = jnp.transpose(x, (1, 0, 2))                 # (N, S, E)

    in_specs = [pl.BlockSpec((1, S, E), lambda n: (n, 0, 0))]
    for w in flat_params:
        in_specs.append(pl.BlockSpec(w.shape, lambda n, nd=w.ndim: (0,) * nd))

    out = pl.pallas_call(
        _fused_transformer_kernel,
        out_shape=jax.ShapeDtypeStruct((N, S, output_dim), x.dtype),
        grid=(N,),
        in_specs=in_specs,
        out_specs=pl.BlockSpec((1, S, output_dim), lambda n: (n, 0, 0)),
        compiler_params=pltpu.CompilerParams(dimension_semantics=("parallel",)),
    )(x_b, *flat_params)

    return jnp.transpose(out, (1, 0, 2))              # back to (S, N, output_dim)


if __name__ == "__main__":
    # input_dim must be divisible by nhead=4; hidden_dim is unused by the torch module.
    input_dim, hidden_dim, output_dim = 32, 64, 16
    S, N = 8, 2  # (seq, batch) -- torch default batch_first=False layout

    key = jax.random.PRNGKey(0)
    kx, kp = jax.random.split(key)
    x = jax.random.normal(kx, (S, N, input_dim), dtype=jnp.float32)
    params = prepare_params(init_params(kp, input_dim, output_dim))

    out = jax.block_until_ready(transformer_model_forward(x, params))
    assert out.shape == (S, N, output_dim), out.shape
    assert bool(jnp.all(jnp.isfinite(out)))
    print("KERNEL_OK")
</pallas_src>

<mosaic_0001>
module attributes {stable_mosaic.version = 11 : i64} {
  func.func @_fused_transformer_kernel(%arg0: i32, %arg1: memref<1x8x32xf32, #tpu.memory_space<vmem>>, %arg2: memref<32x96xf32, #tpu.memory_space<vmem>>, %arg3: memref<1x96xf32, #tpu.memory_space<vmem>>, %arg4: memref<32x32xf32, #tpu.memory_space<vmem>>, %arg5: memref<1x32xf32, #tpu.memory_space<vmem>>, %arg6: memref<32x2048xf32, #tpu.memory_space<vmem>>, %arg7: memref<1x2048xf32, #tpu.memory_space<vmem>>, %arg8: memref<2048x32xf32, #tpu.memory_space<vmem>>, %arg9: memref<1x32xf32, #tpu.memory_space<vmem>>, %arg10: memref<1x32xf32, #tpu.memory_space<vmem>>, %arg11: memref<1x32xf32, #tpu.memory_space<vmem>>, %arg12: memref<1x32xf32, #tpu.memory_space<vmem>>, %arg13: memref<1x32xf32, #tpu.memory_space<vmem>>, %arg14: memref<32x96xf32, #tpu.memory_space<vmem>>, %arg15: memref<1x96xf32, #tpu.memory_space<vmem>>, %arg16: memref<32x32xf32, #tpu.memory_space<vmem>>, %arg17: memref<1x32xf32, #tpu.memory_space<vmem>>, %arg18: memref<32x2048xf32, #tpu.memory_space<vmem>>, %arg19: memref<1x2048xf32, #tpu.memory_space<vmem>>, %arg20: memref<2048x32xf32, #tpu.memory_space<vmem>>, %arg21: memref<1x32xf32, #tpu.memory_space<vmem>>, %arg22: memref<1x32xf32, #tpu.memory_space<vmem>>, %arg23: memref<1x32xf32, #tpu.memory_space<vmem>>, %arg24: memref<1x32xf32, #tpu.memory_space<vmem>>, %arg25: memref<1x32xf32, #tpu.memory_space<vmem>>, %arg26: memref<32x16xf32, #tpu.memory_space<vmem>>, %arg27: memref<1x16xf32, #tpu.memory_space<vmem>>, %arg28: memref<1x8x16xf32, #tpu.memory_space<vmem>>) attributes {dimension_semantics = [#tpu.dimension_semantics<parallel>], iteration_bounds = array<i64: 2>, scalar_prefetch = 0 : i64, scratch_operands = 0 : i64, tpu.core_type = #tpu.core_type<tc>, window_params = [{transform_indices = @transform_0, window_bounds = array<i64: 1, 8, 32>}, {pipeline_mode = #tpu.pipeline_mode<synchronous>, transform_indices = @transform_1, window_bounds = array<i64: 32, 96>}, {pipeline_mode = #tpu.pipeline_mode<synchronous>, transform_indices = @transform_2, window_bounds = array<i64: 1, 96>}, {pipeline_mode = #tpu.pipeline_mode<synchronous>, transform_indices = @transform_3, window_bounds = array<i64: 32, 32>}, {pipeline_mode = #tpu.pipeline_mode<synchronous>, transform_indices = @transform_4, window_bounds = array<i64: 1, 32>}, {pipeline_mode = #tpu.pipeline_mode<synchronous>, transform_indices = @transform_5, window_bounds = array<i64: 32, 2048>}, {pipeline_mode = #tpu.pipeline_mode<synchronous>, transform_indices = @transform_6, window_bounds = array<i64: 1, 2048>}, {pipeline_mode = #tpu.pipeline_mode<synchronous>, transform_indices = @transform_7, window_bounds = array<i64: 2048, 32>}, {pipeline_mode = #tpu.pipeline_mode<synchronous>, transform_indices = @transform_8, window_bounds = array<i64: 1, 32>}, {pipeline_mode = #tpu.pipeline_mode<synchronous>, transform_indices = @transform_9, window_bounds = array<i64: 1, 32>}, {pipeline_mode = #tpu.pipeline_mode<synchronous>, transform_indices = @transform_10, window_bounds = array<i64: 1, 32>}, {pipeline_mode = #tpu.pipeline_mode<synchronous>, transform_indices = @transform_11, window_bounds = array<i64: 1, 32>}, {pipeline_mode = #tpu.pipeline_mode<synchronous>, transform_indices = @transform_12, window_bounds = array<i64: 1, 32>}, {pipeline_mode = #tpu.pipeline_mode<synchronous>, transform_indices = @transform_13, window_bounds = array<i64: 32, 96>}, {pipeline_mode = #tpu.pipeline_mode<synchronous>, transform_indices = @transform_14, window_bounds = array<i64: 1, 96>}, {pipeline_mode = #tpu.pipeline_mode<synchronous>, transform_indices = @transform_15, window_bounds = array<i64: 32, 32>}, {pipeline_mode = #tpu.pipeline_mode<synchronous>, transform_indices = @transform_16, window_bounds = array<i64: 1, 32>}, {pipeline_mode = #tpu.pipeline_mode<synchronous>, transform_indices = @transform_17, window_bounds = array<i64: 32, 2048>}, {pipeline_mode = #tpu.pipeline_mode<synchronous>, transform_indices = @transform_18, window_bounds = array<i64: 1, 2048>}, {pipeline_mode = #tpu.pipeline_mode<synchronous>, transform_indices = @transform_19, window_bounds = array<i64: 2048, 32>}, {pipeline_mode = #tpu.pipeline_mode<synchronous>, transform_indices = @transform_20, window_bounds = array<i64: 1, 32>}, {pipeline_mode = #tpu.pipeline_mode<synchronous>, transform_indices = @transform_21, window_bounds = array<i64: 1, 32>}, {pipeline_mode = #tpu.pipeline_mode<synchronous>, transform_indices = @transform_22, window_bounds = array<i64: 1, 32>}, {pipeline_mode = #tpu.pipeline_mode<synchronous>, transform_indices = @transform_23, window_bounds = array<i64: 1, 32>}, {pipeline_mode = #tpu.pipeline_mode<synchronous>, transform_indices = @transform_24, window_bounds = array<i64: 1, 32>}, {pipeline_mode = #tpu.pipeline_mode<synchronous>, transform_indices = @transform_25, window_bounds = array<i64: 32, 16>}, {pipeline_mode = #tpu.pipeline_mode<synchronous>, transform_indices = @transform_26, window_bounds = array<i64: 1, 16>}, {transform_indices = @transform_27, window_bounds = array<i64: 1, 8, 16>}]} {
    %c0 = arith.constant 0 : index
    %c0_0 = arith.constant 0 : index
    %c0_1 = arith.constant 0 : index
    %0 = vector.load %arg1[%c0, %c0_0, %c0_1] : memref<1x8x32xf32, #tpu.memory_space<vmem>>, vector<1x8x32xf32>
    %1 = vector.shape_cast %0 : vector<1x8x32xf32> to vector<8x32xf32>
    %c0_2 = arith.constant 0 : index
    %c0_3 = arith.constant 0 : index
    %2 = vector.load %arg2[%c0_2, %c0_3] : memref<32x96xf32, #tpu.memory_space<vmem>>, vector<32x96xf32>
    %c0_4 = arith.constant 0 : index
    %c0_5 = arith.constant 0 : index
    %3 = vector.load %arg3[%c0_4, %c0_5] : memref<1x96xf32, #tpu.memory_space<vmem>>, vector<1x96xf32>
    %c0_6 = arith.constant 0 : index
    %c0_7 = arith.constant 0 : index
    %4 = vector.load %arg4[%c0_6, %c0_7] : memref<32x32xf32, #tpu.memory_space<vmem>>, vector<32x32xf32>
    %c0_8 = arith.constant 0 : index
    %c0_9 = arith.constant 0 : index
    %5 = vector.load %arg5[%c0_8, %c0_9] : memref<1x32xf32, #tpu.memory_space<vmem>>, vector<1x32xf32>
    %c0_10 = arith.constant 0 : index
    %c0_11 = arith.constant 0 : index
    %6 = vector.load %arg6[%c0_10, %c0_11] : memref<32x2048xf32, #tpu.memory_space<vmem>>, vector<32x2048xf32>
    %c0_12 = arith.constant 0 : index
    %c0_13 = arith.constant 0 : index
    %7 = vector.load %arg7[%c0_12, %c0_13] : memref<1x2048xf32, #tpu.memory_space<vmem>>, vector<1x2048xf32>
    %c0_14 = arith.constant 0 : index
    %c0_15 = arith.constant 0 : index
    %8 = vector.load %arg8[%c0_14, %c0_15] : memref<2048x32xf32, #tpu.memory_space<vmem>>, vector<2048x32xf32>
    %c0_16 = arith.constant 0 : index
    %c0_17 = arith.constant 0 : index
    %9 = vector.load %arg9[%c0_16, %c0_17] : memref<1x32xf32, #tpu.memory_space<vmem>>, vector<1x32xf32>
    %c0_18 = arith.constant 0 : index
    %c0_19 = arith.constant 0 : index
    %10 = vector.load %arg10[%c0_18, %c0_19] : memref<1x32xf32, #tpu.memory_space<vmem>>, vector<1x32xf32>
    %c0_20 = arith.constant 0 : index
    %c0_21 = arith.constant 0 : index
    %11 = vector.load %arg11[%c0_20, %c0_21] : memref<1x32xf32, #tpu.memory_space<vmem>>, vector<1x32xf32>
    %c0_22 = arith.constant 0 : index
    %c0_23 = arith.constant 0 : index
    %12 = vector.load %arg12[%c0_22, %c0_23] : memref<1x32xf32, #tpu.memory_space<vmem>>, vector<1x32xf32>
    %c0_24 = arith.constant 0 : index
    %c0_25 = arith.constant 0 : index
    %13 = vector.load %arg13[%c0_24, %c0_25] : memref<1x32xf32, #tpu.memory_space<vmem>>, vector<1x32xf32>
    %14 = arith.truncf %1 : vector<8x32xf32> to vector<8x32xbf16>
    %15 = arith.truncf %2 : vector<32x96xf32> to vector<32x96xbf16>
    %cst = arith.constant dense<0.000000e+00> : vector<8x96xf32>
    %16 = tpu.matmul %14, %15, %cst {dimension_numbers = #tpu.dot_dimension_numbers<[1], [0], [0], [1], [0, 0, 1, 1], [], []>} : vector<8x32xbf16>, vector<32x96xbf16>, vector<8x96xf32> -> vector<8x96xf32>
    %17 = vector.broadcast %3 : vector<1x96xf32> to vector<8x96xf32>
    %18 = arith.addf %16, %17 : vector<8x96xf32>
    %19 = vector.extract_strided_slice %18 {offsets = [0, 0], sizes = [8, 32], strides = [1, 1]} : vector<8x96xf32> to vector<8x32xf32>
    %cst_26 = arith.constant 0.353553385 : f32
    %20 = vector.broadcast %cst_26 : f32 to vector<8x32xf32>
    %21 = arith.mulf %19, %20 : vector<8x32xf32>
    %22 = vector.extract_strided_slice %18 {offsets = [0, 32], sizes = [8, 32], strides = [1, 1]} : vector<8x96xf32> to vector<8x32xf32>
    %23 = vector.extract_strided_slice %18 {offsets = [0, 64], sizes = [8, 32], strides = [1, 1]} : vector<8x96xf32> to vector<8x32xf32>
    %24 = vector.extract_strided_slice %21 {offsets = [0, 0], sizes = [8, 8], strides = [1, 1]} : vector<8x32xf32> to vector<8x8xf32>
    %25 = vector.extract_strided_slice %22 {offsets = [0, 0], sizes = [8, 8], strides = [1, 1]} : vector<8x32xf32> to vector<8x8xf32>
    %26 = vector.extract_strided_slice %23 {offsets = [0, 0], sizes = [8, 8], strides = [1, 1]} : vector<8x32xf32> to vector<8x8xf32>
    %27 = tpu.transpose %25, [1, 0] : vector<8x8xf32> -> vector<8x8xf32>
    %cst_27 = arith.constant dense<0.000000e+00> : vector<8x8xf32>
    %28 = tpu.matmul %24, %27, %cst_27 {dimension_numbers = #tpu.dot_dimension_numbers<[1], [0], [0], [1], [0, 0, 1, 1], [], []>} : vector<8x8xf32>, vector<8x8xf32>, vector<8x8xf32> -> vector<8x8xf32>
    %cst_28 = arith.constant dense<0xFF800000> : vector<8xf32>
    %29 = vector.multi_reduction <maximumf>, %28, %cst_28 [1] : vector<8x8xf32> to vector<8xf32>
    %30 = vector.shape_cast %29 : vector<8xf32> to vector<8x1xf32>
    %31 = vector.broadcast %30 : vector<8x1xf32> to vector<8x8xf32>
    %32 = arith.subf %28, %31 : vector<8x8xf32>
    %33 = math.exp %32 : vector<8x8xf32>
    %cst_29 = arith.constant dense<0.000000e+00> : vector<8xf32>
    %34 = vector.multi_reduction <add>, %33, %cst_29 [1] : vector<8x8xf32> to vector<8xf32>
    %35 = vector.shape_cast %34 : vector<8xf32> to vector<8x1xf32>
    %36 = tpu.reciprocal %35 {approx = true} : vector<8x1xf32> -> vector<8x1xf32>
    %37 = vector.broadcast %36 : vector<8x1xf32> to vector<8x8xf32>
    %38 = arith.mulf %33, %37 : vector<8x8xf32>
    %cst_30 = arith.constant dense<0.000000e+00> : vector<8x8xf32>
    %39 = tpu.matmul %38, %26, %cst_30 {dimension_numbers = #tpu.dot_dimension_numbers<[1], [0], [0], [1], [0, 0, 1, 1], [], []>} : vector<8x8xf32>, vector<8x8xf32>, vector<8x8xf32> -> vector<8x8xf32>
    %40 = vector.extract_strided_slice %21 {offsets = [0, 8], sizes = [8, 8], strides = [1, 1]} : vector<8x32xf32> to vector<8x8xf32>
    %41 = vector.extract_strided_slice %22 {offsets = [0, 8], sizes = [8, 8], strides = [1, 1]} : vector<8x32xf32> to vector<8x8xf32>
    %42 = vector.extract_strided_slice %23 {offsets = [0, 8], sizes = [8, 8], strides = [1, 1]} : vector<8x32xf32> to vector<8x8xf32>
    %43 = tpu.transpose %41, [1, 0] : vector<8x8xf32> -> vector<8x8xf32>
    %cst_31 = arith.constant dense<0.000000e+00> : vector<8x8xf32>
    %44 = tpu.matmul %40, %43, %cst_31 {dimension_numbers = #tpu.dot_dimension_numbers<[1], [0], [0], [1], [0, 0, 1, 1], [], []>} : vector<8x8xf32>, vector<8x8xf32>, vector<8x8xf32> -> vector<8x8xf32>
    %cst_32 = arith.constant dense<0xFF800000> : vector<8xf32>
    %45 = vector.multi_reduction <maximumf>, %44, %cst_32 [1] : vector<8x8xf32> to vector<8xf32>
    %46 = vector.shape_cast %45 : vector<8xf32> to vector<8x1xf32>
    %47 = vector.broadcast %46 : vector<8x1xf32> to vector<8x8xf32>
    %48 = arith.subf %44, %47 : vector<8x8xf32>
    %49 = math.exp %48 : vector<8x8xf32>
    %cst_33 = arith.constant dense<0.000000e+00> : vector<8xf32>
    %50 = vector.multi_reduction <add>, %49, %cst_33 [1] : vector<8x8xf32> to vector<8xf32>
    %51 = vector.shape_cast %50 : vector<8xf32> to vector<8x1xf32>
    %52 = tpu.reciprocal %51 {approx = true} : vector<8x1xf32> -> vector<8x1xf32>
    %53 = vector.broadcast %52 : vector<8x1xf32> to vector<8x8xf32>
    %54 = arith.mulf %49, %53 : vector<8x8xf32>
    %cst_34 = arith.constant dense<0.000000e+00> : vector<8x8xf32>
    %55 = tpu.matmul %54, %42, %cst_34 {dimension_numbers = #tpu.dot_dimension_numbers<[1], [0], [0], [1], [0, 0, 1, 1], [], []>} : vector<8x8xf32>, vector<8x8xf32>, vector<8x8xf32> -> vector<8x8xf32>
    %56 = vector.extract_strided_slice %21 {offsets = [0, 16], sizes = [8, 8], strides = [1, 1]} : vector<8x32xf32> to vector<8x8xf32>
    %57 = vector.extract_strided_slice %22 {offsets = [0, 16], sizes = [8, 8], strides = [1, 1]} : vector<8x32xf32> to vector<8x8xf32>
    %58 = vector.extract_strided_slice %23 {offsets = [0, 16], sizes = [8, 8], strides = [1, 1]} : vector<8x32xf32> to vector<8x8xf32>
    %59 = tpu.transpose %57, [1, 0] : vector<8x8xf32> -> vector<8x8xf32>
    %cst_35 = arith.constant dense<0.000000e+00> : vector<8x8xf32>
    %60 = tpu.matmul %56, %59, %cst_35 {dimension_numbers = #tpu.dot_dimension_numbers<[1], [0], [0], [1], [0, 0, 1, 1], [], []>} : vector<8x8xf32>, vector<8x8xf32>, vector<8x8xf32> -> vector<8x8xf32>
    %cst_36 = arith.constant dense<0xFF800000> : vector<8xf32>
    %61 = vector.multi_reduction <maximumf>, %60, %cst_36 [1] : vector<8x8xf32> to vector<8xf32>
    %62 = vector.shape_cast %61 : vector<8xf32> to vector<8x1xf32>
    %63 = vector.broadcast %62 : vector<8x1xf32> to vector<8x8xf32>
    %64 = arith.subf %60, %63 : vector<8x8xf32>
    %65 = math.exp %64 : vector<8x8xf32>
    %cst_37 = arith.constant dense<0.000000e+00> : vector<8xf32>
    %66 = vector.multi_reduction <add>, %65, %cst_37 [1] : vector<8x8xf32> to vector<8xf32>
    %67 = vector.shape_cast %66 : vector<8xf32> to vector<8x1xf32>
    %68 = tpu.reciprocal %67 {approx = true} : vector<8x1xf32> -> vector<8x1xf32>
    %69 = vector.broadcast %68 : vector<8x1xf32> to vector<8x8xf32>
    %70 = arith.mulf %65, %69 : vector<8x8xf32>
    %cst_38 = arith.constant dense<0.000000e+00> : vector<8x8xf32>
    %71 = tpu.matmul %70, %58, %cst_38 {dimension_numbers = #tpu.dot_dimension_numbers<[1], [0], [0], [1], [0, 0, 1, 1], [], []>} : vector<8x8xf32>, vector<8x8xf32>, vector<8x8xf32> -> vector<8x8xf32>
    %72 = vector.extract_strided_slice %21 {offsets = [0, 24], sizes = [8, 8], strides = [1, 1]} : vector<8x32xf32> to vector<8x8xf32>
    %73 = vector.extract_strided_slice %22 {offsets = [0, 24], sizes = [8, 8], strides = [1, 1]} : vector<8x32xf32> to vector<8x8xf32>
    %74 = vector.extract_strided_slice %23 {offsets = [0, 24], sizes = [8, 8], strides = [1, 1]} : vector<8x32xf32> to vector<8x8xf32>
    %75 = tpu.transpose %73, [1, 0] : vector<8x8xf32> -> vector<8x8xf32>
    %cst_39 = arith.constant dense<0.000000e+00> : vector<8x8xf32>
    %76 = tpu.matmul %72, %75, %cst_39 {dimension_numbers = #tpu.dot_dimension_numbers<[1], [0], [0], [1], [0, 0, 1, 1], [], []>} : vector<8x8xf32>, vector<8x8xf32>, vector<8x8xf32> -> vector<8x8xf32>
    %cst_40 = arith.constant dense<0xFF800000> : vector<8xf32>
    %77 = vector.multi_reduction <maximumf>, %76, %cst_40 [1] : vector<8x8xf32> to vector<8xf32>
    %78 = vector.shape_cast %77 : vector<8xf32> to vector<8x1xf32>
    %79 = vector.broadcast %78 : vector<8x1xf32> to vector<8x8xf32>
    %80 = arith.subf %76, %79 : vector<8x8xf32>
    %81 = math.exp %80 : vector<8x8xf32>
    %cst_41 = arith.constant dense<0.000000e+00> : vector<8xf32>
    %82 = vector.multi_reduction <add>, %81, %cst_41 [1] : vector<8x8xf32> to vector<8xf32>
    %83 = vector.shape_cast %82 : vector<8xf32> to vector<8x1xf32>
    %84 = tpu.reciprocal %83 {approx = true} : vector<8x1xf32> -> vector<8x1xf32>
    %85 = vector.broadcast %84 : vector<8x1xf32> to vector<8x8xf32>
    %86 = arith.mulf %81, %85 : vector<8x8xf32>
    %cst_42 = arith.constant dense<0.000000e+00> : vector<8x8xf32>
    %87 = tpu.matmul %86, %74, %cst_42 {dimension_numbers = #tpu.dot_dimension_numbers<[1], [0], [0], [1], [0, 0, 1, 1], [], []>} : vector<8x8xf32>, vector<8x8xf32>, vector<8x8xf32> -> vector<8x8xf32>
    %88 = tpu.concatenate %39, %55, %71, %87 in 1 : vector<8x8xf32>, vector<8x8xf32>, vector<8x8xf32>, vector<8x8xf32> -> vector<8x32xf32>
    %89 = arith.truncf %88 : vector<8x32xf32> to vector<8x32xbf16>
    %90 = arith.truncf %4 : vector<32x32xf32> to vector<32x32xbf16>
    %cst_43 = arith.constant dense<0.000000e+00> : vector<8x32xf32>
    %91 = tpu.matmul %89, %90, %cst_43 {dimension_numbers = #tpu.dot_dimension_numbers<[1], [0], [0], [1], [0, 0, 1, 1], [], []>} : vector<8x32xbf16>, vector<32x32xbf16>, vector<8x32xf32> -> vector<8x32xf32>
    %92 = vector.broadcast %5 : vector<1x32xf32> to vector<8x32xf32>
    %93 = arith.addf %91, %92 : vector<8x32xf32>
    %94 = arith.addf %1, %93 : vector<8x32xf32>
    %cst_44 = arith.constant dense<0.000000e+00> : vector<8xf32>
    %95 = vector.multi_reduction <add>, %94, %cst_44 [1] : vector<8x32xf32> to vector<8xf32>
    %96 = vector.shape_cast %95 : vector<8xf32> to vector<8x1xf32>
    %cst_45 = arith.constant 3.200000e+01 : f32
    %97 = vector.broadcast %cst_45 : f32 to vector<8x1xf32>
    %98 = arith.divf %96, %97 : vector<8x1xf32>
    %99 = vector.broadcast %98 : vector<8x1xf32> to vector<8x32xf32>
    %100 = arith.subf %94, %99 : vector<8x32xf32>
    %101 = arith.mulf %100, %100 : vector<8x32xf32>
    %cst_46 = arith.constant dense<0.000000e+00> : vector<8xf32>
    %102 = vector.multi_reduction <add>, %101, %cst_46 [1] : vector<8x32xf32> to vector<8xf32>
    %103 = vector.shape_cast %102 : vector<8xf32> to vector<8x1xf32>
    %cst_47 = arith.constant 3.200000e+01 : f32
    %104 = vector.broadcast %cst_47 : f32 to vector<8x1xf32>
    %105 = arith.divf %103, %104 : vector<8x1xf32>
    %106 = vector.broadcast %98 : vector<8x1xf32> to vector<8x32xf32>
    %107 = arith.subf %94, %106 : vector<8x32xf32>
    %cst_48 = arith.constant 9.99999974E-6 : f32
    %108 = vector.broadcast %cst_48 : f32 to vector<8x1xf32>
    %109 = arith.addf %105, %108 : vector<8x1xf32>
    %110 = math.rsqrt %109 : vector<8x1xf32>
    %111 = vector.broadcast %110 : vector<8x1xf32> to vector<8x32xf32>
    %112 = arith.mulf %107, %111 : vector<8x32xf32>
    %113 = vector.broadcast %10 : vector<1x32xf32> to vector<8x32xf32>
    %114 = arith.mulf %112, %113 : vector<8x32xf32>
    %115 = vector.broadcast %11 : vector<1x32xf32> to vector<8x32xf32>
    %116 = arith.addf %114, %115 : vector<8x32xf32>
    %117 = arith.truncf %116 : vector<8x32xf32> to vector<8x32xbf16>
    %118 = arith.truncf %6 : vector<32x2048xf32> to vector<32x2048xbf16>
    %cst_49 = arith.constant dense<0.000000e+00> : vector<8x2048xf32>
    %119 = tpu.matmul %117, %118, %cst_49 {dimension_numbers = #tpu.dot_dimension_numbers<[1], [0], [0], [1], [0, 0, 1, 1], [], []>} : vector<8x32xbf16>, vector<32x2048xbf16>, vector<8x2048xf32> -> vector<8x2048xf32>
    %120 = vector.broadcast %7 : vector<1x2048xf32> to vector<8x2048xf32>
    %121 = arith.addf %119, %120 : vector<8x2048xf32>
    %cst_50 = arith.constant 0.000000e+00 : f32
    %122 = vector.broadcast %cst_50 : f32 to vector<8x2048xf32>
    %123 = arith.maximumf %121, %122 : vector<8x2048xf32>
    %124 = arith.truncf %123 : vector<8x2048xf32> to vector<8x2048xbf16>
    %125 = arith.truncf %8 : vector<2048x32xf32> to vector<2048x32xbf16>
    %cst_51 = arith.constant dense<0.000000e+00> : vector<8x32xf32>
    %126 = tpu.matmul %124, %125, %cst_51 {dimension_numbers = #tpu.dot_dimension_numbers<[1], [0], [0], [1], [0, 0, 1, 1], [], []>} : vector<8x2048xbf16>, vector<2048x32xbf16>, vector<8x32xf32> -> vector<8x32xf32>
    %127 = vector.broadcast %9 : vector<1x32xf32> to vector<8x32xf32>
    %128 = arith.addf %126, %127 : vector<8x32xf32>
    %129 = arith.addf %116, %128 : vector<8x32xf32>
    %cst_52 = arith.constant dense<0.000000e+00> : vector<8xf32>
    %130 = vector.multi_reduction <add>, %129, %cst_52 [1] : vector<8x32xf32> to vector<8xf32>
    %131 = vector.shape_cast %130 : vector<8xf32> to vector<8x1xf32>
    %cst_53 = arith.constant 3.200000e+01 : f32
    %132 = vector.broadcast %cst_53 : f32 to vector<8x1xf32>
    %133 = arith.divf %131, %132 : vector<8x1xf32>
    %134 = vector.broadcast %133 : vector<8x1xf32> to vector<8x32xf32>
    %135 = arith.subf %129, %134 : vector<8x32xf32>
    %136 = arith.mulf %135, %135 : vector<8x32xf32>
    %cst_54 = arith.constant dense<0.000000e+00> : vector<8xf32>
    %137 = vector.multi_reduction <add>, %136, %cst_54 [1] : vector<8x32xf32> to vector<8xf32>
    %138 = vector.shape_cast %137 : vector<8xf32> to vector<8x1xf32>
    %cst_55 = arith.constant 3.200000e+01 : f32
    %139 = vector.broadcast %cst_55 : f32 to vector<8x1xf32>
    %140 = arith.divf %138, %139 : vector<8x1xf32>
    %141 = vector.broadcast %133 : vector<8x1xf32> to vector<8x32xf32>
    %142 = arith.subf %129, %141 : vector<8x32xf32>
    %cst_56 = arith.constant 9.99999974E-6 : f32
    %143 = vector.broadcast %cst_56 : f32 to vector<8x1xf32>
    %144 = arith.addf %140, %143 : vector<8x1xf32>
    %145 = math.rsqrt %144 : vector<8x1xf32>
    %146 = vector.broadcast %145 : vector<8x1xf32> to vector<8x32xf32>
    %147 = arith.mulf %142, %146 : vector<8x32xf32>
    %148 = vector.broadcast %12 : vector<1x32xf32> to vector<8x32xf32>
    %149 = arith.mulf %147, %148 : vector<8x32xf32>
    %150 = vector.broadcast %13 : vector<1x32xf32> to vector<8x32xf32>
    %151 = arith.addf %149, %150 : vector<8x32xf32>
    %c0_57 = arith.constant 0 : index
    %c0_58 = arith.constant 0 : index
    %152 = vector.load %arg14[%c0_57, %c0_58] : memref<32x96xf32, #tpu.memory_space<vmem>>, vector<32x96xf32>
    %c0_59 = arith.constant 0 : index
    %c0_60 = arith.constant 0 : index
    %153 = vector.load %arg15[%c0_59, %c0_60] : memref<1x96xf32, #tpu.memory_space<vmem>>, vector<1x96xf32>
    %c0_61 = arith.constant 0 : index
    %c0_62 = arith.constant 0 : index
    %154 = vector.load %arg16[%c0_61, %c0_62] : memref<32x32xf32, #tpu.memory_space<vmem>>, vector<32x32xf32>
    %c0_63 = arith.constant 0 : index
    %c0_64 = arith.constant 0 : index
    %155 = vector.load %arg17[%c0_63, %c0_64] : memref<1x32xf32, #tpu.memory_space<vmem>>, vector<1x32xf32>
    %c0_65 = arith.constant 0 : index
    %c0_66 = arith.constant 0 : index
    %156 = vector.load %arg18[%c0_65, %c0_66] : memref<32x2048xf32, #tpu.memory_space<vmem>>, vector<32x2048xf32>
    %c0_67 = arith.constant 0 : index
    %c0_68 = arith.constant 0 : index
    %157 = vector.load %arg19[%c0_67, %c0_68] : memref<1x2048xf32, #tpu.memory_space<vmem>>, vector<1x2048xf32>
    %c0_69 = arith.constant 0 : index
    %c0_70 = arith.constant 0 : index
    %158 = vector.load %arg20[%c0_69, %c0_70] : memref<2048x32xf32, #tpu.memory_space<vmem>>, vector<2048x32xf32>
    %c0_71 = arith.constant 0 : index
    %c0_72 = arith.constant 0 : index
    %159 = vector.load %arg21[%c0_71, %c0_72] : memref<1x32xf32, #tpu.memory_space<vmem>>, vector<1x32xf32>
    %c0_73 = arith.constant 0 : index
    %c0_74 = arith.constant 0 : index
    %160 = vector.load %arg22[%c0_73, %c0_74] : memref<1x32xf32, #tpu.memory_space<vmem>>, vector<1x32xf32>
    %c0_75 = arith.constant 0 : index
    %c0_76 = arith.constant 0 : index
    %161 = vector.load %arg23[%c0_75, %c0_76] : memref<1x32xf32, #tpu.memory_space<vmem>>, vector<1x32xf32>
    %c0_77 = arith.constant 0 : index
    %c0_78 = arith.constant 0 : index
    %162 = vector.load %arg24[%c0_77, %c0_78] : memref<1x32xf32, #tpu.memory_space<vmem>>, vector<1x32xf32>
    %c0_79 = arith.constant 0 : index
    %c0_80 = arith.constant 0 : index
    %163 = vector.load %arg25[%c0_79, %c0_80] : memref<1x32xf32, #tpu.memory_space<vmem>>, vector<1x32xf32>
    %164 = arith.truncf %151 : vector<8x32xf32> to vector<8x32xbf16>
    %165 = arith.truncf %152 : vector<32x96xf32> to vector<32x96xbf16>
    %cst_81 = arith.constant dense<0.000000e+00> : vector<8x96xf32>
    %166 = tpu.matmul %164, %165, %cst_81 {dimension_numbers = #tpu.dot_dimension_numbers<[1], [0], [0], [1], [0, 0, 1, 1], [], []>} : vector<8x32xbf16>, vector<32x96xbf16>, vector<8x96xf32> -> vector<8x96xf32>
    %167 = vector.broadcast %153 : vector<1x96xf32> to vector<8x96xf32>
    %168 = arith.addf %166, %167 : vector<8x96xf32>
    %169 = vector.extract_strided_slice %168 {offsets = [0, 0], sizes = [8, 32], strides = [1, 1]} : vector<8x96xf32> to vector<8x32xf32>
    %cst_82 = arith.constant 0.353553385 : f32
    %170 = vector.broadcast %cst_82 : f32 to vector<8x32xf32>
    %171 = arith.mulf %169, %170 : vector<8x32xf32>
    %172 = vector.extract_strided_slice %168 {offsets = [0, 32], sizes = [8, 32], strides = [1, 1]} : vector<8x96xf32> to vector<8x32xf32>
    %173 = vector.extract_strided_slice %168 {offsets = [0, 64], sizes = [8, 32], strides = [1, 1]} : vector<8x96xf32> to vector<8x32xf32>
    %174 = vector.extract_strided_slice %171 {offsets = [0, 0], sizes = [8, 8], strides = [1, 1]} : vector<8x32xf32> to vector<8x8xf32>
    %175 = vector.extract_strided_slice %172 {offsets = [0, 0], sizes = [8, 8], strides = [1, 1]} : vector<8x32xf32> to vector<8x8xf32>
    %176 = vector.extract_strided_slice %173 {offsets = [0, 0], sizes = [8, 8], strides = [1, 1]} : vector<8x32xf32> to vector<8x8xf32>
    %177 = tpu.transpose %175, [1, 0] : vector<8x8xf32> -> vector<8x8xf32>
    %cst_83 = arith.constant dense<0.000000e+00> : vector<8x8xf32>
    %178 = tpu.matmul %174, %177, %cst_83 {dimension_numbers = #tpu.dot_dimension_numbers<[1], [0], [0], [1], [0, 0, 1, 1], [], []>} : vector<8x8xf32>, vector<8x8xf32>, vector<8x8xf32> -> vector<8x8xf32>
    %cst_84 = arith.constant dense<0xFF800000> : vector<8xf32>
    %179 = vector.multi_reduction <maximumf>, %178, %cst_84 [1] : vector<8x8xf32> to vector<8xf32>
    %180 = vector.shape_cast %179 : vector<8xf32> to vector<8x1xf32>
    %181 = vector.broadcast %180 : vector<8x1xf32> to vector<8x8xf32>
    %182 = arith.subf %178, %181 : vector<8x8xf32>
    %183 = math.exp %182 : vector<8x8xf32>
    %cst_85 = arith.constant dense<0.000000e+00> : vector<8xf32>
    %184 = vector.multi_reduction <add>, %183, %cst_85 [1] : vector<8x8xf32> to vector<8xf32>
    %185 = vector.shape_cast %184 : vector<8xf32> to vector<8x1xf32>
    %186 = tpu.reciprocal %185 {approx = true} : vector<8x1xf32> -> vector<8x1xf32>
    %187 = vector.broadcast %186 : vector<8x1xf32> to vector<8x8xf32>
    %188 = arith.mulf %183, %187 : vector<8x8xf32>
    %cst_86 = arith.constant dense<0.000000e+00> : vector<8x8xf32>
    %189 = tpu.matmul %188, %176, %cst_86 {dimension_numbers = #tpu.dot_dimension_numbers<[1], [0], [0], [1], [0, 0, 1, 1], [], []>} : vector<8x8xf32>, vector<8x8xf32>, vector<8x8xf32> -> vector<8x8xf32>
    %190 = vector.extract_strided_slice %171 {offsets = [0, 8], sizes = [8, 8], strides = [1, 1]} : vector<8x32xf32> to vector<8x8xf32>
    %191 = vector.extract_strided_slice %172 {offsets = [0, 8], sizes = [8, 8], strides = [1, 1]} : vector<8x32xf32> to vector<8x8xf32>
    %192 = vector.extract_strided_slice %173 {offsets = [0, 8], sizes = [8, 8], strides = [1, 1]} : vector<8x32xf32> to vector<8x8xf32>
    %193 = tpu.transpose %191, [1, 0] : vector<8x8xf32> -> vector<8x8xf32>
    %cst_87 = arith.constant dense<0.000000e+00> : vector<8x8xf32>
    %194 = tpu.matmul %190, %193, %cst_87 {dimension_numbers = #tpu.dot_dimension_numbers<[1], [0], [0], [1], [0, 0, 1, 1], [], []>} : vector<8x8xf32>, vector<8x8xf32>, vector<8x8xf32> -> vector<8x8xf32>
    %cst_88 = arith.constant dense<0xFF800000> : vector<8xf32>
    %195 = vector.multi_reduction <maximumf>, %194, %cst_88 [1] : vector<8x8xf32> to vector<8xf32>
    %196 = vector.shape_cast %195 : vector<8xf32> to vector<8x1xf32>
    %197 = vector.broadcast %196 : vector<8x1xf32> to vector<8x8xf32>
    %198 = arith.subf %194, %197 : vector<8x8xf32>
    %199 = math.exp %198 : vector<8x8xf32>
    %cst_89 = arith.constant dense<0.000000e+00> : vector<8xf32>
    %200 = vector.multi_reduction <add>, %199, %cst_89 [1] : vector<8x8xf32> to vector<8xf32>
    %201 = vector.shape_cast %200 : vector<8xf32> to vector<8x1xf32>
    %202 = tpu.reciprocal %201 {approx = true} : vector<8x1xf32> -> vector<8x1xf32>
    %203 = vector.broadcast %202 : vector<8x1xf32> to vector<8x8xf32>
    %204 = arith.mulf %199, %203 : vector<8x8xf32>
    %cst_90 = arith.constant dense<0.000000e+00> : vector<8x8xf32>
    %205 = tpu.matmul %204, %192, %cst_90 {dimension_numbers = #tpu.dot_dimension_numbers<[1], [0], [0], [1], [0, 0, 1, 1], [], []>} : vector<8x8xf32>, vector<8x8xf32>, vector<8x8xf32> -> vector<8x8xf32>
    %206 = vector.extract_strided_slice %171 {offsets = [0, 16], sizes = [8, 8], strides = [1, 1]} : vector<8x32xf32> to vector<8x8xf32>
    %207 = vector.extract_strided_slice %172 {offsets = [0, 16], sizes = [8, 8], strides = [1, 1]} : vector<8x32xf32> to vector<8x8xf32>
    %208 = vector.extract_strided_slice %173 {offsets = [0, 16], sizes = [8, 8], strides = [1, 1]} : vector<8x32xf32> to vector<8x8xf32>
    %209 = tpu.transpose %207, [1, 0] : vector<8x8xf32> -> vector<8x8xf32>
    %cst_91 = arith.constant dense<0.000000e+00> : vector<8x8xf32>
    %210 = tpu.matmul %206, %209, %cst_91 {dimension_numbers = #tpu.dot_dimension_numbers<[1], [0], [0], [1], [0, 0, 1, 1], [], []>} : vector<8x8xf32>, vector<8x8xf32>, vector<8x8xf32> -> vector<8x8xf32>
    %cst_92 = arith.constant dense<0xFF800000> : vector<8xf32>
    %211 = vector.multi_reduction <maximumf>, %210, %cst_92 [1] : vector<8x8xf32> to vector<8xf32>
    %212 = vector.shape_cast %211 : vector<8xf32> to vector<8x1xf32>
    %213 = vector.broadcast %212 : vector<8x1xf32> to vector<8x8xf32>
    %214 = arith.subf %210, %213 : vector<8x8xf32>
    %215 = math.exp %214 : vector<8x8xf32>
    %cst_93 = arith.constant dense<0.000000e+00> : vector<8xf32>
    %216 = vector.multi_reduction <add>, %215, %cst_93 [1] : vector<8x8xf32> to vector<8xf32>
    %217 = vector.shape_cast %216 : vector<8xf32> to vector<8x1xf32>
    %218 = tpu.reciprocal %217 {approx = true} : vector<8x1xf32> -> vector<8x1xf32>
    %219 = vector.broadcast %218 : vector<8x1xf32> to vector<8x8xf32>
    %220 = arith.mulf %215, %219 : vector<8x8xf32>
    %cst_94 = arith.constant dense<0.000000e+00> : vector<8x8xf32>
    %221 = tpu.matmul %220, %208, %cst_94 {dimension_numbers = #tpu.dot_dimension_numbers<[1], [0], [0], [1], [0, 0, 1, 1], [], []>} : vector<8x8xf32>, vector<8x8xf32>, vector<8x8xf32> -> vector<8x8xf32>
    %222 = vector.extract_strided_slice %171 {offsets = [0, 24], sizes = [8, 8], strides = [1, 1]} : vector<8x32xf32> to vector<8x8xf32>
    %223 = vector.extract_strided_slice %172 {offsets = [0, 24], sizes = [8, 8], strides = [1, 1]} : vector<8x32xf32> to vector<8x8xf32>
    %224 = vector.extract_strided_slice %173 {offsets = [0, 24], sizes = [8, 8], strides = [1, 1]} : vector<8x32xf32> to vector<8x8xf32>
    %225 = tpu.transpose %223, [1, 0] : vector<8x8xf32> -> vector<8x8xf32>
    %cst_95 = arith.constant dense<0.000000e+00> : vector<8x8xf32>
    %226 = tpu.matmul %222, %225, %cst_95 {dimension_numbers = #tpu.dot_dimension_numbers<[1], [0], [0], [1], [0, 0, 1, 1], [], []>} : vector<8x8xf32>, vector<8x8xf32>, vector<8x8xf32> -> vector<8x8xf32>
    %cst_96 = arith.constant dense<0xFF800000> : vector<8xf32>
    %227 = vector.multi_reduction <maximumf>, %226, %cst_96 [1] : vector<8x8xf32> to vector<8xf32>
    %228 = vector.shape_cast %227 : vector<8xf32> to vector<8x1xf32>
    %229 = vector.broadcast %228 : vector<8x1xf32> to vector<8x8xf32>
    %230 = arith.subf %226, %229 : vector<8x8xf32>
    %231 = math.exp %230 : vector<8x8xf32>
    %cst_97 = arith.constant dense<0.000000e+00> : vector<8xf32>
    %232 = vector.multi_reduction <add>, %231, %cst_97 [1] : vector<8x8xf32> to vector<8xf32>
    %233 = vector.shape_cast %232 : vector<8xf32> to vector<8x1xf32>
    %234 = tpu.reciprocal %233 {approx = true} : vector<8x1xf32> -> vector<8x1xf32>
    %235 = vector.broadcast %234 : vector<8x1xf32> to vector<8x8xf32>
    %236 = arith.mulf %231, %235 : vector<8x8xf32>
    %cst_98 = arith.constant dense<0.000000e+00> : vector<8x8xf32>
    %237 = tpu.matmul %236, %224, %cst_98 {dimension_numbers = #tpu.dot_dimension_numbers<[1], [0], [0], [1], [0, 0, 1, 1], [], []>} : vector<8x8xf32>, vector<8x8xf32>, vector<8x8xf32> -> vector<8x8xf32>
    %238 = tpu.concatenate %189, %205, %221, %237 in 1 : vector<8x8xf32>, vector<8x8xf32>, vector<8x8xf32>, vector<8x8xf32> -> vector<8x32xf32>
    %239 = arith.truncf %238 : vector<8x32xf32> to vector<8x32xbf16>
    %240 = arith.truncf %154 : vector<32x32xf32> to vector<32x32xbf16>
    %cst_99 = arith.constant dense<0.000000e+00> : vector<8x32xf32>
    %241 = tpu.matmul %239, %240, %cst_99 {dimension_numbers = #tpu.dot_dimension_numbers<[1], [0], [0], [1], [0, 0, 1, 1], [], []>} : vector<8x32xbf16>, vector<32x32xbf16>, vector<8x32xf32> -> vector<8x32xf32>
    %242 = vector.broadcast %155 : vector<1x32xf32> to vector<8x32xf32>
    %243 = arith.addf %241, %242 : vector<8x32xf32>
    %244 = arith.addf %151, %243 : vector<8x32xf32>
    %cst_100 = arith.constant dense<0.000000e+00> : vector<8xf32>
    %245 = vector.multi_reduction <add>, %244, %cst_100 [1] : vector<8x32xf32> to vector<8xf32>
    %246 = vector.shape_cast %245 : vector<8xf32> to vector<8x1xf32>
    %cst_101 = arith.constant 3.200000e+01 : f32
    %247 = vector.broadcast %cst_101 : f32 to vector<8x1xf32>
    %248 = arith.divf %246, %247 : vector<8x1xf32>
    %249 = vector.broadcast %248 : vector<8x1xf32> to vector<8x32xf32>
    %250 = arith.subf %244, %249 : vector<8x32xf32>
    %251 = arith.mulf %250, %250 : vector<8x32xf32>
    %cst_102 = arith.constant dense<0.000000e+00> : vector<8xf32>
    %252 = vector.multi_reduction <add>, %251, %cst_102 [1] : vector<8x32xf32> to vector<8xf32>
    %253 = vector.shape_cast %252 : vector<8xf32> to vector<8x1xf32>
    %cst_103 = arith.constant 3.200000e+01 : f32
    %254 = vector.broadcast %cst_103 : f32 to vector<8x1xf32>
    %255 = arith.divf %253, %254 : vector<8x1xf32>
    %256 = vector.broadcast %248 : vector<8x1xf32> to vector<8x32xf32>
    %257 = arith.subf %244, %256 : vector<8x32xf32>
    %cst_104 = arith.constant 9.99999974E-6 : f32
    %258 = vector.broadcast %cst_104 : f32 to vector<8x1xf32>
    %259 = arith.addf %255, %258 : vector<8x1xf32>
    %260 = math.rsqrt %259 : vector<8x1xf32>
    %261 = vector.broadcast %260 : vector<8x1xf32> to vector<8x32xf32>
    %262 = arith.mulf %257, %261 : vector<8x32xf32>
    %263 = vector.broadcast %160 : vector<1x32xf32> to vector<8x32xf32>
    %264 = arith.mulf %262, %263 : vector<8x32xf32>
    %265 = vector.broadcast %161 : vector<1x32xf32> to vector<8x32xf32>
    %266 = arith.addf %264, %265 : vector<8x32xf32>
    %267 = arith.truncf %266 : vector<8x32xf32> to vector<8x32xbf16>
    %268 = arith.truncf %156 : vector<32x2048xf32> to vector<32x2048xbf16>
    %cst_105 = arith.constant dense<0.000000e+00> : vector<8x2048xf32>
    %269 = tpu.matmul %267, %268, %cst_105 {dimension_numbers = #tpu.dot_dimension_numbers<[1], [0], [0], [1], [0, 0, 1, 1], [], []>} : vector<8x32xbf16>, vector<32x2048xbf16>, vector<8x2048xf32> -> vector<8x2048xf32>
    %270 = vector.broadcast %157 : vector<1x2048xf32> to vector<8x2048xf32>
    %271 = arith.addf %269, %270 : vector<8x2048xf32>
    %cst_106 = arith.constant 0.000000e+00 : f32
    %272 = vector.broadcast %cst_106 : f32 to vector<8x2048xf32>
    %273 = arith.maximumf %271, %272 : vector<8x2048xf32>
    %274 = arith.truncf %273 : vector<8x2048xf32> to vector<8x2048xbf16>
    %275 = arith.truncf %158 : vector<2048x32xf32> to vector<2048x32xbf16>
    %cst_107 = arith.constant dense<0.000000e+00> : vector<8x32xf32>
    %276 = tpu.matmul %274, %275, %cst_107 {dimension_numbers = #tpu.dot_dimension_numbers<[1], [0], [0], [1], [0, 0, 1, 1], [], []>} : vector<8x2048xbf16>, vector<2048x32xbf16>, vector<8x32xf32> -> vector<8x32xf32>
    %277 = vector.broadcast %159 : vector<1x32xf32> to vector<8x32xf32>
    %278 = arith.addf %276, %277 : vector<8x32xf32>
    %279 = arith.addf %266, %278 : vector<8x32xf32>
    %cst_108 = arith.constant dense<0.000000e+00> : vector<8xf32>
    %280 = vector.multi_reduction <add>, %279, %cst_108 [1] : vector<8x32xf32> to vector<8xf32>
    %281 = vector.shape_cast %280 : vector<8xf32> to vector<8x1xf32>
    %cst_109 = arith.constant 3.200000e+01 : f32
    %282 = vector.broadcast %cst_109 : f32 to vector<8x1xf32>
    %283 = arith.divf %281, %282 : vector<8x1xf32>
    %284 = vector.broadcast %283 : vector<8x1xf32> to vector<8x32xf32>
    %285 = arith.subf %279, %284 : vector<8x32xf32>
    %286 = arith.mulf %285, %285 : vector<8x32xf32>
    %cst_110 = arith.constant dense<0.000000e+00> : vector<8xf32>
    %287 = vector.multi_reduction <add>, %286, %cst_110 [1] : vector<8x32xf32> to vector<8xf32>
    %288 = vector.shape_cast %287 : vector<8xf32> to vector<8x1xf32>
    %cst_111 = arith.constant 3.200000e+01 : f32
    %289 = vector.broadcast %cst_111 : f32 to vector<8x1xf32>
    %290 = arith.divf %288, %289 : vector<8x1xf32>
    %291 = vector.broadcast %283 : vector<8x1xf32> to vector<8x32xf32>
    %292 = arith.subf %279, %291 : vector<8x32xf32>
    %cst_112 = arith.constant 9.99999974E-6 : f32
    %293 = vector.broadcast %cst_112 : f32 to vector<8x1xf32>
    %294 = arith.addf %290, %293 : vector<8x1xf32>
    %295 = math.rsqrt %294 : vector<8x1xf32>
    %296 = vector.broadcast %295 : vector<8x1xf32> to vector<8x32xf32>
    %297 = arith.mulf %292, %296 : vector<8x32xf32>
    %298 = vector.broadcast %162 : vector<1x32xf32> to vector<8x32xf32>
    %299 = arith.mulf %297, %298 : vector<8x32xf32>
    %300 = vector.broadcast %163 : vector<1x32xf32> to vector<8x32xf32>
    %301 = arith.addf %299, %300 : vector<8x32xf32>
    %c0_113 = arith.constant 0 : index
    %c0_114 = arith.constant 0 : index
    %302 = vector.load %arg26[%c0_113, %c0_114] : memref<32x16xf32, #tpu.memory_space<vmem>>, vector<32x16xf32>
    %c0_115 = arith.constant 0 : index
    %c0_116 = arith.constant 0 : index
    %303 = vector.load %arg27[%c0_115, %c0_116] : memref<1x16xf32, #tpu.memory_space<vmem>>, vector<1x16xf32>
    %304 = arith.truncf %301 : vector<8x32xf32> to vector<8x32xbf16>
    %305 = arith.truncf %302 : vector<32x16xf32> to vector<32x16xbf16>
    %cst_117 = arith.constant dense<0.000000e+00> : vector<8x16xf32>
    %306 = tpu.matmul %304, %305, %cst_117 {dimension_numbers = #tpu.dot_dimension_numbers<[1], [0], [0], [1], [0, 0, 1, 1], [], []>} : vector<8x32xbf16>, vector<32x16xbf16>, vector<8x16xf32> -> vector<8x16xf32>
    %307 = vector.broadcast %303 : vector<1x16xf32> to vector<8x16xf32>
    %308 = arith.addf %306, %307 : vector<8x16xf32>
    %c0_118 = arith.constant 0 : index
    %c0_119 = arith.constant 0 : index
    %c0_120 = arith.constant 0 : index
    %309 = vector.load %arg28[%c0_118, %c0_119, %c0_120] : memref<1x8x16xf32, #tpu.memory_space<vmem>>, vector<1x8x16xf32>
    %310 = vector.shape_cast %309 : vector<1x8x16xf32> to vector<8x16xf32>
    %311 = vector.shape_cast %308 : vector<8x16xf32> to vector<1x8x16xf32>
    tpu.vector_store %arg28[%c0_118, %c0_119, %c0_120], %311 {strides = array<i32>} : memref<1x8x16xf32, #tpu.memory_space<vmem>>, vector<1x8x16xf32>,
    return
  }
  func.func @transform_0(%arg0: i32) -> (i32, i32, i32) {
    %c0_i32 = arith.constant 0 : i32
    %c0_i32_0 = arith.constant 0 : i32
    %c0_i32_1 = arith.constant 0 : i32
    return %arg0, %c0_i32, %c0_i32_0 : i32, i32, i32
  }
  func.func @transform_1(%arg0: i32) -> (i32, i32) {
    %c0_i32 = arith.constant 0 : i32
    %c0_i32_0 = arith.constant 0 : i32
    %c0_i32_1 = arith.constant 0 : i32
    return %c0_i32, %c0_i32_0 : i32, i32
  }
  func.func @transform_2(%arg0: i32) -> (i32, i32) {
    %c0_i32 = arith.constant 0 : i32
    %c0_i32_0 = arith.constant 0 : i32
    %c0_i32_1 = arith.constant 0 : i32
    return %c0_i32, %c0_i32_0 : i32, i32
  }
  func.func @transform_3(%arg0: i32) -> (i32, i32) {
    %c0_i32 = arith.constant 0 : i32
    %c0_i32_0 = arith.constant 0 : i32
    %c0_i32_1 = arith.constant 0 : i32
    return %c0_i32, %c0_i32_0 : i32, i32
  }
  func.func @transform_4(%arg0: i32) -> (i32, i32) {
    %c0_i32 = arith.constant 0 : i32
    %c0_i32_0 = arith.constant 0 : i32
    %c0_i32_1 = arith.constant 0 : i32
    return %c0_i32, %c0_i32_0 : i32, i32
  }
  func.func @transform_5(%arg0: i32) -> (i32, i32) {
    %c0_i32 = arith.constant 0 : i32
    %c0_i32_0 = arith.constant 0 : i32
    %c0_i32_1 = arith.constant 0 : i32
    return %c0_i32, %c0_i32_0 : i32, i32
  }
  func.func @transform_6(%arg0: i32) -> (i32, i32) {
    %c0_i32 = arith.constant 0 : i32
    %c0_i32_0 = arith.constant 0 : i32
    %c0_i32_1 = arith.constant 0 : i32
    return %c0_i32, %c0_i32_0 : i32, i32
  }
  func.func @transform_7(%arg0: i32) -> (i32, i32) {
    %c0_i32 = arith.constant 0 : i32
    %c0_i32_0 = arith.constant 0 : i32
    %c0_i32_1 = arith.constant 0 : i32
    return %c0_i32, %c0_i32_0 : i32, i32
  }
  func.func @transform_8(%arg0: i32) -> (i32, i32) {
    %c0_i32 = arith.constant 0 : i32
    %c0_i32_0 = arith.constant 0 : i32
    %c0_i32_1 = arith.constant 0 : i32
    return %c0_i32, %c0_i32_0 : i32, i32
  }
  func.func @transform_9(%arg0: i32) -> (i32, i32) {
    %c0_i32 = arith.constant 0 : i32
    %c0_i32_0 = arith.constant 0 : i32
    %c0_i32_1 = arith.constant 0 : i32
    return %c0_i32, %c0_i32_0 : i32, i32
  }
  func.func @transform_10(%arg0: i32) -> (i32, i32) {
    %c0_i32 = arith.constant 0 : i32
    %c0_i32_0 = arith.constant 0 : i32
    %c0_i32_1 = arith.constant 0 : i32
    return %c0_i32, %c0_i32_0 : i32, i32
  }
  func.func @transform_11(%arg0: i32) -> (i32, i32) {
    %c0_i32 = arith.constant 0 : i32
    %c0_i32_0 = arith.constant 0 : i32
    %c0_i32_1 = arith.constant 0 : i32
    return %c0_i32, %c0_i32_0 : i32, i32
  }
  func.func @transform_12(%arg0: i32) -> (i32, i32) {
    %c0_i32 = arith.constant 0 : i32
    %c0_i32_0 = arith.constant 0 : i32
    %c0_i32_1 = arith.constant 0 : i32
    return %c0_i32, %c0_i32_0 : i32, i32
  }
  func.func @transform_13(%arg0: i32) -> (i32, i32) {
    %c0_i32 = arith.constant 0 : i32
    %c0_i32_0 = arith.constant 0 : i32
    %c0_i32_1 = arith.constant 0 : i32
    return %c0_i32, %c0_i32_0 : i32, i32
  }
  func.func @transform_14(%arg0: i32) -> (i32, i32) {
    %c0_i32 = arith.constant 0 : i32
    %c0_i32_0 = arith.constant 0 : i32
    %c0_i32_1 = arith.constant 0 : i32
    return %c0_i32, %c0_i32_0 : i32, i32
  }
  func.func @transform_15(%arg0: i32) -> (i32, i32) {
    %c0_i32 = arith.constant 0 : i32
    %c0_i32_0 = arith.constant 0 : i32
    %c0_i32_1 = arith.constant 0 : i32
    return %c0_i32, %c0_i32_0 : i32, i32
  }
  func.func @transform_16(%arg0: i32) -> (i32, i32) {
    %c0_i32 = arith.constant 0 : i32
    %c0_i32_0 = arith.constant 0 : i32
    %c0_i32_1 = arith.constant 0 : i32
    return %c0_i32, %c0_i32_0 : i32, i32
  }
  func.func @transform_17(%arg0: i32) -> (i32, i32) {
    %c0_i32 = arith.constant 0 : i32
    %c0_i32_0 = arith.constant 0 : i32
    %c0_i32_1 = arith.constant 0 : i32
    return %c0_i32, %c0_i32_0 : i32, i32
  }
  func.func @transform_18(%arg0: i32) -> (i32, i32) {
    %c0_i32 = arith.constant 0 : i32
    %c0_i32_0 = arith.constant 0 : i32
    %c0_i32_1 = arith.constant 0 : i32
    return %c0_i32, %c0_i32_0 : i32, i32
  }
  func.func @transform_19(%arg0: i32) -> (i32, i32) {
    %c0_i32 = arith.constant 0 : i32
    %c0_i32_0 = arith.constant 0 : i32
    %c0_i32_1 = arith.constant 0 : i32
    return %c0_i32, %c0_i32_0 : i32, i32
  }
  func.func @transform_20(%arg0: i32) -> (i32, i32) {
    %c0_i32 = arith.constant 0 : i32
    %c0_i32_0 = arith.constant 0 : i32
    %c0_i32_1 = arith.constant 0 : i32
    return %c0_i32, %c0_i32_0 : i32, i32
  }
  func.func @transform_21(%arg0: i32) -> (i32, i32) {
    %c0_i32 = arith.constant 0 : i32
    %c0_i32_0 = arith.constant 0 : i32
    %c0_i32_1 = arith.constant 0 : i32
    return %c0_i32, %c0_i32_0 : i32, i32
  }
  func.func @transform_22(%arg0: i32) -> (i32, i32) {
    %c0_i32 = arith.constant 0 : i32
    %c0_i32_0 = arith.constant 0 : i32
    %c0_i32_1 = arith.constant 0 : i32
    return %c0_i32, %c0_i32_0 : i32, i32
  }
  func.func @transform_23(%arg0: i32) -> (i32, i32) {
    %c0_i32 = arith.constant 0 : i32
    %c0_i32_0 = arith.constant 0 : i32
    %c0_i32_1 = arith.constant 0 : i32
    return %c0_i32, %c0_i32_0 : i32, i32
  }
  func.func @transform_24(%arg0: i32) -> (i32, i32) {
    %c0_i32 = arith.constant 0 : i32
    %c0_i32_0 = arith.constant 0 : i32
    %c0_i32_1 = arith.constant 0 : i32
    return %c0_i32, %c0_i32_0 : i32, i32
  }
  func.func @transform_25(%arg0: i32) -> (i32, i32) {
    %c0_i32 = arith.constant 0 : i32
    %c0_i32_0 = arith.constant 0 : i32
    %c0_i32_1 = arith.constant 0 : i32
    return %c0_i32, %c0_i32_0 : i32, i32
  }
  func.func @transform_26(%arg0: i32) -> (i32, i32) {
    %c0_i32 = arith.constant 0 : i32
    %c0_i32_0 = arith.constant 0 : i32
    %c0_i32_1 = arith.constant 0 : i32
    return %c0_i32, %c0_i32_0 : i32, i32
  }
  func.func @transform_27(%arg0: i32) -> (i32, i32, i32) {
    %c0_i32 = arith.constant 0 : i32
    %c0_i32_0 = arith.constant 0 : i32
    %c0_i32_1 = arith.constant 0 : i32
    return %arg0, %c0_i32, %c0_i32_0 : i32, i32, i32
  }
}

</mosaic_0001>

<bundles_post_ra>
// kernel: transformer_model_forward.1
= control target key start
LH: loop header
LB: loop body
LE: loop exit
PB: predicated region body
PF: predicated region fallthrough
CT: control target
= control target key end

     0   :  { %s8432_s0 = inlined_call_operand.vmem [shape: f32[2,8,32], index: 0, kind: input, shape index: {}]   ;;  %s8433_s1 = inlined_call_operand.vmem [shape: f32[32,96], index: 1, kind: input, shape index: {}]   ;;  %s8434_s2 = inlined_call_operand.vmem [shape: f32[1,96], index: 2, kind: input, shape index: {}]   ;;  %s8435_s3 = inlined_call_operand.vmem [shape: f32[32,32], index: 3, kind: input, shape index: {}]   ;;  %s8436_s4 = inlined_call_operand.vmem [shape: f32[1,32], index: 4, kind: input, shape index: {}]   ;;  %s8437_s5 = inlined_call_operand.vmem [shape: f32[32,2048], index: 5, kind: input, shape index: {}]   ;;  %s8438_s6 = inlined_call_operand.vmem [shape: f32[1,2048], index: 6, kind: input, shape index: {}]   ;;  %s8439_s7 = inlined_call_operand.vmem [shape: f32[2048,32], index: 7, kind: input, shape index: {}]   ;;  %s8440_s8 = inlined_call_operand.vmem [shape: f32[1,32], index: 8, kind: input, shape index: {}]   ;;  %s8441_s9 = inlined_call_operand.vmem [shape: f32[1,32], index: 9, kind: input, shape index: {}]   ;;  %s8442_s10 = inlined_call_operand.vmem [shape: f32[1,32], index: 10, kind: input, shape index: {}]   ;;  %s8443_s11 = inlined_call_operand.vmem [shape: f32[1,32], index: 11, kind: input, shape index: {}]   ;;  %s8444_s12 = inlined_call_operand.vmem [shape: f32[1,32], index: 12, kind: input, shape index: {}]   ;;  %s8445_s13 = inlined_call_operand.vmem [shape: f32[32,96], index: 13, kind: input, shape index: {}]   ;;  %s8446_s14 = inlined_call_operand.vmem [shape: f32[1,96], index: 14, kind: input, shape index: {}]   ;;  %s8447_s15 = inlined_call_operand.vmem [shape: f32[32,32], index: 15, kind: input, shape index: {}]   ;;  %s8448_s16 = inlined_call_operand.vmem [shape: f32[1,32], index: 16, kind: input, shape index: {}]   ;;  %s8449_s17 = inlined_call_operand.vmem [shape: f32[32,2048], index: 17, kind: input, shape index: {}]   ;;  %s8450_s18 = inlined_call_operand.vmem [shape: f32[1,2048], index: 18, kind: input, shape index: {}]   ;;  %s8451_s19 = inlined_call_operand.vmem [shape: f32[2048,32], index: 19, kind: input, shape index: {}]   ;;  %s8452_s20 = inlined_call_operand.vmem [shape: f32[1,32], index: 20, kind: input, shape index: {}]   ;;  %s8453_s21 = inlined_call_operand.vmem [shape: f32[1,32], index: 21, kind: input, shape index: {}]   ;;  %s8454_s22 = inlined_call_operand.vmem [shape: f32[1,32], index: 22, kind: input, shape index: {}]   ;;  %s8455_s23 = inlined_call_operand.vmem [shape: f32[1,32], index: 23, kind: input, shape index: {}]   ;;  %s8456_s24 = inlined_call_operand.vmem [shape: f32[1,32], index: 24, kind: input, shape index: {}]   ;;  %s8457_s25 = inlined_call_operand.vmem [shape: f32[32,16], index: 25, kind: input, shape index: {}]   ;;  %s8458_s26 = inlined_call_operand.vmem [shape: f32[1,16], index: 26, kind: input, shape index: {}]   ;;  %s8459_s27 = inlined_call_operand.vmem [shape: f32[2,8,16], index: 27, kind: output, shape index: {}]  }
   0x1   :  { %8484 = sst [smem:[#allocation3_spill]] %s8432_s0 }
   0x2   :  { %8485 = sst [smem:[#allocation4_spill]] %s8433_s1 }
   0x3   :  { %8486 = sst [smem:[#allocation5_spill]] %s8434_s2 }
   0x4   :  { %8487 = sst [smem:[#allocation6_spill]] %s8435_s3 }
   0x5   :  { %8488 = sst [smem:[#allocation7_spill]] %s8436_s4 }
   0x6   :  { %8489 = sst [smem:[#allocation8_spill]] %s8437_s5 }
   0x7   :  { %8490 = sst [smem:[#allocation9_spill]] %s8438_s6 }
   0x8   :  { %8491 = sst [smem:[#allocation10_spill]] %s8439_s7  ;;  %s5960_s7 = smov 0  }
   0x9   :  { %8492 = sst [smem:[#allocation11_spill]] %s8440_s8 }
   0xa   :  { %8493 = sst [smem:[#allocation12_spill]] %s8441_s9 }
   0xb   :  { %8494 = sst [smem:[#allocation13_spill]] %s8442_s10 }
   0xc   :  { %8495 = sst [smem:[#allocation14_spill]] %s8443_s11 }
   0xd LB: > { %8496 = sst [smem:[#allocation2_spill]] %s5801_s7  ;;  %s5142_s4 = sadd.s32 4294967295, %s5801_s7   ;;  %s5801_s7 = sphi %s5960_s7, %s37_s7  }
   0xe   : > { %p5146_p0 = scmp.ge.s32.totalorder %s5801_s7, 1  ;;  %p736_p1 = scmp.lt.s32.totalorder %s5801_s7, 3 }
  0x10   : > { %p737_p2 = pnand %p5146_p0, %p736_p1 }
  0x11   : > { %s8497_s9 = sld [smem:[#allocation4_spill]] (!%p737_p2)  ;;  %p806_p3 = scmp.lt.s32.totalorder (!%p737_p2), %s5142_s4, 1 }
  0x12   : > { %740 = sbr.rel (%p737_p2) target bundleno = 5700 (0x1644), region = 128  ;;  %s8498_s3 = sld [smem:[#allocation3_spill]] (!%p737_p2) }
  0x13   : > { %s8499_s28 = sld [smem:[#allocation5_spill]] (!%p737_p2)  ;;  %s8468_s0 = smov (!%p737_p2), 64  }
  0x14   : > { %s8478_s10 = smov (!%p737_p2), 96   ;;  %s8479_s29 = smov (!%p737_p2), 88  }
  0x15   : > { %s8473_s1 = smov (!%p737_p2), 120   ;;  %s8471_s11 = smov (!%p737_p2), 80  }
  0x16   : > { %s8470_s2 = smov (!%p737_p2), 72   ;;  %s8469_s30 = smov (!%p737_p2), 56  }
  0x17   : > { %v818_v0 = vld [vmem:[%s8497_s9 + $0x10] sm:$0xff]  ;;  %v819_v1 = vld [vmem:[%s8497_s9 + $0x18] sm:$0xff]  ;;  %v816_v2 = vld [vmem:[%s8497_s9] sm:$0xff]  ;;  %v5803_v3 = vmov 0.0   ;;  %vm5804_vm0 = vmmov 0   ;;  %s8526_s4 = smov (!%p806_p3, %s5142_s4), 1 }
  0x18   : > { %5610 = vmatprep.subr.bf16.mxu0 %v5803_v3  ;;  %v1155_v4 = vpack.c.bf16 %v819_v1, %v818_v0  ;;  %v817_v5 = vld [vmem:[%s8497_s9 + $0x8] sm:$0xff]  ;;  %5614 = vmatprep.mubr.msk.bf16.mxu0 %vm5804_vm0, %v5803_v3  ;;  %s8465_s6 = sshll.u32 %s8526_s4, 3  ;;  %vm1162_vm1 = vcmask 261120   ;;  %vm1210_vm2 = vcmask 64512   ;;  %s8466_s5 = smov 40   ;;  %vm1881_vm3 = vcmask 130048  }
  0x19   : > { %5618 = vmatprep.subr.mxu1 %v5803_v3  ;;  %5620 = vmatprep.mubr.msk.f32.mxu1 %vm5804_vm0, %v5803_v3  ;;  %v1154_v6 = vpack.c.bf16 %v817_v5, %v816_v2  ;;  %s809_s8 = scalar_lea.vmem %s8498_s3, %s8465_s6  ;;  %v5149_v9 = vld [vmem:[%s8499_s28] ss:$0 sm:$0xff]  ;;  %s8477_s3 = smov 112   ;;  %vm1883_vm4 = vcmask 195584  }
  0x1a   : > { %5611 = vmatpush3.bf16.msra.mxu0 %v1155_v4  ;;  %v5995_v7 = vld [vmem:[%s809_s8] sm:$0xff]  ;;  %s8472_s8 = smov 104   ;;  %s8467_s28 = smov 48  }
  0x1b   : > { %5612 = vmatprep.subr.bf16.mxu0 %v5803_v3  ;;  %v1153_v8 = vpack.c.bf16 %v5995_v7, %v5995_v7  ;;  %s8476_s6 = smov 8   ;;  %s8505_s9 = sld [smem:[#allocation10_spill]] }
  0x1c   : > { %s8514_s7 = smov 80  }
  0x1e   : > { %5613 = vmatpush3.bf16.msra.mxu0 %v1154_v6 }
  0x1f   : > { %5633 = vmatprep.subr.mxu0 %v5803_v3 }
  0x21   : > { %5615 = vmatmul.mubr.msk.bf16.vlgmr.msra.gmra.mxu0 %vm1162_vm1, %v1153_v8 }
  0x22   : > { %5635 = vmatprep.mubr.msk.f32.mxu0 %vm5804_vm0, %v5803_v3 }
  0xe1   : > { %v1200_v10 = vpop.f32.mrf.mxu0 }
  0xe2   : > { %v6006_v11 = vadd.f32 %v5149_v9, %v1200_v10 }
  0xe3   : > { %v5616_v12 = vpop.f32.mrf.mxu0 }
  0xe4   : > { %1297 = vrot.lane.b32.xlu1 %v6006_v11, %s8468_s0  ;;  %1208 = vrot.lane.b32.xlu0 %v6006_v11, %s8478_s10  ;;  %v1206_v15 = vmul.f32 0.35355338, %v6006_v11  ;;  %s8475_s0 = smov 16   ;;  %s8513_s10 = smov 104  }
  0xe5   : > { %v1203_v13 = vpop.f32.mrf.mxu0 }
  0xe7   : > { %v5617_v14 = vpop.f32.mrf.mxu0 }
  0xe8   : > { %1375 = vrot.lane.b32.xlu1 %v6006_v11, %s8479_s29  ;;  %s8516_s29 = smov 56  }
  0xec   : > { %1373 = vrot.lane.b32.xlu1 %v1206_v15, %s8473_s1  ;;  %s8502_s1 = sld [smem:[#allocation8_spill]] }
  0xf0   : > { %1540 = vrot.lane.b32.xlu1 %v6006_v11, %s8471_s11  ;;  %s8510_s11 = smov 96  }
 0x156   : > { %v1209_v16 = vpop.permute.xlu0 %1208  ;;  %v1298_v17 = vpop.permute.xlu1 %1297 }
 0x157   : > { %5619 = vmatpush3.xpose.msk.msra.mxu1 %vm1210_vm2, %v1209_v16 }
 0x158   : > { %5623 = vmatprep.subr.mxu1 %v5803_v3 }
 0x15a   : > { %5621 = vmatmul.mubr.msk.f32.vlgmr.msra.gmra.mxu1 %vm1210_vm2, %v1206_v15  ;;  %v1376_v26 = vpop.permute.xlu1 %1375 }
 0x15b   : > { %5624 = vmatpush3.msra.mxu1 %v1298_v17  ;;  %5625 = vmatprep.mubr.msk.f32.mxu1 %vm5804_vm0, %v5803_v3 }
 0x15c   : > { %5628 = vmatprep.subr.mxu1 %v5803_v3 }
 0x15e   : > { %v1374_v27 = vpop.permute.xlu1 %1373 }
 0x162   : > { %v1541_v28 = vpop.permute.xlu1 %1540 }
 0x21a   : > { %v1282_v18 = vpop.f32.mrf.mxu1 }
 0x21b   : > { %v1286_v19 = vsel %vm1210_vm2, %v1282_v18, -inf }
 0x21c   : > { %1287 = vmax.xlane.f32.xlu0 %v1286_v19  ;;  %v5622_v20 = vpop.f32.mrf.mxu1 }
 0x232   : > { %1705 = vrot.lane.b32.xlu0 %v6006_v11, %s8470_s2  ;;  %s8501_s2 = sld [smem:[#allocation7_spill]] }
 0x2a5   : > { %v1288_v21 = vpop.xlane.xlu0 %1287 }
 0x2a6   : > { %v1289_v22 = vsub.f32 %v1282_v18, %v1288_v21 }
 0x2a8   : > { %v1290_v23 = vmul.f32 1.442695, %v1289_v22 }
 0x2a9   : > { %v1706_v33 = vpop.permute.xlu0 %1705 }
 0x2aa   : > { %5755 = vpow2.f32 %v1290_v23 }
 0x2b7   : > { %v5756_v24 = vpop.eup %5755 }
 0x2b8   : > { %v1292_v25 = vsel %vm1210_vm2, %v5756_v24, 0.0 }
 0x2b9   : > { %1293 = vadd.xlane.f32.xlu1 %v1292_v25 }
 0x2ca   : > { %1538 = vrot.lane.b32.xlu1 %v1206_v15, %s8477_s3  ;;  %s8517_s3 = smov 64  }
 0x2ce   : > { %1703 = vrot.lane.b32.xlu1 %v1206_v15, %s8472_s8  ;;  %s8506_s8 = sld [smem:[#allocation9_spill]] }
 0x342   : > { %v1294_v29 = vpop.xlane.xlu1 %1293 }
 0x343   : > { %5757 = vrcp.f32 %v1294_v29 }
 0x346   : > { %v1539_v32 = vpop.permute.xlu1 %1538 }
 0x34a   : > { %v1704_v34 = vpop.permute.xlu1 %1703 }
 0x350   : > { %v5758_v30 = vpop.eup %5757 }
 0x351   : > { %v1296_v31 = vmul.f32 %v5758_v30, %v5756_v24  ;;  %v5163_v30 = vld [vmem:[%s8501_s2] ss:$0 sm:$0xff]  ;;  %s8519_s2 = smov 40  }
 0x353   : > { %5626 = vmatmul.mubr.msk.f32.vlgmr.msra.gmra.mxu1 %vm1210_vm2, %v1296_v31 }
 0x354   : > { %5629 = vmatpush3.xpose.msk.msra.mxu1 %vm1210_vm2, %v1376_v26  ;;  %5630 = vmatprep.mubr.msk.f32.mxu1 %vm5804_vm0, %v5803_v3 }
 0x355   : > { %5638 = vmatprep.subr.mxu1 %v5803_v3 }
 0x357   : > { %5631 = vmatmul.mubr.msk.f32.vlgmr.msra.gmra.mxu1 %vm1210_vm2, %v1374_v27 }
 0x358   : > { %5639 = vmatpush3.xpose.msk.msra.mxu1 %vm1210_vm2, %v1541_v28  ;;  %5640 = vmatprep.mubr.msk.f32.mxu1 %vm5804_vm0, %v5803_v3 }
 0x359   : > { %5648 = vmatprep.subr.mxu1 %v5803_v3 }
 0x35b   : > { %5641 = vmatmul.mubr.msk.f32.vlgmr.msra.gmra.mxu1 %vm1210_vm2, %v1539_v32 }
 0x35c   : > { %5649 = vmatpush3.xpose.msk.msra.mxu1 %vm1210_vm2, %v1706_v33  ;;  %5650 = vmatprep.mubr.msk.f32.mxu1 %vm5804_vm0, %v5803_v3 }
 0x35d   : > { %5658 = vmatprep.subr.bf16.mxu1 %v5803_v3 }
 0x35f   : > { %5651 = vmatmul.mubr.msk.f32.vlgmr.msra.gmra.mxu1 %vm1210_vm2, %v1704_v34 }
 0x360   : > { %5662 = vmatprep.mubr.msk.bf16.mxu1 %vm5804_vm0, %v5803_v3 }
 0x413   : > { %v6048_v35 = vpop.f32.mrf.mxu1 }
 0x415   : > { %v5627_v36 = vpop.f32.mrf.mxu1 }
 0x417   : > { %v1447_v37 = vpop.f32.mrf.mxu1 }
 0x418   : > { %v1451_v38 = vsel %vm1210_vm2, %v1447_v37, -inf }
 0x419   : > { %1452 = vmax.xlane.f32.xlu1 %v1451_v38  ;;  %v5632_v39 = vpop.f32.mrf.mxu1 }
 0x41b   : > { %v1612_v40 = vpop.f32.mrf.mxu1 }
 0x41c   : > { %v1616_v41 = vsel %vm1210_vm2, %v1612_v40, -inf }
 0x41d   : > { %1617 = vmax.xlane.f32.xlu0 %v1616_v41  ;;  %v5642_v42 = vpop.f32.mrf.mxu1 }
 0x41f   : > { %v1777_v43 = vpop.f32.mrf.mxu1 }
 0x420   : > { %v1781_v44 = vsel %vm1210_vm2, %v1777_v43, -inf }
 0x421   : > { %1782 = vmax.xlane.f32.xlu1 %v1781_v44  ;;  %v5652_v45 = vpop.f32.mrf.mxu1  ;;  %v861_v44 = vld [vmem:[%s8502_s1 + $0x118] sm:$0xff] }
 0x432   : > { %1462 = vrot.lane.b32.xlu1 %v6006_v11, %s8469_s30  ;;  %s8474_s30 = smov 24  }
 0x4a2   : > { %v1453_v46 = vpop.xlane.xlu1 %1452 }
 0x4a3   : > { %v1454_v47 = vsub.f32 %v1447_v37, %v1453_v46  ;;  %v877_v46 = vld [vmem:[%s8502_s1 + $0x198] sm:$0xff] }
 0x4a5   : > { %v1455_v48 = vmul.f32 1.442695, %v1454_v47  ;;  %v858_v47 = vld [vmem:[%s8502_s1 + $0x100] sm:$0xff] }
 0x4a6   : > { %v1618_v49 = vpop.xlane.xlu0 %1617 }
 0x4a7   : > { %5759 = vpow2.f32 %v1455_v48  ;;  %v1619_v50 = vsub.f32 %v1612_v40, %v1618_v49  ;;  %v874_v48 = vld [vmem:[%s8502_s1 + $0x180] sm:$0xff]  ;;  %v1986_v49 = vpack.c.bf16 %v877_v46, %v861_v44  ;;  %v868_v46 = vld [vmem:[%s8502_s1 + $0x150] sm:$0xff] }
 0x4a9   : > { %v1620_v51 = vmul.f32 1.442695, %v1619_v50  ;;  %v1983_v50 = vpack.c.bf16 %v874_v48, %v858_v47  ;;  %v884_v47 = vld [vmem:[%s8502_s1 + $0x1d0] sm:$0xff]  ;;  %v835_v48 = vld [vmem:[%s8502_s1 + $0x48] sm:$0xff] }
 0x4aa   : > { %v1783_v52 = vpop.xlane.xlu1 %1782 }
 0x4ab   : > { %5761 = vpow2.f32 %v1620_v51  ;;  %v1784_v53 = vsub.f32 %v1777_v43, %v1783_v52  ;;  %v859_v43 = vld [vmem:[%s8502_s1 + $0x108] sm:$0xff]  ;;  %v860_v51 = vld [vmem:[%s8502_s1 + $0x110] sm:$0xff] }
 0x4ac   : > { %v876_v52 = vld [vmem:[%s8502_s1 + $0x190] sm:$0xff] }
 0x4ad   : > { %v1785_v54 = vmul.f32 1.442695, %v1784_v53  ;;  %v1985_v53 = vpack.c.bf16 %v876_v52, %v860_v51  ;;  %v853_v51 = vld [vmem:[%s8502_s1 + $0xd8] sm:$0xff] }
 0x4ae   : > { %v1463_v55 = vpop.permute.xlu1 %1462 }
 0x4af   : > { %5763 = vpow2.f32 %v1785_v54  ;;  %5634 = vmatpush3.msra.mxu0 %v1463_v55  ;;  %v827_v54 = vld [vmem:[%s8502_s1 + $0x8] sm:$0xff] }
 0x4b0   : > { %5643 = vmatprep.subr.mxu0 %v5803_v3  ;;  %v843_v55 = vld [vmem:[%s8502_s1 + $0x88] sm:$0xff] }
 0x4b4   : > { %v5760_v56 = vpop.eup %5759 }
 0x4b5   : > { %v1457_v57 = vsel %vm1210_vm2, %v5760_v56, 0.0 }
 0x4b6   : > { %1458 = vadd.xlane.f32.xlu1 %v1457_v57  ;;  %v1968_v57 = vpack.c.bf16 %v843_v55, %v827_v54  ;;  %v834_v54 = vld [vmem:[%s8502_s1 + $0x40] sm:$0xff] }
 0x4b7   : > { %v850_v55 = vld [vmem:[%s8502_s1 + $0xc0] sm:$0xff] }
 0x4b8   : > { %v5762_v58 = vpop.eup %5761 }
 0x4b9   : > { %v1622_v59 = vsel %vm1210_vm2, %v5762_v58, 0.0 }
 0x4ba   : > { %1623 = vadd.xlane.f32.xlu1 %v1622_v59  ;;  %v826_v59 = vld [vmem:[%s8502_s1] sm:$0xff] }
 0x4bc   : > { %v5764_v60 = vpop.eup %5763 }
 0x4bd   : > { %v1787_v61 = vsel %vm1210_vm2, %v5764_v60, 0.0 }
 0x4be   : > { %1788 = vadd.xlane.f32.xlu0 %v1787_v61 }
 0x4cb   : > { %1792 = vrot.lane.b32.xlu1 %v6006_v11, %s8466_s5  ;;  %s8504_s5 = sld [smem:[#allocation13_spill]] }
 0x4d4   : > { %1627 = vrot.lane.b32.xlu0 %v6006_v11, %s8467_s28  ;;  %s8500_s28 = sld [smem:[#allocation6_spill]] }
 0x4da   : > { %v823_v11 = vld [vmem:[%s8500_s28 + $0x10] sm:$0xff]  ;;  %v824_v12 = vld [vmem:[%s8500_s28 + $0x18] sm:$0xff]  ;;  %v821_v14 = vld [vmem:[%s8500_s28] sm:$0xff] }
 0x4db   : > { %v1887_v13 = vpack.c.bf16 %v824_v12, %v823_v11  ;;  %v822_v15 = vld [vmem:[%s8500_s28 + $0x8] sm:$0xff]  ;;  %s8507_s28 = sld [smem:[#allocation11_spill]] }
 0x4dc   : > { %v1886_v16 = vpack.c.bf16 %v822_v15, %v821_v14 }
 0x4dd   : > { %5659 = vmatpush3.bf16.msra.mxu1 %v1887_v13 }
 0x4de   : > { %5660 = vmatprep.subr.bf16.mxu1 %v5803_v3 }
 0x4e1   : > { %5661 = vmatpush3.bf16.msra.mxu1 %v1886_v16 }
 0x4e2   : > { %2137 = vmatprep.subr.bf16.mxu1 %v1986_v49  ;;  %v851_v49 = vld [vmem:[%s8502_s1 + $0xc8] sm:$0xff] }
 0x53f   : > { %v1459_v62 = vpop.xlane.xlu1 %1458 }
 0x540   : > { %5765 = vrcp.f32 %v1459_v62 }
 0x543   : > { %v1624_v63 = vpop.xlane.xlu1 %1623 }
 0x544   : > { %5767 = vrcp.f32 %v1624_v63  ;;  %v828_v63 = vld [vmem:[%s8502_s1 + $0x10] sm:$0xff] }
 0x547   : > { %v1789_v0 = vpop.xlane.xlu0 %1788  ;;  %v1793_v8 = vpop.permute.xlu1 %1792 }
 0x548   : > { %5769 = vrcp.f32 %v1789_v0  ;;  %v844_v0 = vld [vmem:[%s8502_s1 + $0x90] sm:$0xff] }
 0x54b   : > { %v1628_v4 = vpop.permute.xlu0 %1627 }
 0x54d   : > { %v5766_v1 = vpop.eup %5765 }
 0x54e   : > { %v1461_v2 = vmul.f32 %v5766_v1, %v5760_v56  ;;  %v829_v56 = vld [vmem:[%s8502_s1 + $0x18] sm:$0xff]  ;;  %v1969_v1 = vpack.c.bf16 %v844_v0, %v828_v63  ;;  %v1975_v0 = vpack.c.bf16 %v850_v55, %v834_v54  ;;  %v902_v54 = vld [vmem:[%s8505_s9 + $0x50] sm:$0xff] }
 0x54f   : > { %v889_v63 = vld [vmem:[%s8502_s1 + $0x1f8] sm:$0xff] }
 0x550   : > { %5636 = vmatmul.mubr.msk.f32.vlgmr.msra.gmra.mxu0 %vm1210_vm2, %v1461_v2  ;;  %v863_v2 = vld [vmem:[%s8502_s1 + $0x128] sm:$0xff]  ;;  %v903_v55 = vld [vmem:[%s8505_s9 + $0x58] sm:$0xff] }
 0x551   : > { %v5768_v5 = vpop.eup %5767  ;;  %5644 = vmatpush3.msra.mxu0 %v1628_v4  ;;  %5645 = vmatprep.mubr.msk.f32.mxu0 %vm5804_vm0, %v5803_v3  ;;  %v879_v4 = vld [vmem:[%s8502_s1 + $0x1a8] sm:$0xff] }
 0x552   : > { %5653 = vmatprep.subr.mxu0 %v5803_v3  ;;  %v1626_v6 = vmul.f32 %v5768_v5, %v5762_v58  ;;  %v845_v58 = vld [vmem:[%s8502_s1 + $0x98] sm:$0xff] }
 0x553   : > { %v1970_v61 = vpack.c.bf16 %v845_v58, %v829_v56  ;;  %v865_v5 = vld [vmem:[%s8502_s1 + $0x138] sm:$0xff]  ;;  %v1976_v56 = vpack.c.bf16 %v851_v49, %v835_v48  ;;  %v836_v58 = vld [vmem:[%s8502_s1 + $0x50] sm:$0xff] }
 0x554   : > { %5646 = vmatmul.mubr.msk.f32.vlgmr.msra.gmra.mxu0 %vm1210_vm2, %v1626_v6  ;;  %v5819_v6 = vmov 0   ;;  %v918_v48 = vld [vmem:[%s8505_s9 + $0xd0] sm:$0xff]  ;;  %v919_v49 = vld [vmem:[%s8505_s9 + $0xd8] sm:$0xff] }
 0x555   : > { %v5770_v9 = vpop.eup %5769  ;;  %5654 = vmatpush3.msra.mxu0 %v1793_v8  ;;  %5655 = vmatprep.mubr.msk.f32.mxu0 %vm5804_vm0, %v5803_v3  ;;  %v1988_v8 = vpack.c.bf16 %v879_v4, %v863_v2  ;;  %v870_v2 = vld [vmem:[%s8502_s1 + $0x160] sm:$0xff] }
 0x556   : > { %v1791_v10 = vmul.f32 %v5770_v9, %v5764_v60  ;;  %v842_v60 = vld [vmem:[%s8502_s1 + $0x80] sm:$0xff]  ;;  %v881_v9 = vld [vmem:[%s8502_s1 + $0x1b8] sm:$0xff] }
 0x557   : > { %v1967_v62 = vpack.c.bf16 %v842_v60, %v826_v59  ;;  %v852_v59 = vld [vmem:[%s8502_s1 + $0xd0] sm:$0xff]  ;;  %v871_v60 = vld [vmem:[%s8502_s1 + $0x168] sm:$0xff]  ;;  %v886_v4 = vld [vmem:[%s8502_s1 + $0x1e0] sm:$0xff] }
 0x558   : > { %5656 = vmatmul.mubr.msk.f32.vlgmr.msra.gmra.mxu0 %vm1210_vm2, %v1791_v10  ;;  %v1990_v10 = vpack.c.bf16 %v881_v9, %v865_v5  ;;  %v872_v9 = vld [vmem:[%s8502_s1 + $0x170] sm:$0xff] }
 0x559   : > { %2116 = vmatprep.mubr.bf16.mxu0 %v5819_v6 }
 0x610   : > { %v1534_v17 = vpop.f32.mrf.mxu0 }
 0x611   : > { %1869 = vrot.lane.b32.xlu1 %v1534_v17, %s8476_s6  ;;  %s8503_s6 = sld [smem:[#allocation12_spill]]  ;;  %v5166_v17 = vld [vmem:[%s8504_s5] ss:$0 sm:$0xff]  ;;  %s8509_s5 = smov 88  }
 0x612   : > { %v5637_v18 = vpop.f32.mrf.mxu0 }
 0x613   : > { %v862_v18 = vld [vmem:[%s8502_s1 + $0x120] sm:$0xff] }
 0x614   : > { %v1699_v19 = vpop.f32.mrf.mxu0 }
 0x615   : > { %1873 = vrot.lane.b32.xlu0 %v1699_v19, %s8475_s0  ;;  %v878_v19 = vld [vmem:[%s8502_s1 + $0x1a0] sm:$0xff]  ;;  %s8511_s0 = smov 112  }
 0x616   : > { %v5647_v20 = vpop.f32.mrf.mxu0 }
 0x617   : > { %v5165_v15 = vld [vmem:[%s8503_s6] ss:$0 sm:$0xff]  ;;  %s8518_s6 = smov 48  }
 0x618   : > { %v1864_v21 = vpop.f32.mrf.mxu0 }
 0x619   : > { %1877 = vrot.lane.b32.xlu1 %v1864_v21, %s8474_s30  ;;  %v864_v21 = vld [vmem:[%s8502_s1 + $0x130] sm:$0xff]  ;;  %s8512_s30 = smov 120  }
 0x61a   : > { %v5657_v22 = vpop.f32.mrf.mxu0 }
 0x61b   : > { %v880_v22 = vld [vmem:[%s8502_s1 + $0x1b0] sm:$0xff] }
 0x683   : > { %v1870_v23 = vpop.permute.xlu1 %1869 }
 0x684   : > { %v1880_v25 = vsel %vm1210_vm2, %v6048_v35, %v1870_v23  ;;  %v831_v23 = vld [vmem:[%s8502_s1 + $0x28] sm:$0xff] }
 0x687   : > { %v1874_v24 = vpop.permute.xlu0 %1873 }
 0x688   : > { %v1882_v26 = vsel %vm1881_vm3, %v1880_v25, %v1874_v24  ;;  %v847_v24 = vld [vmem:[%s8502_s1 + $0xa8] sm:$0xff]  ;;  %v833_v25 = vld [vmem:[%s8502_s1 + $0x38] sm:$0xff] }
 0x68b   : > { %v1878_v27 = vpop.permute.xlu1 %1877 }
 0x68c   : > { %v1884_v28 = vsel %vm1883_vm4, %v1882_v26, %v1878_v27  ;;  %v849_v26 = vld [vmem:[%s8502_s1 + $0xb8] sm:$0xff] }
 0x68d   : > { %v1885_v29 = vpack.c.bf16 %v1884_v28, %v1884_v28  ;;  %v1987_v28 = vpack.c.bf16 %v878_v19, %v862_v18  ;;  %v854_v18 = vld [vmem:[%s8502_s1 + $0xe0] sm:$0xff] }
 0x68f   : > { %5663 = vmatmul.mubr.msk.bf16.vlgmr.msra.gmra.mxu1 %vm1162_vm1, %v1885_v29  ;;  %v1989_v29 = vpack.c.bf16 %v880_v22, %v864_v21  ;;  %v840_v21 = vld [vmem:[%s8502_s1 + $0x70] sm:$0xff] }
 0x690   : > { %2138 = vmatpush1.bf16.msra.mxu1 %v1985_v53  ;;  %2157 = vmatprep.mubr.bf16.mxu1 %v5819_v6  ;;  %v1993_v53 = vpack.c.bf16 %v884_v47, %v868_v46  ;;  %v856_v22 = vld [vmem:[%s8502_s1 + $0xf0] sm:$0xff]  ;;  %v936_v46 = vld [vmem:[%s8505_s9 + $0x160] sm:$0xff]  ;;  %v937_v47 = vld [vmem:[%s8505_s9 + $0x168] sm:$0xff] }
 0x691   : > { %2139 = vmatprep.subr.bf16.mxu1 %v1970_v61  ;;  %v887_v61 = vld [vmem:[%s8502_s1 + $0x1e8] sm:$0xff] }
 0x692   : > { %v1996_v5 = vpack.c.bf16 %v887_v61, %v871_v60  ;;  %v917_v60 = vld [vmem:[%s8505_s9 + $0xc8] sm:$0xff]  ;;  %v948_v61 = vld [vmem:[%s8505_s9 + $0x1c0] sm:$0xff] }
 0x694   : > { %2140 = vmatpush1.bf16.msra.mxu1 %v1969_v1  ;;  %v1977_v1 = vpack.c.bf16 %v852_v59, %v836_v58  ;;  %v935_v58 = vld [vmem:[%s8505_s9 + $0x158] sm:$0xff]  ;;  %v916_v59 = vld [vmem:[%s8505_s9 + $0xc0] sm:$0xff] }
 0x695   : > { %2219 = vmatprep.subr.bf16.mxu1 %v1990_v10  ;;  %v888_v10 = vld [vmem:[%s8502_s1 + $0x1f0] sm:$0xff] }
 0x74f   : > { %v1931_v31 = vpop.f32.mrf.mxu1 }
 0x750   : > { %v1932_v32 = vadd.f32 %v5163_v30, %v1931_v31  ;;  %v830_v30 = vld [vmem:[%s8502_s1 + $0x20] sm:$0xff] }
 0x751   : > { %v5664_v33 = vpop.f32.mrf.mxu1  ;;  %v846_v31 = vld [vmem:[%s8502_s1 + $0xa0] sm:$0xff] }
 0x752   : > { %v1937_v34 = vadd.f32 %v1932_v32, %v5995_v7  ;;  %v875_v7 = vld [vmem:[%s8502_s1 + $0x188] sm:$0xff]  ;;  %v1972_v33 = vpack.c.bf16 %v847_v24, %v831_v23  ;;  %v922_v23 = vld [vmem:[%s8505_s9 + $0xf0] sm:$0xff]  ;;  %v923_v24 = vld [vmem:[%s8505_s9 + $0xf8] sm:$0xff] }
 0x753   : > { %v1934_v36 = vpop.f32.mrf.mxu1  ;;  %v1984_v45 = vpack.c.bf16 %v875_v7, %v859_v43  ;;  %v866_v43 = vld [vmem:[%s8502_s1 + $0x140] sm:$0xff] }
 0x754   : > { %v1938_v35 = vsel %vm1162_vm1, %v1937_v34, 0.0  ;;  %v832_v36 = vld [vmem:[%s8502_s1 + $0x30] sm:$0xff]  ;;  %v882_v7 = vld [vmem:[%s8502_s1 + $0x1c0] sm:$0xff] }
 0x755   : > { %1939 = vadd.xlane.f32.xlu0 %v1938_v35  ;;  %v5665_v37 = vpop.f32.mrf.mxu1  ;;  %2096 = vmatprep.subr.bf16.mxu0 %v1984_v45  ;;  %v848_v35 = vld [vmem:[%s8502_s1 + $0xb0] sm:$0xff]  ;;  %v1991_v52 = vpack.c.bf16 %v882_v7, %v866_v43  ;;  %v904_v43 = vld [vmem:[%s8505_s9 + $0x60] sm:$0xff]  ;;  %v905_v7 = vld [vmem:[%s8505_s9 + $0x68] sm:$0xff] }
 0x756   : > { %2097 = vmatpush1.bf16.msra.mxu0 %v1983_v50  ;;  %v867_v37 = vld [vmem:[%s8502_s1 + $0x148] sm:$0xff]  ;;  %v837_v50 = vld [vmem:[%s8502_s1 + $0x58] sm:$0xff] }
 0x757   : > { %2098 = vmatprep.subr.bf16.mxu0 %v1968_v57  ;;  %v1978_v57 = vpack.c.bf16 %v853_v51, %v837_v50  ;;  %v950_v50 = vld [vmem:[%s8505_s9 + $0x1d0] sm:$0xff]  ;;  %v951_v51 = vld [vmem:[%s8505_s9 + $0x1d8] sm:$0xff] }
 0x75a   : > { %2099 = vmatpush1.bf16.msra.mxu0 %v1967_v62  ;;  %v873_v62 = vld [vmem:[%s8502_s1 + $0x178] sm:$0xff] }
 0x75b   : > { %2178 = vmatprep.subr.bf16.mxu0 %v1988_v8  ;;  %v1998_v8 = vpack.c.bf16 %v889_v63, %v873_v62  ;;  %v949_v62 = vld [vmem:[%s8505_s9 + $0x1c8] sm:$0xff]  ;;  %v2449_v63 = vpack.c.bf16 %v903_v55, %v902_v54  ;;  %v892_v54 = vld [vmem:[%s8505_s9] sm:$0xff] }
 0x75c   : > { %v893_v55 = vld [vmem:[%s8505_s9 + $0x8] sm:$0xff] }
 0x7de   : > { %v1940_v38 = vpop.xlane.xlu0 %1939 }
 0x7df   : > { %v1942_v39 = vmul.f32 0.03125, %v1940_v38  ;;  %v883_v38 = vld [vmem:[%s8502_s1 + $0x1c8] sm:$0xff] }
 0x7e0   : > { %v1992_v44 = vpack.c.bf16 %v883_v38, %v867_v37  ;;  %v920_v37 = vld [vmem:[%s8505_s9 + $0xe0] sm:$0xff]  ;;  %v921_v38 = vld [vmem:[%s8505_s9 + $0xe8] sm:$0xff] }
 0x7e1   : > { %v1943_v40 = vsub.f32 %v1937_v34, %v1942_v39  ;;  %v1974_v34 = vpack.c.bf16 %v849_v26, %v833_v25  ;;  %v869_v39 = vld [vmem:[%s8502_s1 + $0x158] sm:$0xff]  ;;  %v954_v25 = vld [vmem:[%s8505_s9 + $0x1f0] sm:$0xff] }
 0x7e2   : > { %v955_v26 = vld [vmem:[%s8505_s9 + $0x1f8] sm:$0xff] }
 0x7e3   : > { %v1944_v41 = vmul.f32 %v1943_v40, %v1943_v40 }
 0x7e5   : > { %v1945_v42 = vsel %vm1162_vm1, %v1944_v41, 0.0  ;;  %v1971_v41 = vpack.c.bf16 %v846_v31, %v830_v30  ;;  %v906_v30 = vld [vmem:[%s8505_s9 + $0x70] sm:$0xff]  ;;  %v907_v31 = vld [vmem:[%s8505_s9 + $0x78] sm:$0xff] }
 0x7e6   : > { %1946 = vadd.xlane.f32.xlu1 %v1945_v42  ;;  %v1973_v42 = vpack.c.bf16 %v848_v35, %v832_v36  ;;  %v938_v36 = vld [vmem:[%s8505_s9 + $0x170] sm:$0xff]  ;;  %v939_v35 = vld [vmem:[%s8505_s9 + $0x178] sm:$0xff] }
 0x86f   : > { %v1947_v11 = vpop.xlane.xlu1 %1946 }
 0x870   : > { %v1948_v12 = vmul.f32 0.03125, %v1947_v11  ;;  %v839_v11 = vld [vmem:[%s8502_s1 + $0x68] sm:$0xff] }
 0x872   : > { %v1949_v13 = vadd.f32 1e-05, %v1948_v12  ;;  %v855_v12 = vld [vmem:[%s8502_s1 + $0xe8] sm:$0xff] }
 0x873   : > { %v1980_v19 = vpack.c.bf16 %v855_v12, %v839_v11  ;;  %v915_v11 = vld [vmem:[%s8505_s9 + $0xb8] sm:$0xff]  ;;  %v946_v12 = vld [vmem:[%s8505_s9 + $0x1b0] sm:$0xff] }
 0x874   : > { %5771 = vrsqrt.f32 %v1949_v13  ;;  %v841_v13 = vld [vmem:[%s8502_s1 + $0x78] sm:$0xff] }
 0x881   : > { %v5772_v14 = vpop.eup %5771 }
 0x882   : > { %v1951_v16 = vmul.f32 %v5772_v14, %v1943_v40  ;;  %v885_v40 = vld [vmem:[%s8502_s1 + $0x1d8] sm:$0xff] }
 0x883   : > { %v1994_v45 = vpack.c.bf16 %v885_v40, %v869_v39  ;;  %v857_v14 = vld [vmem:[%s8502_s1 + $0xf8] sm:$0xff]  ;;  %v952_v39 = vld [vmem:[%s8505_s9 + $0x1e0] sm:$0xff]  ;;  %v953_v40 = vld [vmem:[%s8505_s9 + $0x1e8] sm:$0xff] }
 0x884   : > { %v1958_v20 = vmul.f32 %v5165_v15, %v1951_v16  ;;  %v1995_v15 = vpack.c.bf16 %v886_v4, %v870_v2  ;;  %v1997_v16 = vpack.c.bf16 %v888_v10, %v872_v9  ;;  %v901_v2 = vld [vmem:[%s8505_s9 + $0x48] sm:$0xff]  ;;  %v2456_v4 = vpack.c.bf16 %v917_v60, %v916_v59  ;;  %v914_v10 = vld [vmem:[%s8505_s9 + $0xb0] sm:$0xff] }
 0x885   : > { %v933_v9 = vld [vmem:[%s8505_s9 + $0x148] sm:$0xff]  ;;  %v986_v60 = vld [vmem:[%s8505_s9 + $0x2f0] sm:$0xff] }
 0x886   : > { %v6190_v27 = vadd.f32 %v5166_v17, %v1958_v20  ;;  %v838_v17 = vld [vmem:[%s8502_s1 + $0x60] sm:$0xff]  ;;  %v1982_v20 = vpack.c.bf16 %v857_v14, %v841_v13  ;;  %v947_v13 = vld [vmem:[%s8505_s9 + $0x1b8] sm:$0xff]  ;;  %s8523_s1 = sshll.u32 %s8526_s4, 3 }
 0x888   : > { %v6200_v32 = vpack.c.bf16 %v6190_v27, %v6190_v27 }
 0x88a   : > { %5167 = vmatmul.mubr.msk.bf16.vlgmr.msra.gmra.mxu0 %vm1162_vm1, %v6200_v32  ;;  %5168 = vmatmul.mubr.msk.bf16.vlgmr.msra.gmra.mxu1 %vm1162_vm1, %v6200_v32 }
 0x88b   : > { %2179 = vmatpush1.bf16.msra.mxu0 %v1987_v28  ;;  %2220 = vmatpush1.bf16.msra.mxu1 %v1989_v29  ;;  %v1979_v28 = vpack.c.bf16 %v854_v18, %v838_v17  ;;  %v1981_v29 = vpack.c.bf16 %v856_v22, %v840_v21  ;;  %v899_v17 = vld [vmem:[%s8505_s9 + $0x38] sm:$0xff]  ;;  %v2455_v18 = vpack.c.bf16 %v915_v11, %v914_v10  ;;  %v912_v22 = vld [vmem:[%s8505_s9 + $0xa0] sm:$0xff] }
 0x88c   : > { %2180 = vmatprep.subr.bf16.mxu0 %v1972_v33  ;;  %2221 = vmatprep.subr.bf16.mxu1 %v1974_v34  ;;  %v2459_v33 = vpack.c.bf16 %v923_v24, %v922_v23  ;;  %v2475_v34 = vpack.c.bf16 %v955_v26, %v954_v25  ;;  %v931_v21 = vld [vmem:[%s8505_s9 + $0x138] sm:$0xff]  ;;  %v913_v23 = vld [vmem:[%s8505_s9 + $0xa8] sm:$0xff]  ;;  %v944_v24 = vld [vmem:[%s8505_s9 + $0x1a0] sm:$0xff] }
 0x88d   : > { %2198 = vmatprep.mubr.bf16.mxu0 %v5819_v6  ;;  %2239 = vmatprep.mubr.bf16.mxu1 %v5819_v6  ;;  %v945_v25 = vld [vmem:[%s8505_s9 + $0x1a8] sm:$0xff] }
 0x88f   : > { %2181 = vmatpush1.bf16.msra.mxu0 %v1971_v41  ;;  %2222 = vmatpush1.bf16.msra.mxu1 %v1973_v42  ;;  %v2451_v41 = vpack.c.bf16 %v907_v31, %v906_v30  ;;  %v2467_v42 = vpack.c.bf16 %v939_v35, %v938_v36  ;;  %v2454_v30 = vpack.c.bf16 %v913_v23, %v912_v22  ;;  %v929_v36 = vld [vmem:[%s8505_s9 + $0x128] sm:$0xff] }
 0x890   : > { %2260 = vmatprep.subr.bf16.mxu0 %v1992_v44  ;;  %2301 = vmatprep.subr.bf16.mxu1 %v1994_v45  ;;  %v2458_v44 = vpack.c.bf16 %v921_v38, %v920_v37  ;;  %v2474_v45 = vpack.c.bf16 %v953_v40, %v952_v39  ;;  %v2470_v31 = vpack.c.bf16 %v945_v25, %v944_v24  ;;  %v910_v38 = vld [vmem:[%s8505_s9 + $0x90] sm:$0xff]  ;;  %v911_v39 = vld [vmem:[%s8505_s9 + $0x98] sm:$0xff] }
 0x891   : > { %v942_v40 = vld [vmem:[%s8505_s9 + $0x190] sm:$0xff] }
 0x892   : > { %5169 = vmatmul.mubr.msk.bf16.vlgmr.msra.gmra.mxu0 %vm1162_vm1, %v6200_v32  ;;  %5170 = vmatmul.mubr.msk.bf16.vlgmr.msra.gmra.mxu1 %vm1162_vm1, %v6200_v32 }
 0x893   : > { %2261 = vmatpush1.bf16.msra.mxu0 %v1991_v52  ;;  %2302 = vmatpush1.bf16.msra.mxu1 %v1993_v53  ;;  %v2450_v52 = vpack.c.bf16 %v905_v7, %v904_v43  ;;  %v2466_v53 = vpack.c.bf16 %v937_v47, %v936_v46  ;;  %v894_v43 = vld [vmem:[%s8505_s9 + $0x10] sm:$0xff]  ;;  %v895_v7 = vld [vmem:[%s8505_s9 + $0x18] sm:$0xff] }
 0x894   : > { %2262 = vmatprep.subr.bf16.mxu0 %v1976_v56  ;;  %2303 = vmatprep.subr.bf16.mxu1 %v1978_v57  ;;  %v2457_v56 = vpack.c.bf16 %v919_v49, %v918_v48  ;;  %v2473_v57 = vpack.c.bf16 %v951_v51, %v950_v50  ;;  %v926_v46 = vld [vmem:[%s8505_s9 + $0x110] sm:$0xff]  ;;  %v927_v47 = vld [vmem:[%s8505_s9 + $0x118] sm:$0xff]  ;;  %v908_v49 = vld [vmem:[%s8505_s9 + $0x80] sm:$0xff] }
 0x895   : > { %2280 = vmatprep.mubr.bf16.mxu0 %v5819_v6  ;;  %2321 = vmatprep.mubr.bf16.mxu1 %v5819_v6  ;;  %v2461_v48 = vpack.c.bf16 %v927_v47, %v926_v46  ;;  %v909_v50 = vld [vmem:[%s8505_s9 + $0x88] sm:$0xff]  ;;  %v940_v51 = vld [vmem:[%s8505_s9 + $0x180] sm:$0xff] }
 0x897   : > { %2263 = vmatpush1.bf16.msra.mxu0 %v1975_v0  ;;  %2304 = vmatpush1.bf16.msra.mxu1 %v1977_v1  ;;  %v900_v1 = vld [vmem:[%s8505_s9 + $0x40] sm:$0xff] }
 0x898   : > { %2342 = vmatprep.subr.bf16.mxu0 %v1996_v5  ;;  %2383 = vmatprep.subr.bf16.mxu1 %v1998_v8  ;;  %v2472_v5 = vpack.c.bf16 %v949_v62, %v948_v61  ;;  %v932_v8 = vld [vmem:[%s8505_s9 + $0x140] sm:$0xff]  ;;  %v2448_v14 = vpack.c.bf16 %v901_v2, %v900_v1  ;;  %v987_v61 = vld [vmem:[%s8505_s9 + $0x2f8] sm:$0xff]  ;;  %v1018_v62 = vld [vmem:[%s8505_s9 + $0x3f0] sm:$0xff]  ;;  %v2001_v2 = vlaneseq }
 0x89a   : > { %5171 = vmatmul.mubr.msk.bf16.vlgmr.msra.gmra.mxu0 %vm1162_vm1, %v6200_v32  ;;  %5172 = vmatmul.mubr.msk.bf16.vlgmr.msra.gmra.mxu1 %vm1162_vm1, %v6200_v32 }
 0x89b   : > { %2343 = vmatpush1.bf16.msra.mxu0 %v1995_v15  ;;  %2384 = vmatpush1.bf16.msra.mxu1 %v1997_v16  ;;  %v2464_v15 = vpack.c.bf16 %v933_v9, %v932_v8  ;;  %v898_v16 = vld [vmem:[%s8505_s9 + $0x30] sm:$0xff]  ;;  %v6541_v9 = vld [vmem:[%s8506_s8] sm:$0xff] }
 0x89c   : > { %2344 = vmatprep.subr.bf16.mxu0 %v1980_v19  ;;  %2385 = vmatprep.subr.bf16.mxu1 %v1982_v20  ;;  %v2471_v19 = vpack.c.bf16 %v947_v13, %v946_v12  ;;  %v930_v20 = vld [vmem:[%s8505_s9 + $0x130] sm:$0xff]  ;;  %v2447_v26 = vpack.c.bf16 %v899_v17, %v898_v16 }
 0x89d   : > { %2362 = vmatprep.mubr.bf16.mxu0 %v5819_v6  ;;  %2403 = vmatprep.mubr.bf16.mxu1 %v5819_v6 }
 0x89f   : > { %2345 = vmatpush1.bf16.msra.mxu0 %v1979_v28  ;;  %2386 = vmatpush1.bf16.msra.mxu1 %v1981_v29  ;;  %v2463_v28 = vpack.c.bf16 %v931_v21, %v930_v20  ;;  %v896_v29 = vld [vmem:[%s8505_s9 + $0x20] sm:$0xff] }
 0x8a0   : > { %5233 = vmatprep.subr.bf16.mxu0 %v2459_v33  ;;  %5255 = vmatprep.subr.bf16.mxu1 %v2475_v34  ;;  %v897_v33 = vld [vmem:[%s8505_s9 + $0x28] sm:$0xff]  ;;  %v928_v34 = vld [vmem:[%s8505_s9 + $0x120] sm:$0xff] }
 0x8a1   : > { %v2446_v35 = vpack.c.bf16 %v897_v33, %v896_v29  ;;  %v2462_v37 = vpack.c.bf16 %v929_v36, %v928_v34  ;;  %v1002_v34 = vld [vmem:[%s8505_s9 + $0x370] sm:$0xff]  ;;  %v1003_v36 = vld [vmem:[%s8505_s9 + $0x378] sm:$0xff] }
 0x8a2   : > { %5173 = vmatmul.mubr.msk.bf16.vlgmr.msra.gmra.mxu0 %vm1162_vm1, %v6200_v32  ;;  %5174 = vmatmul.mubr.msk.bf16.vlgmr.msra.gmra.mxu1 %vm1162_vm1, %v6200_v32  ;;  %v934_v32 = vld [vmem:[%s8505_s9 + $0x150] sm:$0xff] }
 0x8a3   : > { %5234 = vmatpush3.bf16.msra.mxu0 %v2451_v41  ;;  %5256 = vmatpush3.bf16.msra.mxu1 %v2467_v42  ;;  %v2465_v0 = vpack.c.bf16 %v935_v58, %v934_v32  ;;  %v2453_v41 = vpack.c.bf16 %v911_v39, %v910_v38  ;;  %v943_v42 = vld [vmem:[%s8505_s9 + $0x198] sm:$0xff]  ;;  %v924_v32 = vld [vmem:[%s8505_s9 + $0x100] sm:$0xff]  ;;  %v925_v58 = vld [vmem:[%s8505_s9 + $0x108] sm:$0xff] }
 0x8a4   : > { %5235 = vmatprep.subr.bf16.mxu0 %v2458_v44  ;;  %5257 = vmatprep.subr.bf16.mxu1 %v2474_v45  ;;  %v2469_v44 = vpack.c.bf16 %v943_v42, %v942_v40  ;;  %v2445_v45 = vpack.c.bf16 %v895_v7, %v894_v43  ;;  %v2460_v59 = vpack.c.bf16 %v925_v58, %v924_v32  ;;  %v985_v39 = vld [vmem:[%s8505_s9 + $0x2e8] sm:$0xff]  ;;  %v1016_v40 = vld [vmem:[%s8505_s9 + $0x3e0] sm:$0xff]  ;;  %v982_v58 = vld [vmem:[%s8505_s9 + $0x2d0] sm:$0xff] }
 0x8a5   : > { %v1001_v32 = vld [vmem:[%s8505_s9 + $0x368] sm:$0xff] }
 0x8a7   : > { %5236 = vmatpush3.bf16.msra.mxu0 %v2450_v52  ;;  %5258 = vmatpush3.bf16.msra.mxu1 %v2466_v53  ;;  %v2452_v52 = vpack.c.bf16 %v909_v50, %v908_v49  ;;  %v941_v53 = vld [vmem:[%s8505_s9 + $0x188] sm:$0xff]  ;;  %v968_v49 = vld [vmem:[%s8505_s9 + $0x260] sm:$0xff] }
 0x8a8   : > { %5237 = vmatprep.subr.bf16.mxu0 %v2457_v56  ;;  %5259 = vmatprep.subr.bf16.mxu1 %v2473_v57  ;;  %v2468_v56 = vpack.c.bf16 %v941_v53, %v940_v51  ;;  %v2444_v57 = vpack.c.bf16 %v893_v55, %v892_v54  ;;  %v969_v50 = vld [vmem:[%s8505_s9 + $0x268] sm:$0xff] }
 0x8ab   : > { %5238 = vmatpush3.bf16.msra.mxu0 %v2449_v63  ;;  %5260 = vmatpush3.bf16.msra.mxu1 %v2465_v0  ;;  %v2491_v63 = vpack.c.bf16 %v987_v61, %v986_v60  ;;  %v1019_v0 = vld [vmem:[%s8505_s9 + $0x3f8] sm:$0xff]  ;;  %v1014_v60 = vld [vmem:[%s8505_s9 + $0x3d0] sm:$0xff] }
 0x8ac   : > { %5239 = vmatprep.subr.bf16.mxu0 %v2456_v4  ;;  %5261 = vmatprep.subr.bf16.mxu1 %v2472_v5  ;;  %v2507_v1 = vpack.c.bf16 %v1019_v0, %v1018_v62  ;;  %v6530_v4 = vshrl.u32 %v2001_v2, 7  ;;  %v1015_v61 = vld [vmem:[%s8505_s9 + $0x3d8] sm:$0xff]  ;;  %v2482_v0 = vpack.c.bf16 %v969_v50, %v968_v49 }
 0x8ae   : > { %v6533_v5 = vsub.s32 0, %v6530_v4  ;;  %v6536_v8 = vsub.s32 2, %v6530_v4  ;;  %v6544_v10 = vsub.s32 1, %v6530_v4  ;;  %v6547_v11 = vsub.s32 3, %v6530_v4 }
 0x8af   : > { %5240 = vmatpush3.bf16.msra.mxu0 %v2448_v14  ;;  %5262 = vmatpush3.bf16.msra.mxu1 %v2464_v15  ;;  %v6558_v22 = vsub.s32 5, %v6530_v4  ;;  %v6561_v25 = vsub.s32 7, %v6530_v4  ;;  %v6676_v50 = vsub.s32 6, %v6530_v4 }
 0x8b0   : > { %5241 = vmatprep.subr.bf16.mxu0 %v2455_v18  ;;  %5263 = vmatprep.subr.bf16.mxu1 %v2471_v19  ;;  %v2004_v12 = vrot.slane %v6541_v9, %v6533_v5  ;;  %v2012_v13 = vrot.slane %v6541_v9, %v6536_v8  ;;  %v2008_v14 = vrot.slane %v6541_v9, %v6544_v10 }
 0x8b1   : > { %v2016_v15 = vrot.slane %v6541_v9, %v6547_v11  ;;  %v2024_v7 = vrot.slane %v6541_v9, %v6558_v22  ;;  %v2032_v47 = vrot.slane %v6541_v9, %v6561_v25 }
 0x8b3   : > { %5242 = vmatpush3.bf16.msra.mxu0 %v2447_v26  ;;  %5264 = vmatpush3.bf16.msra.mxu1 %v2463_v28  ;;  %v970_v26 = vld [vmem:[%s8505_s9 + $0x270] sm:$0xff]  ;;  %v971_v28 = vld [vmem:[%s8505_s9 + $0x278] sm:$0xff] }
 0x8b4   : > { %5243 = vmatprep.subr.bf16.mxu0 %v2454_v30  ;;  %5265 = vmatprep.subr.bf16.mxu1 %v2470_v31 }
 0x8b7   : > { %5244 = vmatpush3.bf16.msra.mxu0 %v2446_v35  ;;  %5266 = vmatpush3.bf16.msra.mxu1 %v2462_v37  ;;  %v984_v35 = vld [vmem:[%s8505_s9 + $0x2e0] sm:$0xff] }
 0x8b8   : > { %5245 = vmatprep.subr.bf16.mxu0 %v2453_v41  ;;  %5267 = vmatprep.subr.bf16.mxu1 %v2469_v44  ;;  %v1017_v41 = vld [vmem:[%s8505_s9 + $0x3e8] sm:$0xff]  ;;  %v2483_v44 = vpack.c.bf16 %v971_v28, %v970_v26  ;;  %v2490_v55 = vpack.c.bf16 %v985_v39, %v984_v35  ;;  %v1012_v28 = vld [vmem:[%s8505_s9 + $0x3c0] sm:$0xff] }
 0x8b9   : > { %v981_v26 = vld [vmem:[%s8505_s9 + $0x2c8] sm:$0xff] }
 0x8bb   : > { %5246 = vmatpush3.bf16.msra.mxu0 %v2445_v45  ;;  %5268 = vmatpush3.bf16.msra.mxu1 %v2461_v48  ;;  %v2499_v48 = vpack.c.bf16 %v1003_v36, %v1002_v34 }
 0x8bc   : > { %5247 = vmatprep.subr.bf16.mxu0 %v2452_v52  ;;  %5269 = vmatprep.subr.bf16.mxu1 %v2468_v56  ;;  %v2506_v56 = vpack.c.bf16 %v1017_v41, %v1016_v40 }
 0x8bf   : > { %5248 = vmatpush3.bf16.msra.mxu0 %v2444_v57  ;;  %5270 = vmatpush3.bf16.msra.mxu1 %v2460_v59  ;;  %v1000_v57 = vld [vmem:[%s8505_s9 + $0x360] sm:$0xff]  ;;  %v983_v59 = vld [vmem:[%s8505_s9 + $0x2d8] sm:$0xff] }
 0x8c0   : > { %5277 = vmatprep.subr.bf16.mxu0 %v2491_v63  ;;  %5299 = vmatprep.subr.bf16.mxu1 %v2507_v1 }
 0x94a   : > { %v2118_v16 = vpop.f32.mrf.mxu0  ;;  %v2159_v17 = vpop.f32.mrf.mxu1 }
 0x94b   : > { %v2119_v18 = vadd.f32 %v2118_v16, %v2004_v12  ;;  %v2160_v19 = vadd.f32 %v2159_v17, %v2012_v13  ;;  %v2498_v12 = vpack.c.bf16 %v1001_v32, %v1000_v57  ;;  %v966_v13 = vld [vmem:[%s8505_s9 + $0x250] sm:$0xff]  ;;  %v2489_v17 = vpack.c.bf16 %v983_v59, %v982_v58  ;;  %v963_v57 = vld [vmem:[%s8505_s9 + $0x238] sm:$0xff] }
 0x94c   : > { %v2120_v20 = vpop.f32.mrf.mxu0  ;;  %v2161_v21 = vpop.f32.mrf.mxu1 }
 0x94d   : > { %v2121_v23 = vadd.f32 %v2120_v20, %v2008_v14  ;;  %v2162_v24 = vadd.f32 %v2161_v21, %v2016_v15  ;;  %v2412_v29 = vmax.f32 %v2119_v18, 0.0  ;;  %v2414_v30 = vmax.f32 %v2160_v19, 0.0  ;;  %v967_v14 = vld [vmem:[%s8505_s9 + $0x258] sm:$0xff]  ;;  %v998_v19 = vld [vmem:[%s8505_s9 + $0x350] sm:$0xff]  ;;  %v980_v21 = vld [vmem:[%s8505_s9 + $0x2c0] sm:$0xff] }
 0x94e   : > { %v2122_v31 = vpop.f32.mrf.mxu0  ;;  %v2163_v33 = vpop.f32.mrf.mxu1  ;;  %v2505_v18 = vpack.c.bf16 %v1015_v61, %v1014_v60  ;;  %v999_v20 = vld [vmem:[%s8505_s9 + $0x358] sm:$0xff]  ;;  %v2488_v41 = vpack.c.bf16 %v981_v26, %v980_v21  ;;  %v994_v61 = vld [vmem:[%s8505_s9 + $0x330] sm:$0xff]  ;;  %v993_v26 = vld [vmem:[%s8505_s9 + $0x328] sm:$0xff] }
 0x94f   : > { %v2413_v37 = vmax.f32 %v2121_v23, 0.0  ;;  %v2415_v38 = vmax.f32 %v2162_v24, 0.0  ;;  %v2428_v51 = vpack.c.bf16 %v2412_v29, %v2412_v29  ;;  %v2430_v52 = vpack.c.bf16 %v2414_v30, %v2414_v30  ;;  %v1013_v29 = vld [vmem:[%s8505_s9 + $0x3c8] sm:$0xff] }
 0x950   : > { %v2123_v42 = vpop.f32.mrf.mxu0  ;;  %v2164_v43 = vpop.f32.mrf.mxu1  ;;  %v2481_v33 = vpack.c.bf16 %v967_v14, %v966_v13  ;;  %v2497_v35 = vpack.c.bf16 %v999_v20, %v998_v19  ;;  %v961_v19 = vld [vmem:[%s8505_s9 + $0x228] sm:$0xff] }
 0x951   : > { %v2429_v45 = vpack.c.bf16 %v2413_v37, %v2413_v37  ;;  %v2431_v46 = vpack.c.bf16 %v2415_v38, %v2415_v38  ;;  %v964_v37 = vld [vmem:[%s8505_s9 + $0x240] sm:$0xff]  ;;  %v965_v38 = vld [vmem:[%s8505_s9 + $0x248] sm:$0xff]  ;;  %v2504_v42 = vpack.c.bf16 %v1013_v29, %v1012_v28  ;;  %v974_v28 = vld [vmem:[%s8505_s9 + $0x290] sm:$0xff] }
 0x952   : > { %v6597_v53 = vpop.f32.mrf.mxu0  ;;  %v6599_v54 = vpop.f32.mrf.mxu1  ;;  %v996_v43 = vld [vmem:[%s8505_s9 + $0x340] sm:$0xff] }
 0x953   : > { %2610 = vmatprep.mubr.bf16.mxu0 %v2429_v45  ;;  %2650 = vmatprep.mubr.bf16.mxu1 %v2431_v46  ;;  %v979_v45 = vld [vmem:[%s8505_s9 + $0x2b8] sm:$0xff]  ;;  %v1010_v46 = vld [vmem:[%s8505_s9 + $0x3b0] sm:$0xff] }
 0x954   : > { %v2202_v62 = vpop.f32.mrf.mxu0  ;;  %v2243_v63 = vpop.f32.mrf.mxu1  ;;  %2611 = vmatmul.mubr.bf16.vlgmr.msra.gmra.mxu0 %v2428_v51  ;;  %2651 = vmatmul.mubr.bf16.vlgmr.msra.gmra.mxu1 %v2430_v52  ;;  %v6681_v51 = vld [vmem:[%s8506_s8 + $0x8] sm:$0xff]  ;;  %v2480_v52 = vpack.c.bf16 %v965_v38, %v964_v37 }
 0x955   : > { %v2203_v1 = vadd.f32 %v2202_v62, %v2024_v7  ;;  %v2244_v2 = vadd.f32 %v2243_v63, %v2032_v47  ;;  %5278 = vmatpush3.bf16.msra.mxu0 %v2483_v44  ;;  %5300 = vmatpush3.bf16.msra.mxu1 %v2499_v48  ;;  %v997_v7 = vld [vmem:[%s8505_s9 + $0x348] sm:$0xff]  ;;  %v978_v44 = vld [vmem:[%s8505_s9 + $0x2b0] sm:$0xff]  ;;  %v1011_v47 = vld [vmem:[%s8505_s9 + $0x3b8] sm:$0xff] }
 0x956   : > { %v2204_v15 = vpop.f32.mrf.mxu0  ;;  %v2245_v16 = vpop.f32.mrf.mxu1  ;;  %5279 = vmatprep.subr.bf16.mxu0 %v2490_v55  ;;  %5301 = vmatprep.subr.bf16.mxu1 %v2506_v56  ;;  %v2496_v55 = vpack.c.bf16 %v997_v7, %v996_v43  ;;  %v962_v56 = vld [vmem:[%s8505_s9 + $0x230] sm:$0xff]  ;;  %v2487_v59 = vpack.c.bf16 %v979_v45, %v978_v44  ;;  %v2503_v60 = vpack.c.bf16 %v1011_v47, %v1010_v46  ;;  %v995_v62 = vld [vmem:[%s8505_s9 + $0x338] sm:$0xff]  ;;  %v976_v63 = vld [vmem:[%s8505_s9 + $0x2a0] sm:$0xff] }
 0x957   : > { %v2417_v23 = vmax.f32 %v2203_v1, 0.0  ;;  %v2419_v24 = vmax.f32 %v2244_v2, 0.0  ;;  %v977_v1 = vld [vmem:[%s8505_s9 + $0x2a8] sm:$0xff]  ;;  %v1008_v2 = vld [vmem:[%s8505_s9 + $0x3a0] sm:$0xff]  ;;  %v6710_v15 = vsub.s32 4, %v6530_v4  ;;  %v2479_v16 = vpack.c.bf16 %v963_v57, %v962_v56  ;;  %v990_v43 = vld [vmem:[%s8505_s9 + $0x310] sm:$0xff] }
 0x958   : > { %v2205_v30 = vpop.f32.mrf.mxu0  ;;  %v2246_v31 = vpop.f32.mrf.mxu1  ;;  %v2028_v7 = vrot.slane %v6541_v9, %v6676_v50  ;;  %v973_v56 = vld [vmem:[%s8505_s9 + $0x288] sm:$0xff]  ;;  %v1004_v57 = vld [vmem:[%s8505_s9 + $0x380] sm:$0xff] }
 0x959   : > { %v2433_v34 = vpack.c.bf16 %v2417_v23, %v2417_v23  ;;  %v2435_v36 = vpack.c.bf16 %v2419_v24, %v2419_v24  ;;  %5280 = vmatpush3.bf16.msra.mxu0 %v2482_v0  ;;  %5302 = vmatpush3.bf16.msra.mxu1 %v2498_v12  ;;  %v2060_v0 = vrot.slane %v6681_v51, %v6676_v50  ;;  %v1009_v12 = vld [vmem:[%s8505_s9 + $0x3a8] sm:$0xff]  ;;  %v992_v24 = vld [vmem:[%s8505_s9 + $0x320] sm:$0xff]  ;;  %v975_v30 = vld [vmem:[%s8505_s9 + $0x298] sm:$0xff] }
 0x95a   : > { %v6649_v39 = vpop.f32.mrf.mxu0  ;;  %v6651_v40 = vpop.f32.mrf.mxu1  ;;  %5281 = vmatprep.subr.bf16.mxu0 %v2489_v17  ;;  %5303 = vmatprep.subr.bf16.mxu1 %v2505_v18  ;;  %v2495_v17 = vpack.c.bf16 %v995_v62, %v994_v61  ;;  %v960_v18 = vld [vmem:[%s8505_s9 + $0x220] sm:$0xff]  ;;  %v2486_v23 = vpack.c.bf16 %v977_v1, %v976_v63  ;;  %v2502_v4 = vpack.c.bf16 %v1009_v12, %v1008_v2  ;;  %v1006_v31 = vld [vmem:[%s8505_s9 + $0x390] sm:$0xff]  ;;  %v957_v1 = vld [vmem:[%s8505_s9 + $0x208] sm:$0xff] }
 0x95b   : > { %2690 = vmatprep.mubr.bf16.mxu0 %v2433_v34  ;;  %2730 = vmatprep.mubr.bf16.mxu1 %v2435_v36  ;;  %v2478_v37 = vpack.c.bf16 %v961_v19, %v960_v18  ;;  %v2494_v38 = vpack.c.bf16 %v993_v26, %v992_v24  ;;  %v2485_v46 = vpack.c.bf16 %v975_v30, %v974_v28  ;;  %v1083_v19 = vld [vmem:[%s8505_s9 + $0x5f8] sm:$0xff]  ;;  %v1034_v30 = vld [vmem:[%s8505_s9 + $0x470] sm:$0xff] }
 0x95c   : > { %v6671_v48 = vpop.f32.mrf.mxu0  ;;  %v6673_v49 = vpop.f32.mrf.mxu1  ;;  %v2242_v12 = vadd.f32 %v6599_v54, %v2028_v7  ;;  %v1082_v54 = vld [vmem:[%s8505_s9 + $0x5f0] sm:$0xff] }
 0x95d   : > { %5282 = vmatpush3.bf16.msra.mxu0 %v2481_v33  ;;  %5304 = vmatpush3.bf16.msra.mxu1 %v2497_v35  ;;  %v1007_v33 = vld [vmem:[%s8505_s9 + $0x398] sm:$0xff]  ;;  %v2020_v35 = vrot.slane %v6541_v9, %v6710_v15  ;;  %v2040_v9 = vrot.slane %v6681_v51, %v6544_v10  ;;  %v2539_v28 = vpack.c.bf16 %v1083_v19, %v1082_v54  ;;  %v1077_v54 = vld [vmem:[%s8505_s9 + $0x5c8] sm:$0xff] }
 0x95e   : > { %v2286_v32 = vpop.f32.mrf.mxu0  ;;  %v2327_v58 = vpop.f32.mrf.mxu1  ;;  %5283 = vmatprep.subr.bf16.mxu0 %v2488_v41  ;;  %5305 = vmatprep.subr.bf16.mxu1 %v2504_v42  ;;  %v958_v41 = vld [vmem:[%s8505_s9 + $0x210] sm:$0xff]  ;;  %v959_v42 = vld [vmem:[%s8505_s9 + $0x218] sm:$0xff]  ;;  %v2501_v47 = vpack.c.bf16 %v1007_v33, %v1006_v31 }
 0x95f   : > { %v1005_v32 = vld [vmem:[%s8505_s9 + $0x388] sm:$0xff]  ;;  %v2048_v58 = vrot.slane %v6681_v51, %v6547_v11  ;;  %v2477_v61 = vpack.c.bf16 %v959_v42, %v958_v41  ;;  %v2201_v2 = vadd.f32 %v6597_v53, %v2020_v35  ;;  %v2285_v18 = vadd.f32 %v6671_v48, %v2040_v9  ;;  %v1051_v53 = vld [vmem:[%s8505_s9 + $0x4f8] sm:$0xff]  ;;  %v1080_v42 = vld [vmem:[%s8505_s9 + $0x5e0] sm:$0xff] }
 0x960   : > { %v2287_v13 = vpop.f32.mrf.mxu0  ;;  %v2328_v14 = vpop.f32.mrf.mxu1  ;;  %v2418_v48 = vmax.f32 %v2242_v12, 0.0  ;;  %v1035_v31 = vld [vmem:[%s8505_s9 + $0x478] sm:$0xff]  ;;  %v1049_v41 = vld [vmem:[%s8505_s9 + $0x4e8] sm:$0xff] }
 0x961   : > { %5284 = vmatpush3.bf16.msra.mxu0 %v2480_v52  ;;  %5306 = vmatpush3.bf16.msra.mxu1 %v2496_v55  ;;  %v991_v52 = vld [vmem:[%s8505_s9 + $0x318] sm:$0xff]  ;;  %v972_v55 = vld [vmem:[%s8505_s9 + $0x280] sm:$0xff]  ;;  %v2500_v13 = vpack.c.bf16 %v1005_v32, %v1004_v57  ;;  %v2416_v24 = vmax.f32 %v2201_v2, 0.0  ;;  %v2421_v33 = vmax.f32 %v2285_v18, 0.0  ;;  %v2515_v7 = vpack.c.bf16 %v1035_v31, %v1034_v30  ;;  %v1065_v32 = vld [vmem:[%s8505_s9 + $0x568] sm:$0xff] }
 0x962   : > { %v6718_v20 = vpop.f32.mrf.mxu0  ;;  %v2405_v21 = vpop.f32.mrf.mxu1  ;;  %5285 = vmatprep.subr.bf16.mxu0 %v2487_v59  ;;  %5307 = vmatprep.subr.bf16.mxu1 %v2503_v60  ;;  %v2493_v62 = vpack.c.bf16 %v991_v52, %v990_v43  ;;  %v2484_v63 = vpack.c.bf16 %v973_v56, %v972_v55  ;;  %v988_v14 = vld [vmem:[%s8505_s9 + $0x300] sm:$0xff]  ;;  %v1067_v35 = vld [vmem:[%s8505_s9 + $0x578] sm:$0xff]  ;;  %v1081_v43 = vld [vmem:[%s8505_s9 + $0x5e8] sm:$0xff] }
 0x963   : > { %v6729_v29 = vadd.f32 %v2405_v21, %v2060_v0  ;;  %v956_v0 = vld [vmem:[%s8505_s9 + $0x200] sm:$0xff]  ;;  %v2326_v21 = vadd.f32 %v6673_v49, %v2048_v58  ;;  %v1066_v49 = vld [vmem:[%s8505_s9 + $0x570] sm:$0xff]  ;;  %v1033_v52 = vld [vmem:[%s8505_s9 + $0x468] sm:$0xff]  ;;  %v2437_v56 = vpack.c.bf16 %v2421_v33, %v2421_v33  ;;  %v2538_v57 = vpack.c.bf16 %v1081_v43, %v1080_v42 }
 0x964   : > { %v6740_v34 = vpop.f32.mrf.mxu0  ;;  %v6742_v36 = vpop.f32.mrf.mxu1  ;;  %v1064_v55 = vld [vmem:[%s8505_s9 + $0x560] sm:$0xff]  ;;  %v1046_v58 = vld [vmem:[%s8505_s9 + $0x4d0] sm:$0xff]  ;;  %v1031_v12 = vld [vmem:[%s8505_s9 + $0x458] sm:$0xff] }
 0x965   : > { %5286 = vmatpush3.bf16.msra.mxu0 %v2479_v16  ;;  %5308 = vmatpush3.bf16.msra.mxu1 %v2495_v17  ;;  %v989_v16 = vld [vmem:[%s8505_s9 + $0x308] sm:$0xff]  ;;  %v1050_v17 = vld [vmem:[%s8505_s9 + $0x4f0] sm:$0xff]  ;;  %v1043_v31 = vld [vmem:[%s8505_s9 + $0x4b8] sm:$0xff] }
 0x966   : > { %v2368_v44 = vpop.f32.mrf.mxu0  ;;  %v2409_v45 = vpop.f32.mrf.mxu1  ;;  %5287 = vmatprep.subr.bf16.mxu0 %v2486_v23  ;;  %5309 = vmatprep.subr.bf16.mxu1 %v2502_v4  ;;  %v2476_v23 = vpack.c.bf16 %v957_v1, %v956_v0  ;;  %v2492_v4 = vpack.c.bf16 %v989_v16, %v988_v14  ;;  %v2523_v26 = vpack.c.bf16 %v1051_v53, %v1050_v17  ;;  %v1030_v2 = vld [vmem:[%s8505_s9 + $0x450] sm:$0xff]  ;;  %v1063_v16 = vld [vmem:[%s8505_s9 + $0x558] sm:$0xff]  ;;  %v1044_v17 = vld [vmem:[%s8505_s9 + $0x4c0] sm:$0xff] }
 0x967   : > { %v2432_v44 = vpack.c.bf16 %v2416_v24, %v2416_v24  ;;  %v2434_v45 = vpack.c.bf16 %v2418_v48, %v2418_v48  ;;  %v2530_v0 = vpack.c.bf16 %v1065_v32, %v1064_v55  ;;  %v1045_v18 = vld [vmem:[%s8505_s9 + $0x4c8] sm:$0xff]  ;;  %v1076_v53 = vld [vmem:[%s8505_s9 + $0x5c0] sm:$0xff]  ;;  %v2513_v19 = vpack.c.bf16 %v1031_v12, %v1030_v2  ;;  %v1042_v30 = vld [vmem:[%s8505_s9 + $0x4b0] sm:$0xff] }
 0x968   : > { %v2369_v59 = vpop.f32.mrf.mxu0  ;;  %v2410_v60 = vpop.f32.mrf.mxu1  ;;  %v1029_v24 = vld [vmem:[%s8505_s9 + $0x448] sm:$0xff]  ;;  %v1060_v48 = vld [vmem:[%s8505_s9 + $0x540] sm:$0xff]  ;;  %v1074_v33 = vld [vmem:[%s8505_s9 + $0x5b0] sm:$0xff]  ;;  %v2036_v2 = vrot.slane %v6681_v51, %v6533_v5 }
 0x969   : > { %5288 = vmatpush3.bf16.msra.mxu0 %v2478_v37  ;;  %5310 = vmatpush3.bf16.msra.mxu1 %v2494_v38  ;;  %v1048_v37 = vld [vmem:[%s8505_s9 + $0x4e0] sm:$0xff]  ;;  %v2423_v38 = vmax.f32 %v2326_v21, 0.0  ;;  %v1047_v59 = vld [vmem:[%s8505_s9 + $0x4d8] sm:$0xff]  ;;  %v1058_v43 = vld [vmem:[%s8505_s9 + $0x530] sm:$0xff] }
 0x96a   : > { %5289 = vmatprep.subr.bf16.mxu0 %v2485_v46  ;;  %5311 = vmatprep.subr.bf16.mxu1 %v2501_v47  ;;  %v2531_v46 = vpack.c.bf16 %v1067_v35, %v1066_v49  ;;  %v1032_v47 = vld [vmem:[%s8505_s9 + $0x460] sm:$0xff]  ;;  %v2522_v9 = vpack.c.bf16 %v1049_v41, %v1048_v37  ;;  %v2521_v1 = vpack.c.bf16 %v1047_v59, %v1046_v58  ;;  %v1075_v49 = vld [vmem:[%s8505_s9 + $0x5b8] sm:$0xff]  ;;  %v1026_v41 = vld [vmem:[%s8505_s9 + $0x430] sm:$0xff] }
 0x96b   : > { %v2439_v60 = vpack.c.bf16 %v2423_v38, %v2423_v38  ;;  %v2519_v38 = vpack.c.bf16 %v1043_v31, %v1042_v30  ;;  %v1027_v42 = vld [vmem:[%s8505_s9 + $0x438] sm:$0xff]  ;;  %v1025_v32 = vld [vmem:[%s8505_s9 + $0x428] sm:$0xff]  ;;  %v1056_v58 = vld [vmem:[%s8505_s9 + $0x520] sm:$0xff] }
 0x96c   : > { %v2511_v55 = vpack.c.bf16 %v1027_v42, %v1026_v41  ;;  %v1114_v41 = vld [vmem:[%s8505_s9 + $0x6f0] sm:$0xff]  ;;  %v1115_v42 = vld [vmem:[%s8505_s9 + $0x6f8] sm:$0xff] }
 0x96d   : > { %5290 = vmatpush3.bf16.msra.mxu0 %v2477_v61  ;;  %5312 = vmatpush3.bf16.msra.mxu1 %v2493_v62  ;;  %v1078_v61 = vld [vmem:[%s8505_s9 + $0x5d0] sm:$0xff]  ;;  %v1079_v62 = vld [vmem:[%s8505_s9 + $0x5d8] sm:$0xff] }
 0x96e   : > { %5291 = vmatprep.subr.bf16.mxu0 %v2484_v63  ;;  %5313 = vmatprep.subr.bf16.mxu1 %v2500_v13  ;;  %v2514_v63 = vpack.c.bf16 %v1033_v52, %v1032_v47  ;;  %v1062_v13 = vld [vmem:[%s8505_s9 + $0x550] sm:$0xff]  ;;  %v2537_v14 = vpack.c.bf16 %v1079_v62, %v1078_v61  ;;  %v1072_v47 = vld [vmem:[%s8505_s9 + $0x5a0] sm:$0xff]  ;;  %v1073_v52 = vld [vmem:[%s8505_s9 + $0x5a8] sm:$0xff] }
 0x96f   : > { %v2529_v21 = vpack.c.bf16 %v1063_v16, %v1062_v13  ;;  %v2534_v59 = vpack.c.bf16 %v1073_v52, %v1072_v47  ;;  %v1038_v61 = vld [vmem:[%s8505_s9 + $0x490] sm:$0xff]  ;;  %v1039_v62 = vld [vmem:[%s8505_s9 + $0x498] sm:$0xff]  ;;  %v2555_v52 = vpack.c.bf16 %v1115_v42, %v1114_v41 }
 0x970   : > { %v2517_v13 = vpack.c.bf16 %v1039_v62, %v1038_v61  ;;  %v1023_v16 = vld [vmem:[%s8505_s9 + $0x418] sm:$0xff]  ;;  %v1144_v62 = vld [vmem:[%s8505_s9 + $0x7e0] sm:$0xff] }
 0x971   : > { %5292 = vmatpush3.bf16.msra.mxu0 %v2476_v23  ;;  %5314 = vmatpush3.bf16.msra.mxu1 %v2492_v4  ;;  %v2520_v23 = vpack.c.bf16 %v1045_v18, %v1044_v17  ;;  %v1028_v4 = vld [vmem:[%s8505_s9 + $0x440] sm:$0xff]  ;;  %v1054_v17 = vld [vmem:[%s8505_s9 + $0x510] sm:$0xff]  ;;  %v2044_v18 = vrot.slane %v6681_v51, %v6536_v8 }
 0x972   : > { %5321 = vmatprep.subr.bf16.mxu0 %v2523_v26  ;;  %5343 = vmatprep.subr.bf16.mxu1 %v2539_v28  ;;  %v2536_v26 = vpack.c.bf16 %v1077_v54, %v1076_v53  ;;  %v1061_v28 = vld [vmem:[%s8505_s9 + $0x548] sm:$0xff]  ;;  %v2512_v35 = vpack.c.bf16 %v1029_v24, %v1028_v4  ;;  %v1055_v54 = vld [vmem:[%s8505_s9 + $0x518] sm:$0xff]  ;;  %v1068_v4 = vld [vmem:[%s8505_s9 + $0x580] sm:$0xff] }
 0x973   : > { %v2528_v37 = vpack.c.bf16 %v1061_v28, %v1060_v48  ;;  %v1069_v24 = vld [vmem:[%s8505_s9 + $0x588] sm:$0xff]  ;;  %v2064_v48 = vrot.slane %v6681_v51, %v6561_v25  ;;  %v2283_v28 = vadd.f32 %v6649_v39, %v2036_v2  ;;  %v2525_v30 = vpack.c.bf16 %v1055_v54, %v1054_v17  ;;  %v1096_v2 = vld [vmem:[%s8505_s9 + $0x660] sm:$0xff] }
 0x974   : > { %2691 = vmatmul.mubr.bf16.vlgmr.msra.gmra.mxu0 %v2432_v44  ;;  %2731 = vmatmul.mubr.bf16.vlgmr.msra.gmra.mxu1 %v2434_v45  ;;  %v1059_v44 = vld [vmem:[%s8505_s9 + $0x538] sm:$0xff]  ;;  %v1040_v45 = vld [vmem:[%s8505_s9 + $0x4a0] sm:$0xff]  ;;  %v2532_v39 = vpack.c.bf16 %v1069_v24, %v1068_v4  ;;  %v1129_v17 = vld [vmem:[%s8505_s9 + $0x768] sm:$0xff] }
 0x975   : > { %5322 = vmatpush3.bf16.msra.mxu0 %v2515_v7  ;;  %2770 = vmatprep.mubr.bf16.mxu0 %v2437_v56  ;;  %v2535_v7 = vpack.c.bf16 %v1075_v49, %v1074_v33  ;;  %v2527_v56 = vpack.c.bf16 %v1059_v44, %v1058_v43  ;;  %v1020_v33 = vld [vmem:[%s8505_s9 + $0x400] sm:$0xff]  ;;  %v1021_v49 = vld [vmem:[%s8505_s9 + $0x408] sm:$0xff]  ;;  %v2408_v44 = vadd.f32 %v6742_v36, %v2064_v48  ;;  %v1130_v36 = vld [vmem:[%s8505_s9 + $0x770] sm:$0xff] }
 0x976   : > { %5344 = vmatpush3.bf16.msra.mxu1 %v2531_v46  ;;  %2810 = vmatprep.mubr.bf16.mxu1 %v2439_v60  ;;  %v1041_v46 = vld [vmem:[%s8505_s9 + $0x4a8] sm:$0xff] }
 0x977   : > { %5323 = vmatprep.subr.bf16.mxu0 %v2522_v9  ;;  %5345 = vmatprep.subr.bf16.mxu1 %v2538_v57  ;;  %v2518_v9 = vpack.c.bf16 %v1041_v46, %v1040_v45  ;;  %v1024_v57 = vld [vmem:[%s8505_s9 + $0x420] sm:$0xff]  ;;  %v1057_v60 = vld [vmem:[%s8505_s9 + $0x528] sm:$0xff]  ;;  %v2508_v45 = vpack.c.bf16 %v1021_v49, %v1020_v33  ;;  %v2420_v46 = vmax.f32 %v2283_v28, 0.0  ;;  %v1094_v28 = vld [vmem:[%s8505_s9 + $0x650] sm:$0xff] }
 0x978   : > { %v2526_v12 = vpack.c.bf16 %v1057_v60, %v1056_v58  ;;  %v1112_v58 = vld [vmem:[%s8505_s9 + $0x6e0] sm:$0xff]  ;;  %v2427_v60 = vmax.f32 %v2408_v44, 0.0  ;;  %v1127_v49 = vld [vmem:[%s8505_s9 + $0x758] sm:$0xff] }
 0x979   : > { %5324 = vmatpush3.bf16.msra.mxu0 %v2514_v63  ;;  %v1070_v63 = vld [vmem:[%s8505_s9 + $0x590] sm:$0xff]  ;;  %v1124_v44 = vld [vmem:[%s8505_s9 + $0x740] sm:$0xff] }
 0x97a   : > { %5346 = vmatpush3.bf16.msra.mxu1 %v2530_v0  ;;  %5325 = vmatprep.subr.bf16.mxu0 %v2521_v1  ;;  %v1071_v0 = vld [vmem:[%s8505_s9 + $0x598] sm:$0xff]  ;;  %v2510_v1 = vpack.c.bf16 %v1025_v32, %v1024_v57  ;;  %v2443_v4 = vpack.c.bf16 %v2427_v60, %v2427_v60 }
 0x97b   : > { %5347 = vmatprep.subr.bf16.mxu1 %v2537_v14  ;;  %v1022_v14 = vld [vmem:[%s8505_s9 + $0x410] sm:$0xff]  ;;  %v2533_v53 = vpack.c.bf16 %v1071_v0, %v1070_v63  ;;  %v1131_v57 = vld [vmem:[%s8505_s9 + $0x778] sm:$0xff]  ;;  %v1145_v63 = vld [vmem:[%s8505_s9 + $0x7e8] sm:$0xff]  ;;  %v2436_v0 = vpack.c.bf16 %v2420_v46, %v2420_v46 }
 0x97c   : > { %v1125_v46 = vld [vmem:[%s8505_s9 + $0x748] sm:$0xff]  ;;  %v1123_v60 = vld [vmem:[%s8505_s9 + $0x738] sm:$0xff] }
 0x97d   : > { %5326 = vmatpush3.bf16.msra.mxu0 %v2513_v19  ;;  %v1036_v19 = vld [vmem:[%s8505_s9 + $0x480] sm:$0xff] }
 0x97e   : > { %5348 = vmatpush3.bf16.msra.mxu1 %v2529_v21  ;;  %5327 = vmatprep.subr.bf16.mxu0 %v2520_v23  ;;  %v1037_v21 = vld [vmem:[%s8505_s9 + $0x488] sm:$0xff]  ;;  %v2056_v23 = vrot.slane %v6681_v51, %v6558_v22 }
 0x97f   : > { %5349 = vmatprep.subr.bf16.mxu1 %v2536_v26  ;;  %v2509_v26 = vpack.c.bf16 %v1023_v16, %v1022_v14  ;;  %v2516_v31 = vpack.c.bf16 %v1037_v21, %v1036_v19  ;;  %v2570_v19 = vpack.c.bf16 %v1145_v63, %v1144_v62  ;;  %v1142_v21 = vld [vmem:[%s8505_s9 + $0x7d0] sm:$0xff]  ;;  %v1105_v62 = vld [vmem:[%s8505_s9 + $0x6a8] sm:$0xff]  ;;  %v1136_v63 = vld [vmem:[%s8505_s9 + $0x7a0] sm:$0xff] }
 0x980   : > { %v2367_v43 = vadd.f32 %v6740_v34, %v2056_v23  ;;  %v1098_v34 = vld [vmem:[%s8505_s9 + $0x670] sm:$0xff]  ;;  %v1143_v23 = vld [vmem:[%s8505_s9 + $0x7d8] sm:$0xff] }
 0x981   : > { %5328 = vmatpush3.bf16.msra.mxu0 %v2512_v35  ;;  %v1052_v35 = vld [vmem:[%s8505_s9 + $0x500] sm:$0xff]  ;;  %v2569_v33 = vpack.c.bf16 %v1143_v23, %v1142_v21  ;;  %v1135_v21 = vld [vmem:[%s8505_s9 + $0x798] sm:$0xff] }
 0x982   : > { %5350 = vmatpush3.bf16.msra.mxu1 %v2528_v37  ;;  %5329 = vmatprep.subr.bf16.mxu0 %v2519_v38  ;;  %v2324_v37 = vadd.f32 %v6651_v40, %v2044_v18  ;;  %v1053_v38 = vld [vmem:[%s8505_s9 + $0x508] sm:$0xff]  ;;  %v1146_v40 = vld [vmem:[%s8505_s9 + $0x7f0] sm:$0xff]  ;;  %v2425_v32 = vmax.f32 %v2367_v43, 0.0 }
 0x983   : > { %5351 = vmatprep.subr.bf16.mxu1 %v2535_v7  ;;  %v1147_v7 = vld [vmem:[%s8505_s9 + $0x7f8] sm:$0xff]  ;;  %v2524_v47 = vpack.c.bf16 %v1053_v38, %v1052_v35  ;;  %v1110_v18 = vld [vmem:[%s8505_s9 + $0x6d0] sm:$0xff]  ;;  %v1108_v35 = vld [vmem:[%s8505_s9 + $0x6c0] sm:$0xff] }
 0x984   : > { %v2441_v54 = vpack.c.bf16 %v2425_v32, %v2425_v32  ;;  %v1141_v38 = vld [vmem:[%s8505_s9 + $0x7c8] sm:$0xff]  ;;  %v1091_v32 = vld [vmem:[%s8505_s9 + $0x638] sm:$0xff] }
 0x985   : > { %5330 = vmatpush3.bf16.msra.mxu0 %v2511_v55  ;;  %v1099_v55 = vld [vmem:[%s8505_s9 + $0x678] sm:$0xff] }
 0x986   : > { %5352 = vmatpush3.bf16.msra.mxu1 %v2527_v56  ;;  %5331 = vmatprep.subr.bf16.mxu0 %v2518_v9  ;;  %v2422_v56 = vmax.f32 %v2324_v37, 0.0  ;;  %v2571_v9 = vpack.c.bf16 %v1147_v7, %v1146_v40  ;;  %v2547_v61 = vpack.c.bf16 %v1099_v55, %v1098_v34  ;;  %v1109_v37 = vld [vmem:[%s8505_s9 + $0x6c8] sm:$0xff]  ;;  %v1092_v40 = vld [vmem:[%s8505_s9 + $0x640] sm:$0xff]  ;;  %v1138_v34 = vld [vmem:[%s8505_s9 + $0x7b0] sm:$0xff] }
 0x987   : > { %5353 = vmatprep.subr.bf16.mxu1 %v2534_v59  ;;  %v1113_v59 = vld [vmem:[%s8505_s9 + $0x6e8] sm:$0xff]  ;;  %v2552_v43 = vpack.c.bf16 %v1109_v37, %v1108_v35  ;;  %v1139_v55 = vld [vmem:[%s8505_s9 + $0x7b8] sm:$0xff]  ;;  %v1132_v35 = vld [vmem:[%s8505_s9 + $0x780] sm:$0xff] }
 0x988   : > { %v2438_v14 = vpack.c.bf16 %v2422_v56, %v2422_v56  ;;  %v2554_v16 = vpack.c.bf16 %v1113_v59, %v1112_v58  ;;  %v1093_v7 = vld [vmem:[%s8505_s9 + $0x648] sm:$0xff]  ;;  %v1122_v58 = vld [vmem:[%s8505_s9 + $0x730] sm:$0xff]  ;;  %v2567_v59 = vpack.c.bf16 %v1139_v55, %v1138_v34 }
 0x989   : > { %5332 = vmatpush3.bf16.msra.mxu0 %v2510_v1  ;;  %v2563_v1 = vpack.c.bf16 %v1131_v57, %v1130_v36  ;;  %v2544_v56 = vpack.c.bf16 %v1093_v7, %v1092_v40  ;;  %v1090_v57 = vld [vmem:[%s8505_s9 + $0x630] sm:$0xff]  ;;  %v1133_v37 = vld [vmem:[%s8505_s9 + $0x788] sm:$0xff] }
 0x98a   : > { %5354 = vmatpush3.bf16.msra.mxu1 %v2526_v12  ;;  %5333 = vmatprep.subr.bf16.mxu0 %v2517_v13  ;;  %v1097_v12 = vld [vmem:[%s8505_s9 + $0x668] sm:$0xff]  ;;  %v1128_v13 = vld [vmem:[%s8505_s9 + $0x760] sm:$0xff]  ;;  %v2564_v7 = vpack.c.bf16 %v1133_v37, %v1132_v35 }
 0x98b   : > { %5355 = vmatprep.subr.bf16.mxu1 %v2533_v53  ;;  %v1111_v53 = vld [vmem:[%s8505_s9 + $0x6d8] sm:$0xff]  ;;  %v2546_v24 = vpack.c.bf16 %v1097_v12, %v1096_v2  ;;  %v2562_v48 = vpack.c.bf16 %v1129_v17, %v1128_v13  ;;  %v2559_v2 = vpack.c.bf16 %v1123_v60, %v1122_v58  ;;  %v1088_v13 = vld [vmem:[%s8505_s9 + $0x620] sm:$0xff]  ;;  %v1085_v40 = vld [vmem:[%s8505_s9 + $0x608] sm:$0xff] }
 0x98d   : > { %5334 = vmatpush3.bf16.msra.mxu0 %v2509_v26  ;;  %v2553_v26 = vpack.c.bf16 %v1111_v53, %v1110_v18  ;;  %v1121_v18 = vld [vmem:[%s8505_s9 + $0x728] sm:$0xff]  ;;  %v1102_v53 = vld [vmem:[%s8505_s9 + $0x690] sm:$0xff] }
 0x98e   : > { %5356 = vmatpush3.bf16.msra.mxu1 %v2525_v30  ;;  %5335 = vmatprep.subr.bf16.mxu0 %v2516_v31  ;;  %v1095_v30 = vld [vmem:[%s8505_s9 + $0x658] sm:$0xff]  ;;  %v1126_v31 = vld [vmem:[%s8505_s9 + $0x750] sm:$0xff] }
 0x98f   : > { %5357 = vmatprep.subr.bf16.mxu1 %v2532_v39  ;;  %v1140_v39 = vld [vmem:[%s8505_s9 + $0x7c0] sm:$0xff]  ;;  %v2545_v41 = vpack.c.bf16 %v1095_v30, %v1094_v28  ;;  %v2561_v42 = vpack.c.bf16 %v1127_v49, %v1126_v31  ;;  %v1087_v28 = vld [vmem:[%s8505_s9 + $0x618] sm:$0xff]  ;;  %v1118_v30 = vld [vmem:[%s8505_s9 + $0x710] sm:$0xff] }
 0x990   : > { %v1101_v49 = vld [vmem:[%s8505_s9 + $0x688] sm:$0xff] }
 0x991   : > { %5336 = vmatpush3.bf16.msra.mxu0 %v2508_v45  ;;  %v2568_v45 = vpack.c.bf16 %v1141_v38, %v1140_v39 }
 0x992   : > { %5358 = vmatpush3.bf16.msra.mxu1 %v2524_v47  ;;  %5365 = vmatprep.subr.bf16.mxu0 %v2555_v52  ;;  %v1106_v47 = vld [vmem:[%s8505_s9 + $0x6b0] sm:$0xff]  ;;  %v1107_v52 = vld [vmem:[%s8505_s9 + $0x6b8] sm:$0xff] }
 0x993   : > { %5387 = vmatprep.subr.bf16.mxu1 %v2571_v9  ;;  %v2560_v9 = vpack.c.bf16 %v1125_v46, %v1124_v44  ;;  %v2551_v36 = vpack.c.bf16 %v1107_v52, %v1106_v47  ;;  %v1116_v44 = vld [vmem:[%s8505_s9 + $0x700] sm:$0xff]  ;;  %v2426_v52 = vmax.f32 %v6729_v29, 0.0 }
 0x994   : > { %2771 = vmatmul.mubr.bf16.vlgmr.msra.gmra.mxu0 %v2436_v0  ;;  %v1137_v0 = vld [vmem:[%s8505_s9 + $0x7a8] sm:$0xff]  ;;  %v5175_v29 = vld [vmem:[%s8507_s28] ss:$0 sm:$0xff]  ;;  %s8508_s28 = sld [smem:[#allocation14_spill]] }
 0x995   : > { %2811 = vmatmul.mubr.bf16.vlgmr.msra.gmra.mxu1 %v2438_v14  ;;  %5366 = vmatpush3.bf16.msra.mxu0 %v2547_v61  ;;  %v1104_v61 = vld [vmem:[%s8505_s9 + $0x6a0] sm:$0xff]  ;;  %v1089_v14 = vld [vmem:[%s8505_s9 + $0x628] sm:$0xff]  ;;  %v2566_v17 = vpack.c.bf16 %v1137_v0, %v1136_v63  ;;  %v2442_v55 = vpack.c.bf16 %v2426_v52, %v2426_v52 }
 0x996   : > { %2850 = vmatprep.mubr.bf16.mxu0 %v2441_v54  ;;  %5388 = vmatpush3.bf16.msra.mxu1 %v2563_v1  ;;  %v2543_v1 = vpack.c.bf16 %v1091_v32, %v1090_v57  ;;  %v2550_v12 = vpack.c.bf16 %v1105_v62, %v1104_v61  ;;  %v1103_v54 = vld [vmem:[%s8505_s9 + $0x698] sm:$0xff]  ;;  %v2542_v23 = vpack.c.bf16 %v1089_v14, %v1088_v13 }
 0x997   : > { %2890 = vmatprep.mubr.bf16.mxu1 %v2443_v4  ;;  %5367 = vmatprep.subr.bf16.mxu0 %v2554_v16  ;;  %v1120_v16 = vld [vmem:[%s8505_s9 + $0x720] sm:$0xff]  ;;  %v2052_v4 = vrot.slane %v6681_v51, %v6710_v15  ;;  %v1119_v51 = vld [vmem:[%s8505_s9 + $0x718] sm:$0xff] }
 0x998   : > { %5389 = vmatprep.subr.bf16.mxu1 %v2570_v19  ;;  %v1134_v19 = vld [vmem:[%s8505_s9 + $0x790] sm:$0xff] }
 0x999   : > { %5368 = vmatpush3.bf16.msra.mxu0 %v2546_v24  ;;  %v2558_v24 = vpack.c.bf16 %v1121_v18, %v1120_v16  ;;  %v2565_v31 = vpack.c.bf16 %v1135_v21, %v1134_v19  ;;  %v2365_v38 = vadd.f32 %v6718_v20, %v2052_v4  ;;  %v1117_v20 = vld [vmem:[%s8505_s9 + $0x708] sm:$0xff] }
 0x99a   : > { %5390 = vmatpush3.bf16.msra.mxu1 %v2562_v48  ;;  %5369 = vmatprep.subr.bf16.mxu0 %v2553_v26  ;;  %v2549_v48 = vpack.c.bf16 %v1103_v54, %v1102_v53  ;;  %v1086_v26 = vld [vmem:[%s8505_s9 + $0x610] sm:$0xff]  ;;  %v2556_v47 = vpack.c.bf16 %v1117_v20, %v1116_v44 }
 0x99b   : > { %5391 = vmatprep.subr.bf16.mxu1 %v2569_v33  ;;  %v1100_v33 = vld [vmem:[%s8505_s9 + $0x680] sm:$0xff]  ;;  %v2541_v39 = vpack.c.bf16 %v1087_v28, %v1086_v26  ;;  %v2424_v46 = vmax.f32 %v2365_v38, 0.0 }
 0x99d   : > { %5370 = vmatpush3.bf16.msra.mxu0 %v2545_v41  ;;  %v2557_v41 = vpack.c.bf16 %v1119_v51, %v1118_v30  ;;  %v2440_v34 = vpack.c.bf16 %v2424_v46, %v2424_v46 }
 0x99e   : > { %5392 = vmatpush3.bf16.msra.mxu1 %v2561_v42  ;;  %5371 = vmatprep.subr.bf16.mxu0 %v2552_v43  ;;  %v2548_v42 = vpack.c.bf16 %v1101_v49, %v1100_v33  ;;  %v1084_v43 = vld [vmem:[%s8505_s9 + $0x600] sm:$0xff] }
 0x99f   : > { %5393 = vmatprep.subr.bf16.mxu1 %v2568_v45  ;;  %v2540_v45 = vpack.c.bf16 %v1085_v40, %v1084_v43 }
 0x9a1   : > { %5372 = vmatpush3.bf16.msra.mxu0 %v2544_v56 }
 0x9a2   : > { %5394 = vmatpush3.bf16.msra.mxu1 %v2560_v9  ;;  %5373 = vmatprep.subr.bf16.mxu0 %v2551_v36 }
 0x9a3   : > { %5395 = vmatprep.subr.bf16.mxu1 %v2567_v59 }
 0x9a5   : > { %5374 = vmatpush3.bf16.msra.mxu0 %v2543_v1 }
 0x9a6   : > { %5396 = vmatpush3.bf16.msra.mxu1 %v2559_v2  ;;  %5375 = vmatprep.subr.bf16.mxu0 %v2550_v12 }
 0x9a7   : > { %5397 = vmatprep.subr.bf16.mxu1 %v2566_v17 }
 0x9a9   : > { %5376 = vmatpush3.bf16.msra.mxu0 %v2542_v23 }
 0x9aa   : > { %5398 = vmatpush3.bf16.msra.mxu1 %v2558_v24  ;;  %5377 = vmatprep.subr.bf16.mxu0 %v2549_v48 }
 0x9ab   : > { %5399 = vmatprep.subr.bf16.mxu1 %v2565_v31 }
 0x9ad   : > { %5378 = vmatpush3.bf16.msra.mxu0 %v2541_v39 }
 0x9ae   : > { %5400 = vmatpush3.bf16.msra.mxu1 %v2557_v41  ;;  %5379 = vmatprep.subr.bf16.mxu0 %v2548_v42 }
 0x9af   : > { %5401 = vmatprep.subr.bf16.mxu1 %v2564_v7 }
 0x9b1   : > { %5380 = vmatpush3.bf16.msra.mxu0 %v2540_v45 }
 0x9b2   : > { %5402 = vmatpush3.bf16.msra.mxu1 %v2556_v47  ;;  %5666 = vmatprep.subr.bf16.mxu0 %v5803_v3 }
 0x9b3   : > { %5674 = vmatprep.subr.mxu1 %v5803_v3 }
 0x9b4   : > { %2851 = vmatmul.mubr.bf16.vlgmr.msra.gmra.mxu0 %v2440_v34 }
 0x9b5   : > { %2891 = vmatmul.mubr.bf16.vlgmr.msra.gmra.mxu1 %v2442_v55  ;;  %5670 = vmatprep.mubr.msk.bf16.mxu0 %vm5804_vm0, %v5803_v3 }
 0x9b6   : > { %5676 = vmatprep.mubr.msk.f32.mxu1 %vm5804_vm0, %v5803_v3 }
 0xa14   : > { %v5249_v56 = vpop.f32.mrf.mxu0  ;;  %v5271_v9 = vpop.f32.mrf.mxu1 }
 0xa16   : > { %v5250_v36 = vpop.f32.mrf.mxu0  ;;  %v5272_v57 = vpop.f32.mrf.mxu1 }
 0xa17   : > { %v5251_v32 = vadd.f32 %v5250_v36, %v5249_v56  ;;  %v5273_v58 = vadd.f32 %v5272_v57, %v5271_v9  ;;  %v2928_v36 = vld [vmem:[%s8445_s13 + $0x10] sm:$0xff]  ;;  %v2929_v57 = vld [vmem:[%s8445_s13 + $0x18] sm:$0xff] }
 0xa18   : > { %v5252_v59 = vpop.f32.mrf.mxu0  ;;  %v5274_v60 = vpop.f32.mrf.mxu1 }
 0xa19   : > { %v2613_v61 = vadd.f32 %v5251_v32, %v5175_v29  ;;  %v3265_v32 = vpack.c.bf16 %v2929_v57, %v2928_v36 }
 0xa1a   : > { %v5253_v62 = vpop.f32.mrf.mxu0  ;;  %v5275_v63 = vpop.f32.mrf.mxu1 }
 0xa1b   : > { %v2653_v0 = vadd.f32 %v5273_v58, %v2613_v61  ;;  %v2927_v58 = vld [vmem:[%s8445_s13 + $0x8] sm:$0xff]  ;;  %5667 = vmatpush3.bf16.msra.mxu0 %v3265_v32 }
 0xa1c   : > { %5668 = vmatprep.subr.bf16.mxu0 %v5803_v3 }
 0xa34   : > { %v5293_v1 = vpop.f32.mrf.mxu0  ;;  %v5315_v2 = vpop.f32.mrf.mxu1 }
 0xa36   : > { %v5294_v12 = vpop.f32.mrf.mxu0  ;;  %v5316_v13 = vpop.f32.mrf.mxu1 }
 0xa37   : > { %v5295_v26 = vadd.f32 %v5294_v12, %v5293_v1  ;;  %v5317_v30 = vadd.f32 %v5316_v13, %v5315_v2  ;;  %v5177_v2 = vld [vmem:[%s8444_s12] ss:$0 sm:$0xff] }
 0xa38   : > { %v5296_v14 = vpop.f32.mrf.mxu0  ;;  %v5318_v16 = vpop.f32.mrf.mxu1 }
 0xa39   : > { %v2693_v28 = vadd.f32 %v5295_v26, %v2653_v0  ;;  %v5176_v0 = vld [vmem:[%s8508_s28] ss:$0 sm:$0xff]  ;;  %s8515_s28 = smov 72  }
 0xa3a   : > { %v5297_v17 = vpop.f32.mrf.mxu0  ;;  %v5319_v18 = vpop.f32.mrf.mxu1  ;;  %v5178_v16 = vld [vmem:[%s8446_s14] ss:$0 sm:$0xff] }
 0xa3b   : > { %v2733_v51 = vadd.f32 %v5317_v30, %v2693_v28 }
 0xa54   : > { %v5337_v53 = vpop.f32.mrf.mxu0 }
 0xa55   : > { %v5359_v54 = vpop.f32.mrf.mxu1 }
 0xa56   : > { %v5338_v19 = vpop.f32.mrf.mxu0 }
 0xa57   : > { %v5360_v21 = vpop.f32.mrf.mxu1  ;;  %v5339_v31 = vadd.f32 %v5338_v19, %v5337_v53 }
 0xa58   : > { %v5340_v23 = vpop.f32.mrf.mxu0  ;;  %v5361_v35 = vadd.f32 %v5360_v21, %v5359_v54 }
 0xa59   : > { %v5362_v4 = vpop.f32.mrf.mxu1  ;;  %v2773_v33 = vadd.f32 %v5339_v31, %v2733_v51 }
 0xa5a   : > { %v5341_v24 = vpop.f32.mrf.mxu0 }
 0xa5b   : > { %v5363_v48 = vpop.f32.mrf.mxu1  ;;  %v2813_v38 = vadd.f32 %v5361_v35, %v2773_v33 }
 0xa74   : > { %v5381_v49 = vpop.f32.mrf.mxu0 }
 0xa75   : > { %v5403_v37 = vpop.f32.mrf.mxu1 }
 0xa76   : > { %v5382_v39 = vpop.f32.mrf.mxu0 }
 0xa77   : > { %v5383_v41 = vadd.f32 %v5382_v39, %v5381_v49  ;;  %v5404_v42 = vpop.f32.mrf.mxu1 }
 0xa78   : > { %v5384_v43 = vpop.f32.mrf.mxu0  ;;  %v5405_v7 = vadd.f32 %v5404_v42, %v5403_v37 }
 0xa79   : > { %v2853_v40 = vadd.f32 %v5383_v41, %v2813_v38  ;;  %v5406_v44 = vpop.f32.mrf.mxu1 }
 0xa7a   : > { %v5385_v20 = vpop.f32.mrf.mxu0 }
 0xa7b   : > { %v2893_v45 = vadd.f32 %v5405_v7, %v2853_v40  ;;  %v5407_v46 = vpop.f32.mrf.mxu1 }
 0xa7d   : > { %v2898_v47 = vadd.f32 %v2893_v45, %v6190_v27  ;;  %v2926_v27 = vld [vmem:[%s8445_s13] sm:$0xff] }
 0xa7e   : > { %v3264_v59 = vpack.c.bf16 %v2927_v58, %v2926_v27 }
 0xa7f   : > { %v2899_v52 = vsel %vm1162_vm1, %v2898_v47, 0.0 }
 0xa80   : > { %2900 = vadd.xlane.f32.xlu0 %v2899_v52  ;;  %5669 = vmatpush3.bf16.msra.mxu0 %v3264_v59 }
 0xa81   : > { %5679 = vmatprep.subr.mxu0 %v5803_v3 }
 0xb09   : > { %v2901_v34 = vpop.xlane.xlu0 %2900 }
 0xb0a   : > { %v2902_v55 = vmul.f32 0.03125, %v2901_v34 }
 0xb0c   : > { %v2903_v56 = vsub.f32 %v2898_v47, %v2902_v55 }
 0xb0e   : > { %v2904_v9 = vmul.f32 %v2903_v56, %v2903_v56 }
 0xb10   : > { %v2905_v29 = vsel %vm1162_vm1, %v2904_v9, 0.0 }
 0xb11   : > { %2906 = vadd.xlane.f32.xlu0 %v2905_v29 }
 0xb9a   : > { %v2907_v60 = vpop.xlane.xlu0 %2906 }
 0xb9b   : > { %v2908_v61 = vmul.f32 0.03125, %v2907_v60 }
 0xb9d   : > { %v2909_v62 = vadd.f32 1e-05, %v2908_v61 }
 0xb9f   : > { %5773 = vrsqrt.f32 %v2909_v62 }
 0xbac   : > { %v5774_v63 = vpop.eup %5773 }
 0xbad   : > { %v2911_v1 = vmul.f32 %v5774_v63, %v2903_v56 }
 0xbaf   : > { %v2918_v12 = vmul.f32 %v5176_v0, %v2911_v1 }
 0xbb1   : > { %v7224_v13 = vadd.f32 %v5177_v2, %v2918_v12 }
 0xbb3   : > { %v3263_v14 = vpack.c.bf16 %v7224_v13, %v7224_v13 }
 0xbb5   : > { %5671 = vmatmul.mubr.msk.bf16.vlgmr.msra.gmra.mxu0 %vm1162_vm1, %v3263_v14 }
 0xbb6   : > { %5681 = vmatprep.mubr.msk.f32.mxu0 %vm5804_vm0, %v5803_v3 }
 0xc75   : > { %v3309_v17 = vpop.f32.mrf.mxu0 }
 0xc76   : > { %v7234_v18 = vadd.f32 %v5178_v16, %v3309_v17 }
 0xc77   : > { %v5672_v53 = vpop.f32.mrf.mxu0 }
 0xc78   : > { %3483 = vrot.lane.b32.xlu0 %v7234_v18, %s8509_s5  ;;  %3317 = vrot.lane.b32.xlu1 %v7234_v18, %s8510_s11  ;;  %v3315_v19 = vmul.f32 0.35355338, %v7234_v18  ;;  %s8520_s5 = smov 8   ;;  %s813_s11 = scalar_lea.vmem %s8459_s27, %s8523_s1 }
 0xc79   : > { %v3312_v54 = vpop.f32.mrf.mxu0 }
 0xc7b   : > { %v5673_v21 = vpop.f32.mrf.mxu0 }
 0xc7c   : > { %3646 = vrot.lane.b32.xlu0 %v3315_v19, %s8511_s0  ;;  %3481 = vrot.lane.b32.xlu1 %v3315_v19, %s8512_s30 }
 0xc80   : > { %3811 = vrot.lane.b32.xlu0 %v3315_v19, %s8513_s10  ;;  %3648 = vrot.lane.b32.xlu1 %v7234_v18, %s8514_s7 }
 0xc84   : > { %3813 = vrot.lane.b32.xlu1 %v7234_v18, %s8515_s28 }
 0xcea   : > { %v3318_v23 = vpop.permute.xlu1 %3317  ;;  %v3484_v4 = vpop.permute.xlu0 %3483 }
 0xceb   : > { %5675 = vmatpush3.xpose.msk.msra.mxu1 %vm1210_vm2, %v3318_v23 }
 0xcec   : > { %5684 = vmatprep.subr.mxu1 %v5803_v3 }
 0xcee   : > { %v3482_v24 = vpop.permute.xlu1 %3481  ;;  %5677 = vmatmul.mubr.msk.f32.vlgmr.msra.gmra.mxu1 %vm1210_vm2, %v3315_v19  ;;  %v3647_v26 = vpop.permute.xlu0 %3646 }
 0xcef   : > { %5685 = vmatpush3.xpose.msk.msra.mxu1 %vm1210_vm2, %v3484_v4  ;;  %5686 = vmatprep.mubr.msk.f32.mxu1 %vm5804_vm0, %v5803_v3 }
 0xcf0   : > { %5694 = vmatprep.subr.mxu1 %v5803_v3 }
 0xcf2   : > { %v3649_v48 = vpop.permute.xlu1 %3648  ;;  %5687 = vmatmul.mubr.msk.f32.vlgmr.msra.gmra.mxu1 %vm1210_vm2, %v3482_v24  ;;  %v3812_v30 = vpop.permute.xlu0 %3811 }
 0xcf3   : > { %5695 = vmatpush3.xpose.msk.msra.mxu1 %vm1210_vm2, %v3649_v48  ;;  %5696 = vmatprep.mubr.msk.f32.mxu1 %vm5804_vm0, %v5803_v3 }
 0xcf4   : > { %5704 = vmatprep.subr.mxu1 %v5803_v3 }
 0xcf6   : > { %v3814_v28 = vpop.permute.xlu1 %3813  ;;  %5697 = vmatmul.mubr.msk.f32.vlgmr.msra.gmra.mxu1 %vm1210_vm2, %v3647_v26 }
 0xcf7   : > { %5705 = vmatpush3.xpose.msk.msra.mxu1 %vm1210_vm2, %v3814_v28  ;;  %5706 = vmatprep.mubr.msk.f32.mxu1 %vm5804_vm0, %v5803_v3 }
 0xcf8   : > { %5714 = vmatprep.subr.bf16.mxu1 %v5803_v3 }
 0xcfa   : > { %5707 = vmatmul.mubr.msk.f32.vlgmr.msra.gmra.mxu1 %vm1210_vm2, %v3812_v30  ;;  %v2933_v30 = vld [vmem:[%s8447_s15 + $0x10] sm:$0xff] }
 0xcfb   : > { %5718 = vmatprep.mubr.msk.bf16.mxu1 %vm5804_vm0, %v5803_v3 }
 0xdae   : > { %v3390_v31 = vpop.f32.mrf.mxu1 }
 0xdaf   : > { %v3394_v51 = vsel %vm1210_vm2, %v3390_v31, -inf }
 0xdb0   : > { %3395 = vmax.xlane.f32.xlu1 %v3394_v51  ;;  %v5678_v33 = vpop.f32.mrf.mxu1 }
 0xdb1   : > { %v2931_v33 = vld [vmem:[%s8447_s15] sm:$0xff] }
 0xdb2   : > { %v3555_v49 = vpop.f32.mrf.mxu1 }
 0xdb3   : > { %v3559_v35 = vsel %vm1210_vm2, %v3555_v49, -inf }
 0xdb4   : > { %3560 = vmax.xlane.f32.xlu0 %v3559_v35  ;;  %v5688_v37 = vpop.f32.mrf.mxu1 }
 0xdb6   : > { %v3720_v39 = vpop.f32.mrf.mxu1 }
 0xdb7   : > { %v3724_v38 = vsel %vm1210_vm2, %v3720_v39, -inf }
 0xdb8   : > { %3725 = vmax.xlane.f32.xlu0 %v3724_v38  ;;  %v5698_v41 = vpop.f32.mrf.mxu1 }
 0xdba   : > { %v3885_v42 = vpop.f32.mrf.mxu1 }
 0xdbb   : > { %v3889_v43 = vsel %vm1210_vm2, %v3885_v42, -inf }
 0xdbc   : > { %3890 = vmax.xlane.f32.xlu1 %v3889_v43  ;;  %v5708_v40 = vpop.f32.mrf.mxu1 }
 0xdcd   : > { %3570 = vrot.lane.b32.xlu1 %v7234_v18, %s8516_s29 }
 0xe39   : > { %v3396_v7 = vpop.xlane.xlu1 %3395 }
 0xe3a   : > { %v3397_v44 = vsub.f32 %v3390_v31, %v3396_v7  ;;  %v2934_v31 = vld [vmem:[%s8447_s15 + $0x18] sm:$0xff] }
 0xe3b   : > { %v3993_v51 = vpack.c.bf16 %v2934_v31, %v2933_v30  ;;  %v2973_v30 = vld [vmem:[%s8449_s17 + $0x128] sm:$0xff] }
 0xe3c   : > { %v3398_v20 = vmul.f32 1.442695, %v3397_v44  ;;  %v2989_v31 = vld [vmem:[%s8449_s17 + $0x1a8] sm:$0xff] }
 0xe3d   : > { %v3561_v45 = vpop.xlane.xlu0 %3560  ;;  %5715 = vmatpush3.bf16.msra.mxu1 %v3993_v51  ;;  %v2975_v51 = vld [vmem:[%s8449_s17 + $0x138] sm:$0xff] }
 0xe3e   : > { %5775 = vpow2.f32 %v3398_v20  ;;  %v3562_v46 = vsub.f32 %v3555_v49, %v3561_v45  ;;  %5716 = vmatprep.subr.bf16.mxu1 %v5803_v3  ;;  %v2932_v49 = vld [vmem:[%s8447_s15 + $0x8] sm:$0xff] }
 0xe3f   : > { %v3992_v35 = vpack.c.bf16 %v2932_v49, %v2931_v33  ;;  %v4093_v33 = vpack.c.bf16 %v2989_v31, %v2973_v30  ;;  %v2991_v49 = vld [vmem:[%s8449_s17 + $0x1b8] sm:$0xff]  ;;  %v2946_v30 = vld [vmem:[%s8449_s17 + $0x50] sm:$0xff] }
 0xe40   : > { %v3563_v47 = vmul.f32 1.442695, %v3562_v46  ;;  %v5192_v46 = vld [vmem:[%s8448_s16] ss:$0 sm:$0xff]  ;;  %v2962_v31 = vld [vmem:[%s8449_s17 + $0xd0] sm:$0xff] }
 0xe41   : > { %v3726_v32 = vpop.xlane.xlu0 %3725  ;;  %5717 = vmatpush3.bf16.msra.mxu1 %v3992_v35  ;;  %v4095_v35 = vpack.c.bf16 %v2991_v49, %v2975_v51  ;;  %v2981_v51 = vld [vmem:[%s8449_s17 + $0x168] sm:$0xff]  ;;  %v2983_v49 = vld [vmem:[%s8449_s17 + $0x178] sm:$0xff] }
 0xe42   : > { %5777 = vpow2.f32 %v3563_v47  ;;  %v3727_v58 = vsub.f32 %v3720_v39, %v3726_v32 }
 0xe44   : > { %v3728_v59 = vmul.f32 1.442695, %v3727_v58 }
 0xe45   : > { %v3891_v52 = vpop.xlane.xlu1 %3890 }
 0xe46   : > { %v3892_v34 = vsub.f32 %v3885_v42, %v3891_v52 }
 0xe48   : > { %v3893_v55 = vmul.f32 1.442695, %v3892_v34 }
 0xe49   : > { %v3571_v62 = vpop.permute.xlu1 %3570 }
 0xe4a   : > { %5779 = vpow2.f32 %v3893_v55 }
 0xe4b   : > { %v5776_v56 = vpop.eup %5775  ;;  %5781 = vpow2.f32 %v3728_v59  ;;  %v2969_v59 = vld [vmem:[%s8449_s17 + $0x108] sm:$0xff] }
 0xe4c   : > { %v3400_v9 = vsel %vm1210_vm2, %v5776_v56, 0.0 }
 0xe4d   : > { %3401 = vadd.xlane.f32.xlu0 %v3400_v9 }
 0xe4f   : > { %v5778_v29 = vpop.eup %5777 }
 0xe50   : > { %v3565_v36 = vsel %vm1210_vm2, %v5778_v29, 0.0 }
 0xe51   : > { %3566 = vadd.xlane.f32.xlu1 %v3565_v36 }
 0xe57   : > { %v5780_v57 = vpop.eup %5779 }
 0xe58   : > { %v3895_v27 = vsel %vm1210_vm2, %v5780_v57, 0.0  ;;  %v5782_v60 = vpop.eup %5781 }
 0xe59   : > { %3896 = vadd.xlane.f32.xlu1 %v3895_v27  ;;  %v3730_v61 = vsel %vm1210_vm2, %v5782_v60, 0.0 }
 0xe63   : > { %3405 = vrot.lane.b32.xlu0 %v7234_v18, %s8517_s3 }
 0xe6a   : > { %3735 = vrot.lane.b32.xlu1 %v7234_v18, %s8518_s6  ;;  %s8521_s6 = smov 16  }
 0xe82   : > { %3731 = vadd.xlane.f32.xlu0 %v3730_v61 }
 0xe98   : > { %3900 = vrot.lane.b32.xlu0 %v7234_v18, %s8519_s2  ;;  %s8522_s2 = smov 24  }
 0xed6   : > { %v3402_v63 = vpop.xlane.xlu0 %3401 }
 0xed7   : > { %5783 = vrcp.f32 %v3402_v63  ;;  %v2968_v63 = vld [vmem:[%s8449_s17 + $0x100] sm:$0xff] }
 0xeda   : > { %v3406_v0 = vpop.permute.xlu0 %3405  ;;  %v3567_v1 = vpop.xlane.xlu1 %3566 }
 0xedb   : > { %5785 = vrcp.f32 %v3567_v1  ;;  %5680 = vmatpush3.msra.mxu0 %v3406_v0  ;;  %v2984_v0 = vld [vmem:[%s8449_s17 + $0x180] sm:$0xff] }
 0xedc   : > { %5689 = vmatprep.subr.mxu0 %v5803_v3 }
 0xee2   : > { %v3897_v12 = vpop.xlane.xlu1 %3896 }
 0xee4   : > { %v5784_v2 = vpop.eup %5783 }
 0xee5   : > { %v3404_v14 = vmul.f32 %v5784_v2, %v5776_v56  ;;  %v4088_v2 = vpack.c.bf16 %v2984_v0, %v2968_v63  ;;  %v2995_v63 = vld [vmem:[%s8449_s17 + $0x1d8] sm:$0xff] }
 0xee6   : > { %v3736_v18 = vpop.permute.xlu1 %3735 }
 0xee7   : > { %5682 = vmatmul.mubr.msk.f32.vlgmr.msra.gmra.mxu0 %vm1210_vm2, %v3404_v14  ;;  %v2986_v14 = vld [vmem:[%s8449_s17 + $0x190] sm:$0xff] }
 0xee8   : > { %v5786_v16 = vpop.eup %5785  ;;  %5690 = vmatpush3.msra.mxu0 %v3571_v62  ;;  %5691 = vmatprep.mubr.msk.f32.mxu0 %vm5804_vm0, %v5803_v3  ;;  %v2987_v62 = vld [vmem:[%s8449_s17 + $0x198] sm:$0xff] }
 0xee9   : > { %5699 = vmatprep.subr.mxu0 %v5803_v3  ;;  %v3569_v17 = vmul.f32 %v5786_v16, %v5778_v29 }
 0xeeb   : > { %5692 = vmatmul.mubr.msk.f32.vlgmr.msra.gmra.mxu0 %vm1210_vm2, %v3569_v17  ;;  %v2937_v17 = vld [vmem:[%s8449_s17 + $0x8] sm:$0xff] }
 0xeec   : > { %5700 = vmatpush3.msra.mxu0 %v3736_v18  ;;  %5701 = vmatprep.mubr.msk.f32.mxu0 %vm5804_vm0, %v5803_v3  ;;  %v2953_v18 = vld [vmem:[%s8449_s17 + $0x88] sm:$0xff] }
 0xeed   : > { %5709 = vmatprep.subr.mxu0 %v5803_v3 }
 0xf0b   : > { %v3732_v53 = vpop.xlane.xlu0 %3731 }
 0xf0c   : > { %5787 = vrcp.f32 %v3732_v53  ;;  %v2939_v53 = vld [vmem:[%s8449_s17 + $0x18] sm:$0xff] }
 0xf0d   : > { %5789 = vrcp.f32 %v3897_v12  ;;  %v2970_v12 = vld [vmem:[%s8449_s17 + $0x110] sm:$0xff] }
 0xf0e   : > { %v4090_v16 = vpack.c.bf16 %v2986_v14, %v2970_v12  ;;  %v2992_v12 = vld [vmem:[%s8449_s17 + $0x1c0] sm:$0xff] }
 0xf0f   : > { %v3901_v23 = vpop.permute.xlu0 %3900 }
 0xf19   : > { %v5788_v54 = vpop.eup %5787 }
 0xf1a   : > { %v3734_v19 = vmul.f32 %v5788_v54, %v5782_v60  ;;  %v5790_v21 = vpop.eup %5789  ;;  %v2971_v60 = vld [vmem:[%s8449_s17 + $0x118] sm:$0xff]  ;;  %v4073_v54 = vpack.c.bf16 %v2953_v18, %v2937_v17  ;;  %v2978_v17 = vld [vmem:[%s8449_s17 + $0x150] sm:$0xff] }
 0xf1b   : > { %v3899_v4 = vmul.f32 %v5790_v21, %v5780_v57  ;;  %v4091_v1 = vpack.c.bf16 %v2987_v62, %v2971_v60  ;;  %v2936_v21 = vld [vmem:[%s8449_s17] sm:$0xff]  ;;  %v2977_v60 = vld [vmem:[%s8449_s17 + $0x148] sm:$0xff]  ;;  %v2979_v62 = vld [vmem:[%s8449_s17 + $0x158] sm:$0xff] }
 0xf1c   : > { %5702 = vmatmul.mubr.msk.f32.vlgmr.msra.gmra.mxu0 %vm1210_vm2, %v3734_v19  ;;  %v2955_v19 = vld [vmem:[%s8449_s17 + $0x98] sm:$0xff]  ;;  %v2994_v18 = vld [vmem:[%s8449_s17 + $0x1d0] sm:$0xff] }
 0xf1d   : > { %5710 = vmatpush3.msra.mxu0 %v3901_v23  ;;  %5711 = vmatprep.mubr.msk.f32.mxu0 %vm5804_vm0, %v5803_v3  ;;  %v2952_v23 = vld [vmem:[%s8449_s17 + $0x80] sm:$0xff] }
 0xf1e   : > { %4242 = vmatprep.subr.bf16.mxu1 %v4091_v1 }
 0xf20   : > { %5712 = vmatmul.mubr.msk.f32.vlgmr.msra.gmra.mxu0 %vm1210_vm2, %v3899_v4  ;;  %v4075_v4 = vpack.c.bf16 %v2955_v19, %v2939_v53  ;;  %v2945_v53 = vld [vmem:[%s8449_s17 + $0x48] sm:$0xff]  ;;  %v2947_v19 = vld [vmem:[%s8449_s17 + $0x58] sm:$0xff] }
 0xf21   : > { %4221 = vmatprep.mubr.bf16.mxu0 %v5819_v6 }
 0xfa7   : > { %v3477_v24 = vpop.f32.mrf.mxu0 }
 0xfa9   : > { %v5683_v48 = vpop.f32.mrf.mxu0 }
 0xfaa   : > { %v2938_v48 = vld [vmem:[%s8449_s17 + $0x10] sm:$0xff] }
 0xfab   : > { %v3642_v26 = vpop.f32.mrf.mxu0 }
 0xfac   : > { %3977 = vrot.lane.b32.xlu1 %v3642_v26, %s8520_s5  ;;  %v2954_v26 = vld [vmem:[%s8449_s17 + $0x90] sm:$0xff] }
 0xfad   : > { %v5693_v28 = vpop.f32.mrf.mxu0 }
 0xfae   : > { %v4074_v28 = vpack.c.bf16 %v2954_v26, %v2938_v48  ;;  %v2960_v48 = vld [vmem:[%s8449_s17 + $0xc0] sm:$0xff] }
 0xfdc   : > { %v3807_v37 = vpop.f32.mrf.mxu0 }
 0xfdd   : > { %3981 = vrot.lane.b32.xlu0 %v3807_v37, %s8521_s6 }
 0xfde   : > { %v5703_v39 = vpop.f32.mrf.mxu0 }
 0xfe0   : > { %v3972_v38 = vpop.f32.mrf.mxu0 }
 0xfe1   : > { %3985 = vrot.lane.b32.xlu1 %v3972_v38, %s8522_s2 }
 0xfe2   : > { %v5713_v41 = vpop.f32.mrf.mxu0 }
0x101e   : > { %v3978_v42 = vpop.permute.xlu1 %3977 }
0x101f   : > { %v3988_v40 = vsel %vm1210_vm2, %v3477_v24, %v3978_v42  ;;  %v4072_v24 = vpack.c.bf16 %v2952_v23, %v2936_v21  ;;  %v5194_v42 = vld [vmem:[%s8453_s21] ss:$0 sm:$0xff]  ;;  %v2963_v21 = vld [vmem:[%s8449_s17 + $0xd8] sm:$0xff] }
0x104f   : > { %v3982_v43 = vpop.permute.xlu0 %3981 }
0x1050   : > { %v3989_v7 = vsel %vm1881_vm3, %v3988_v40, %v3982_v43  ;;  %v5195_v40 = vld [vmem:[%s8454_s22] ss:$0 sm:$0xff] }
0x1053   : > { %v3986_v44 = vpop.permute.xlu1 %3985 }
0x1054   : > { %v3990_v20 = vsel %vm1883_vm4, %v3989_v7, %v3986_v44  ;;  %v2972_v7 = vld [vmem:[%s8449_s17 + $0x120] sm:$0xff] }
0x1055   : > { %v3991_v45 = vpack.c.bf16 %v3990_v20, %v3990_v20  ;;  %v2988_v44 = vld [vmem:[%s8449_s17 + $0x1a0] sm:$0xff] }
0x1057   : > { %5719 = vmatmul.mubr.msk.bf16.vlgmr.msra.gmra.mxu1 %vm1162_vm1, %v3991_v45  ;;  %v2974_v45 = vld [vmem:[%s8449_s17 + $0x130] sm:$0xff] }
0x1058   : > { %4262 = vmatprep.mubr.bf16.mxu1 %v5819_v6  ;;  %4243 = vmatpush1.bf16.msra.mxu1 %v4090_v16  ;;  %v4099_v16 = vpack.c.bf16 %v2995_v63, %v2979_v62  ;;  %v3016_v62 = vld [vmem:[%s8451_s19 + $0x70] sm:$0xff]  ;;  %v3017_v63 = vld [vmem:[%s8451_s19 + $0x78] sm:$0xff] }
0x1059   : > { %4244 = vmatprep.subr.bf16.mxu1 %v4075_v4  ;;  %v4098_v4 = vpack.c.bf16 %v2994_v18, %v2978_v17  ;;  %v3062_v17 = vld [vmem:[%s8451_s19 + $0x1e0] sm:$0xff]  ;;  %v3063_v18 = vld [vmem:[%s8451_s19 + $0x1e8] sm:$0xff] }
0x105c   : > { %4245 = vmatpush1.bf16.msra.mxu1 %v4074_v28  ;;  %v4083_v28 = vpack.c.bf16 %v2963_v21, %v2947_v19  ;;  %v3015_v19 = vld [vmem:[%s8451_s19 + $0x68] sm:$0xff] }
0x105d   : > { %4324 = vmatprep.subr.bf16.mxu1 %v4095_v35  ;;  %v2999_v35 = vld [vmem:[%s8449_s17 + $0x1f8] sm:$0xff] }
0x1117   : > { %v4037_v47 = vpop.f32.mrf.mxu1 }
0x1118   : > { %v4038_v52 = vadd.f32 %v5192_v46, %v4037_v47  ;;  %v2990_v46 = vld [vmem:[%s8449_s17 + $0x1b0] sm:$0xff]  ;;  %v2941_v47 = vld [vmem:[%s8449_s17 + $0x28] sm:$0xff] }
0x1119   : > { %v5720_v34 = vpop.f32.mrf.mxu1 }
0x111a   : > { %v4043_v55 = vadd.f32 %v4038_v52, %v7224_v13  ;;  %v2985_v13 = vld [vmem:[%s8449_s17 + $0x188] sm:$0xff]  ;;  %v2943_v34 = vld [vmem:[%s8449_s17 + $0x38] sm:$0xff] }
0x111b   : > { %v4040_v56 = vpop.f32.mrf.mxu1  ;;  %v4089_v61 = vpack.c.bf16 %v2985_v13, %v2969_v59  ;;  %v2957_v52 = vld [vmem:[%s8449_s17 + $0xa8] sm:$0xff]  ;;  %v2942_v59 = vld [vmem:[%s8449_s17 + $0x30] sm:$0xff] }
0x111c   : > { %v4044_v9 = vsel %vm1162_vm1, %v4043_v55, 0.0  ;;  %v2958_v13 = vld [vmem:[%s8449_s17 + $0xb0] sm:$0xff] }
0x111d   : > { %4045 = vadd.xlane.f32.xlu0 %v4044_v9  ;;  %v5721_v29 = vpop.f32.mrf.mxu1  ;;  %4201 = vmatprep.subr.bf16.mxu0 %v4089_v61  ;;  %v4092_v9 = vpack.c.bf16 %v2988_v44, %v2972_v7  ;;  %v2993_v61 = vld [vmem:[%s8449_s17 + $0x1c8] sm:$0xff]  ;;  %v4078_v1 = vpack.c.bf16 %v2958_v13, %v2942_v59  ;;  %v2998_v7 = vld [vmem:[%s8449_s17 + $0x1f0] sm:$0xff]  ;;  %v3065_v13 = vld [vmem:[%s8451_s19 + $0x1f8] sm:$0xff] }
0x111e   : > { %4202 = vmatpush1.bf16.msra.mxu0 %v4088_v2  ;;  %v4094_v29 = vpack.c.bf16 %v2990_v46, %v2974_v45  ;;  %v2976_v2 = vld [vmem:[%s8449_s17 + $0x140] sm:$0xff]  ;;  %v4097_v14 = vpack.c.bf16 %v2993_v61, %v2977_v60  ;;  %v2949_v44 = vld [vmem:[%s8449_s17 + $0x68] sm:$0xff]  ;;  %v2951_v45 = vld [vmem:[%s8449_s17 + $0x78] sm:$0xff] }
0x111f   : > { %4203 = vmatprep.subr.bf16.mxu0 %v4073_v54  ;;  %v2961_v54 = vld [vmem:[%s8449_s17 + $0xc8] sm:$0xff]  ;;  %v4096_v23 = vpack.c.bf16 %v2992_v12, %v2976_v2  ;;  %v2967_v46 = vld [vmem:[%s8449_s17 + $0xf8] sm:$0xff]  ;;  %v3064_v59 = vld [vmem:[%s8451_s19 + $0x1f0] sm:$0xff] }
0x1120   : > { %v4081_v26 = vpack.c.bf16 %v2961_v54, %v2945_v53  ;;  %v3048_v2 = vld [vmem:[%s8451_s19 + $0x170] sm:$0xff]  ;;  %v3049_v12 = vld [vmem:[%s8451_s19 + $0x178] sm:$0xff]  ;;  %v4556_v53 = vpack.c.bf16 %v3017_v63, %v3016_v62  ;;  %v3022_v62 = vld [vmem:[%s8451_s19 + $0xa0] sm:$0xff] }
0x1121   : > { %v4572_v54 = vpack.c.bf16 %v3049_v12, %v3048_v2  ;;  %v3023_v63 = vld [vmem:[%s8451_s19 + $0xa8] sm:$0xff] }
0x1122   : > { %4204 = vmatpush1.bf16.msra.mxu0 %v4072_v24  ;;  %v2944_v24 = vld [vmem:[%s8449_s17 + $0x40] sm:$0xff] }
0x1123   : > { %4283 = vmatprep.subr.bf16.mxu0 %v4093_v33  ;;  %v2997_v33 = vld [vmem:[%s8449_s17 + $0x1e8] sm:$0xff] }
0x11a6   : > { %v4046_v36 = vpop.xlane.xlu0 %4045 }
0x11a7   : > { %v4047_v57 = vmul.f32 0.03125, %v4046_v36  ;;  %v2940_v36 = vld [vmem:[%s8449_s17 + $0x20] sm:$0xff] }
0x11a9   : > { %v4048_v27 = vsub.f32 %v4043_v55, %v4047_v57  ;;  %v2959_v55 = vld [vmem:[%s8449_s17 + $0xb8] sm:$0xff]  ;;  %v2956_v57 = vld [vmem:[%s8449_s17 + $0xa0] sm:$0xff] }
0x11aa   : > { %v4076_v0 = vpack.c.bf16 %v2956_v57, %v2940_v36  ;;  %v2950_v36 = vld [vmem:[%s8449_s17 + $0x70] sm:$0xff] }
0x11ab   : > { %v4049_v32 = vmul.f32 %v4048_v27, %v4048_v27  ;;  %v2966_v57 = vld [vmem:[%s8449_s17 + $0xf0] sm:$0xff] }
0x11ac   : > { %v4086_v61 = vpack.c.bf16 %v2966_v57, %v2950_v36 }
0x11ad   : > { %v4050_v58 = vsel %vm1162_vm1, %v4049_v32, 0.0  ;;  %v4077_v32 = vpack.c.bf16 %v2957_v52, %v2941_v47 }
0x11ae   : > { %4051 = vadd.xlane.f32.xlu1 %v4050_v58  ;;  %v4079_v58 = vpack.c.bf16 %v2959_v55, %v2943_v34  ;;  %v2948_v34 = vld [vmem:[%s8449_s17 + $0x60] sm:$0xff] }
0x11af   : > { %v2964_v55 = vld [vmem:[%s8449_s17 + $0xe0] sm:$0xff] }
0x11b0   : > { %v4084_v60 = vpack.c.bf16 %v2964_v55, %v2948_v34  ;;  %v3024_v34 = vld [vmem:[%s8451_s19 + $0xb0] sm:$0xff]  ;;  %v3025_v55 = vld [vmem:[%s8451_s19 + $0xb8] sm:$0xff] }
0x1237   : > { %v4052_v37 = vpop.xlane.xlu1 %4051 }
0x1238   : > { %v4053_v39 = vmul.f32 0.03125, %v4052_v37  ;;  %v4080_v37 = vpack.c.bf16 %v2960_v48, %v2944_v24  ;;  %v3047_v24 = vld [vmem:[%s8451_s19 + $0x168] sm:$0xff]  ;;  %v3028_v48 = vld [vmem:[%s8451_s19 + $0xd0] sm:$0xff] }
0x123a   : > { %v4054_v38 = vadd.f32 1e-05, %v4053_v39  ;;  %v4082_v39 = vpack.c.bf16 %v2962_v31, %v2946_v30  ;;  %v3061_v30 = vld [vmem:[%s8451_s19 + $0x1d8] sm:$0xff] }
0x123c   : > { %5791 = vrsqrt.f32 %v4054_v38  ;;  %v2980_v38 = vld [vmem:[%s8449_s17 + $0x160] sm:$0xff] }
0x1249   : > { %v5792_v41 = vpop.eup %5791 }
0x124a   : > { %v4056_v43 = vmul.f32 %v5792_v41, %v4048_v27  ;;  %v2996_v41 = vld [vmem:[%s8449_s17 + $0x1e0] sm:$0xff] }
0x124b   : > { %v4100_v47 = vpack.c.bf16 %v2996_v41, %v2980_v38  ;;  %v3026_v38 = vld [vmem:[%s8451_s19 + $0xc0] sm:$0xff]  ;;  %v3027_v41 = vld [vmem:[%s8451_s19 + $0xc8] sm:$0xff] }
0x124c   : > { %v4063_v20 = vmul.f32 %v5194_v42, %v4056_v43  ;;  %v4101_v42 = vpack.c.bf16 %v2997_v33, %v2981_v51  ;;  %v4103_v43 = vpack.c.bf16 %v2999_v35, %v2983_v49  ;;  %v3012_v33 = vld [vmem:[%s8451_s19 + $0x50] sm:$0xff]  ;;  %v3013_v49 = vld [vmem:[%s8451_s19 + $0x58] sm:$0xff] }
0x124e   : > { %v7415_v56 = vadd.f32 %v5195_v40, %v4063_v20  ;;  %v2982_v40 = vld [vmem:[%s8449_s17 + $0x170] sm:$0xff]  ;;  %v2965_v20 = vld [vmem:[%s8449_s17 + $0xe8] sm:$0xff] }
0x124f   : > { %v4102_v52 = vpack.c.bf16 %v2998_v7, %v2982_v40  ;;  %v4554_v40 = vpack.c.bf16 %v3013_v49, %v3012_v33  ;;  %v3037_v33 = vld [vmem:[%s8451_s19 + $0x118] sm:$0xff] }
0x1250   : > { %v7425_v27 = vpack.c.bf16 %v7415_v56, %v7415_v56 }
0x1252   : > { %5196 = vmatmul.mubr.msk.bf16.vlgmr.msra.gmra.mxu0 %vm1162_vm1, %v7425_v27  ;;  %5197 = vmatmul.mubr.msk.bf16.vlgmr.msra.gmra.mxu1 %vm1162_vm1, %v7425_v27 }
0x1253   : > { %4284 = vmatpush1.bf16.msra.mxu0 %v4092_v9  ;;  %4325 = vmatpush1.bf16.msra.mxu1 %v4094_v29  ;;  %v4085_v9 = vpack.c.bf16 %v2965_v20, %v2949_v44  ;;  %v4087_v29 = vpack.c.bf16 %v2967_v46, %v2951_v45  ;;  %v3010_v44 = vld [vmem:[%s8451_s19 + $0x40] sm:$0xff]  ;;  %v3011_v20 = vld [vmem:[%s8451_s19 + $0x48] sm:$0xff]  ;;  %v4561_v45 = vpack.c.bf16 %v3027_v41, %v3026_v38 }
0x1254   : > { %4285 = vmatprep.subr.bf16.mxu0 %v4077_v32  ;;  %4326 = vmatprep.subr.bf16.mxu1 %v4079_v58  ;;  %v3032_v32 = vld [vmem:[%s8451_s19 + $0xf0] sm:$0xff]  ;;  %v3033_v58 = vld [vmem:[%s8451_s19 + $0xf8] sm:$0xff]  ;;  %v4553_v36 = vpack.c.bf16 %v3011_v20, %v3010_v44  ;;  %v3051_v38 = vld [vmem:[%s8451_s19 + $0x188] sm:$0xff] }
0x1255   : > { %4303 = vmatprep.mubr.bf16.mxu0 %v5819_v6  ;;  %4344 = vmatprep.mubr.bf16.mxu1 %v5819_v6  ;;  %v3002_v41 = vld [vmem:[%s8451_s19] sm:$0xff]  ;;  %v3035_v44 = vld [vmem:[%s8451_s19 + $0x108] sm:$0xff] }
0x1257   : > { %4286 = vmatpush1.bf16.msra.mxu0 %v4076_v0  ;;  %4327 = vmatpush1.bf16.msra.mxu1 %v4078_v1  ;;  %v4564_v0 = vpack.c.bf16 %v3033_v58, %v3032_v32  ;;  %v4580_v1 = vpack.c.bf16 %v3065_v13, %v3064_v59  ;;  %v3008_v32 = vld [vmem:[%s8451_s19 + $0x30] sm:$0xff]  ;;  %v3009_v58 = vld [vmem:[%s8451_s19 + $0x38] sm:$0xff]  ;;  %v4560_v59 = vpack.c.bf16 %v3025_v55, %v3024_v34 }
0x1258   : > { %4365 = vmatprep.subr.bf16.mxu0 %v4097_v14  ;;  %4406 = vmatprep.subr.bf16.mxu1 %v4099_v16  ;;  %v3030_v14 = vld [vmem:[%s8451_s19 + $0xe0] sm:$0xff]  ;;  %v3031_v16 = vld [vmem:[%s8451_s19 + $0xe8] sm:$0xff]  ;;  %v4552_v2 = vpack.c.bf16 %v3009_v58, %v3008_v32  ;;  %v3129_v34 = vld [vmem:[%s8451_s19 + $0x3f8] sm:$0xff] }
0x1259   : > { %v4563_v21 = vpack.c.bf16 %v3031_v16, %v3030_v14  ;;  %v3006_v14 = vld [vmem:[%s8451_s19 + $0x20] sm:$0xff]  ;;  %v4559_v16 = vpack.c.bf16 %v3023_v63, %v3022_v62 }
0x125a   : > { %5198 = vmatmul.mubr.msk.bf16.vlgmr.msra.gmra.mxu0 %vm1162_vm1, %v7425_v27  ;;  %5199 = vmatmul.mubr.msk.bf16.vlgmr.msra.gmra.mxu1 %vm1162_vm1, %v7425_v27 }
0x125b   : > { %4366 = vmatpush1.bf16.msra.mxu0 %v4096_v23  ;;  %4407 = vmatpush1.bf16.msra.mxu1 %v4098_v4  ;;  %v4579_v23 = vpack.c.bf16 %v3063_v18, %v3062_v17  ;;  %v3046_v4 = vld [vmem:[%s8451_s19 + $0x160] sm:$0xff]  ;;  %v3007_v18 = vld [vmem:[%s8451_s19 + $0x28] sm:$0xff] }
0x125c   : > { %4367 = vmatprep.subr.bf16.mxu0 %v4081_v26  ;;  %4408 = vmatprep.subr.bf16.mxu1 %v4083_v28  ;;  %v3029_v26 = vld [vmem:[%s8451_s19 + $0xd8] sm:$0xff]  ;;  %v3060_v28 = vld [vmem:[%s8451_s19 + $0x1d0] sm:$0xff]  ;;  %v4571_v51 = vpack.c.bf16 %v3047_v24, %v3046_v4 }
0x125d   : > { %4385 = vmatprep.mubr.bf16.mxu0 %v5819_v6  ;;  %4426 = vmatprep.mubr.bf16.mxu1 %v5819_v6  ;;  %v4562_v35 = vpack.c.bf16 %v3029_v26, %v3028_v48  ;;  %v3052_v4 = vld [vmem:[%s8451_s19 + $0x190] sm:$0xff]  ;;  %v3053_v48 = vld [vmem:[%s8451_s19 + $0x198] sm:$0xff] }
0x125e   : > { %v3004_v26 = vld [vmem:[%s8451_s19 + $0x10] sm:$0xff] }
0x125f   : > { %4368 = vmatpush1.bf16.msra.mxu0 %v4080_v37  ;;  %4409 = vmatpush1.bf16.msra.mxu1 %v4082_v39  ;;  %v4578_v37 = vpack.c.bf16 %v3061_v30, %v3060_v28  ;;  %v3045_v39 = vld [vmem:[%s8451_s19 + $0x158] sm:$0xff]  ;;  %v4574_v30 = vpack.c.bf16 %v3053_v48, %v3052_v4  ;;  %v3127_v4 = vld [vmem:[%s8451_s19 + $0x3e8] sm:$0xff] }
0x1260   : > { %4447 = vmatprep.subr.bf16.mxu0 %v4101_v42  ;;  %4488 = vmatprep.subr.bf16.mxu1 %v4103_v43  ;;  %v3058_v42 = vld [vmem:[%s8451_s19 + $0x1c0] sm:$0xff]  ;;  %v3059_v43 = vld [vmem:[%s8451_s19 + $0x1c8] sm:$0xff]  ;;  %v3005_v28 = vld [vmem:[%s8451_s19 + $0x18] sm:$0xff] }
0x1261   : > { %v4577_v46 = vpack.c.bf16 %v3059_v43, %v3058_v42  ;;  %v3003_v42 = vld [vmem:[%s8451_s19 + $0x8] sm:$0xff] }
0x1262   : > { %5200 = vmatmul.mubr.msk.bf16.vlgmr.msra.gmra.mxu0 %vm1162_vm1, %v7425_v27  ;;  %5201 = vmatmul.mubr.msk.bf16.vlgmr.msra.gmra.mxu1 %vm1162_vm1, %v7425_v27 }
0x1263   : > { %4448 = vmatpush1.bf16.msra.mxu0 %v4100_v47  ;;  %4489 = vmatpush1.bf16.msra.mxu1 %v4102_v52  ;;  %v3042_v47 = vld [vmem:[%s8451_s19 + $0x140] sm:$0xff]  ;;  %v3043_v52 = vld [vmem:[%s8451_s19 + $0x148] sm:$0xff] }
0x1264   : > { %4449 = vmatprep.subr.bf16.mxu0 %v4085_v9  ;;  %4490 = vmatprep.subr.bf16.mxu1 %v4087_v29  ;;  %v3056_v9 = vld [vmem:[%s8451_s19 + $0x1b0] sm:$0xff]  ;;  %v3057_v29 = vld [vmem:[%s8451_s19 + $0x1b8] sm:$0xff]  ;;  %v4569_v57 = vpack.c.bf16 %v3043_v52, %v3042_v47 }
0x1265   : > { %4467 = vmatprep.mubr.bf16.mxu0 %v5819_v6  ;;  %4508 = vmatprep.mubr.bf16.mxu1 %v5819_v6  ;;  %v3014_v6 = vld [vmem:[%s8451_s19 + $0x60] sm:$0xff]  ;;  %v4576_v13 = vpack.c.bf16 %v3057_v29, %v3056_v9  ;;  %v3128_v47 = vld [vmem:[%s8451_s19 + $0x3f0] sm:$0xff] }
0x1266   : > { %v4555_v31 = vpack.c.bf16 %v3015_v19, %v3014_v6  ;;  %v4551_v6 = vpack.c.bf16 %v3007_v18, %v3006_v14  ;;  %v4612_v55 = vpack.c.bf16 %v3129_v34, %v3128_v47  ;;  %v7758_v9 = vld [vmem:[%s8450_s18] sm:$0xff]  ;;  %v3112_v18 = vld [vmem:[%s8451_s19 + $0x370] sm:$0xff] }
0x1267   : > { %4450 = vmatpush1.bf16.msra.mxu0 %v4084_v60  ;;  %4491 = vmatpush1.bf16.msra.mxu1 %v4086_v61  ;;  %v3040_v60 = vld [vmem:[%s8451_s19 + $0x130] sm:$0xff]  ;;  %v3041_v61 = vld [vmem:[%s8451_s19 + $0x138] sm:$0xff]  ;;  %v4109_v29 = vrot.slane %v7758_v9, %v6533_v5  ;;  %v4121_v32 = vrot.slane %v7758_v9, %v6547_v11 }
0x1268   : > { %5431 = vmatprep.subr.bf16.mxu0 %v4564_v0  ;;  %5453 = vmatprep.subr.bf16.mxu1 %v4580_v1  ;;  %v3054_v0 = vld [vmem:[%s8451_s19 + $0x1a0] sm:$0xff]  ;;  %v3055_v1 = vld [vmem:[%s8451_s19 + $0x1a8] sm:$0xff]  ;;  %v4568_v12 = vpack.c.bf16 %v3041_v61, %v3040_v60 }
0x1269   : > { %v4575_v17 = vpack.c.bf16 %v3055_v1, %v3054_v0  ;;  %v3080_v1 = vld [vmem:[%s8451_s19 + $0x270] sm:$0xff] }
0x126a   : > { %5202 = vmatmul.mubr.msk.bf16.vlgmr.msra.gmra.mxu0 %vm1162_vm1, %v7425_v27  ;;  %5203 = vmatmul.mubr.msk.bf16.vlgmr.msra.gmra.mxu1 %vm1162_vm1, %v7425_v27  ;;  %v3044_v27 = vld [vmem:[%s8451_s19 + $0x150] sm:$0xff] }
0x126b   : > { %5432 = vmatpush3.bf16.msra.mxu0 %v4556_v53  ;;  %5454 = vmatpush3.bf16.msra.mxu1 %v4572_v54  ;;  %v4570_v7 = vpack.c.bf16 %v3045_v39, %v3044_v27  ;;  %v3038_v53 = vld [vmem:[%s8451_s19 + $0x120] sm:$0xff]  ;;  %v3039_v54 = vld [vmem:[%s8451_s19 + $0x128] sm:$0xff] }
0x126c   : > { %5433 = vmatprep.subr.bf16.mxu0 %v4563_v21  ;;  %5455 = vmatprep.subr.bf16.mxu1 %v4579_v23  ;;  %v4567_v19 = vpack.c.bf16 %v3039_v54, %v3038_v53  ;;  %v3020_v21 = vld [vmem:[%s8451_s19 + $0x90] sm:$0xff]  ;;  %v3021_v23 = vld [vmem:[%s8451_s19 + $0x98] sm:$0xff]  ;;  %v3050_v27 = vld [vmem:[%s8451_s19 + $0x180] sm:$0xff] }
0x126d   : > { %v4558_v24 = vpack.c.bf16 %v3021_v23, %v3020_v21  ;;  %v4573_v43 = vpack.c.bf16 %v3051_v38, %v3050_v27  ;;  %v3113_v53 = vld [vmem:[%s8451_s19 + $0x378] sm:$0xff]  ;;  %v3094_v54 = vld [vmem:[%s8451_s19 + $0x2e0] sm:$0xff]  ;;  %v3095_v21 = vld [vmem:[%s8451_s19 + $0x2e8] sm:$0xff] }
0x126e   : > { %v3126_v23 = vld [vmem:[%s8451_s19 + $0x3e0] sm:$0xff] }
0x126f   : > { %5434 = vmatpush3.bf16.msra.mxu0 %v4555_v31  ;;  %5456 = vmatpush3.bf16.msra.mxu1 %v4571_v51  ;;  %v4550_v31 = vpack.c.bf16 %v3005_v28, %v3004_v26  ;;  %v3036_v51 = vld [vmem:[%s8451_s19 + $0x110] sm:$0xff]  ;;  %v4129_v26 = vrot.slane %v7758_v9, %v6558_v22 }
0x1270   : > { %5435 = vmatprep.subr.bf16.mxu0 %v4562_v35  ;;  %5457 = vmatprep.subr.bf16.mxu1 %v4578_v37  ;;  %v4566_v49 = vpack.c.bf16 %v3037_v33, %v3036_v51  ;;  %v3018_v35 = vld [vmem:[%s8451_s19 + $0x80] sm:$0xff]  ;;  %v3019_v37 = vld [vmem:[%s8451_s19 + $0x88] sm:$0xff]  ;;  %v4137_v51 = vrot.slane %v7758_v9, %v6561_v25  ;;  %v4604_v33 = vpack.c.bf16 %v3113_v53, %v3112_v18 }
0x1271   : > { %v4557_v39 = vpack.c.bf16 %v3019_v37, %v3018_v35  ;;  %v3079_v35 = vld [vmem:[%s8451_s19 + $0x268] sm:$0xff] }
0x1273   : > { %5436 = vmatpush3.bf16.msra.mxu0 %v4554_v40  ;;  %5458 = vmatpush3.bf16.msra.mxu1 %v4570_v7  ;;  %v4549_v40 = vpack.c.bf16 %v3003_v42, %v3002_v41  ;;  %v3034_v7 = vld [vmem:[%s8451_s19 + $0x100] sm:$0xff]  ;;  %v4595_v41 = vpack.c.bf16 %v3095_v21, %v3094_v54  ;;  %v4611_v42 = vpack.c.bf16 %v3127_v4, %v3126_v23 }
0x1274   : > { %5437 = vmatprep.subr.bf16.mxu0 %v4561_v45  ;;  %5459 = vmatprep.subr.bf16.mxu1 %v4577_v46  ;;  %v4565_v20 = vpack.c.bf16 %v3035_v44, %v3034_v7  ;;  %v3096_v45 = vld [vmem:[%s8451_s19 + $0x2f0] sm:$0xff]  ;;  %v3097_v46 = vld [vmem:[%s8451_s19 + $0x2f8] sm:$0xff] }
0x1275   : > { %v4596_v52 = vpack.c.bf16 %v3097_v46, %v3096_v45  ;;  %v3092_v7 = vld [vmem:[%s8451_s19 + $0x2d0] sm:$0xff]  ;;  %v3093_v44 = vld [vmem:[%s8451_s19 + $0x2d8] sm:$0xff] }
0x1276   : > { %v3125_v45 = vld [vmem:[%s8451_s19 + $0x3d8] sm:$0xff] }
0x1277   : > { %5438 = vmatpush3.bf16.msra.mxu0 %v4553_v36  ;;  %5460 = vmatpush3.bf16.msra.mxu1 %v4569_v57  ;;  %v4117_v36 = vrot.slane %v7758_v9, %v6536_v8  ;;  %v4113_v57 = vrot.slane %v7758_v9, %v6544_v10 }
0x1278   : > { %5439 = vmatprep.subr.bf16.mxu0 %v4560_v59  ;;  %5461 = vmatprep.subr.bf16.mxu1 %v4576_v13 }
0x127b   : > { %5440 = vmatpush3.bf16.msra.mxu0 %v4552_v2  ;;  %5462 = vmatpush3.bf16.msra.mxu1 %v4568_v12  ;;  %v3081_v2 = vld [vmem:[%s8451_s19 + $0x278] sm:$0xff] }
0x127c   : > { %5441 = vmatprep.subr.bf16.mxu0 %v4559_v16  ;;  %5463 = vmatprep.subr.bf16.mxu1 %v4575_v17  ;;  %v4588_v28 = vpack.c.bf16 %v3081_v2, %v3080_v1  ;;  %v3091_v1 = vld [vmem:[%s8451_s19 + $0x2c8] sm:$0xff]  ;;  %v3122_v2 = vld [vmem:[%s8451_s19 + $0x3c0] sm:$0xff] }
0x127f   : > { %5442 = vmatpush3.bf16.msra.mxu0 %v4551_v6  ;;  %5464 = vmatpush3.bf16.msra.mxu1 %v4567_v19 }
0x1280   : > { %5443 = vmatprep.subr.bf16.mxu0 %v4558_v24  ;;  %5465 = vmatprep.subr.bf16.mxu1 %v4574_v30 }
0x1283   : > { %5444 = vmatpush3.bf16.msra.mxu0 %v4550_v31  ;;  %5466 = vmatpush3.bf16.msra.mxu1 %v4566_v49  ;;  %v3078_v49 = vld [vmem:[%s8451_s19 + $0x260] sm:$0xff] }
0x1284   : > { %5445 = vmatprep.subr.bf16.mxu0 %v4557_v39  ;;  %5467 = vmatprep.subr.bf16.mxu1 %v4573_v43  ;;  %v3110_v43 = vld [vmem:[%s8451_s19 + $0x360] sm:$0xff] }
0x1287   : > { %5446 = vmatpush3.bf16.msra.mxu0 %v4549_v40  ;;  %5468 = vmatpush3.bf16.msra.mxu1 %v4565_v20  ;;  %v3111_v40 = vld [vmem:[%s8451_s19 + $0x368] sm:$0xff]  ;;  %v3124_v20 = vld [vmem:[%s8451_s19 + $0x3d0] sm:$0xff] }
0x1288   : > { %5475 = vmatprep.subr.bf16.mxu0 %v4596_v52  ;;  %5497 = vmatprep.subr.bf16.mxu1 %v4612_v55  ;;  %v4587_v52 = vpack.c.bf16 %v3079_v35, %v3078_v49  ;;  %v7883_v35 = vld [vmem:[%s8450_s18 + $0x8] sm:$0xff] }
0x1312   : > { %v4223_v58 = vpop.f32.mrf.mxu0  ;;  %v4264_v59 = vpop.f32.mrf.mxu1 }
0x1313   : > { %v4224_v13 = vadd.f32 %v4223_v58, %v4109_v29  ;;  %v4265_v60 = vadd.f32 %v4264_v59, %v4117_v36  ;;  %v4603_v29 = vpack.c.bf16 %v3111_v40, %v3110_v43  ;;  %v3076_v36 = vld [vmem:[%s8451_s19 + $0x250] sm:$0xff]  ;;  %v4594_v59 = vpack.c.bf16 %v3093_v44, %v3092_v7 }
0x1314   : > { %v4225_v61 = vpop.f32.mrf.mxu0  ;;  %v4266_v62 = vpop.f32.mrf.mxu1 }
0x1315   : > { %v4226_v63 = vadd.f32 %v4225_v61, %v4113_v57  ;;  %v4267_v0 = vadd.f32 %v4266_v62, %v4121_v32  ;;  %v4517_v12 = vmax.f32 %v4224_v13, 0.0  ;;  %v4519_v14 = vmax.f32 %v4265_v60, 0.0  ;;  %v3077_v57 = vld [vmem:[%s8451_s19 + $0x258] sm:$0xff]  ;;  %v3108_v60 = vld [vmem:[%s8451_s19 + $0x350] sm:$0xff]  ;;  %v3090_v62 = vld [vmem:[%s8451_s19 + $0x2c0] sm:$0xff] }
0x1316   : > { %v4227_v16 = vpop.f32.mrf.mxu0  ;;  %v4268_v17 = vpop.f32.mrf.mxu1  ;;  %v4610_v13 = vpack.c.bf16 %v3125_v45, %v3124_v20  ;;  %v3109_v61 = vld [vmem:[%s8451_s19 + $0x358] sm:$0xff]  ;;  %v4593_v4 = vpack.c.bf16 %v3091_v1, %v3090_v62  ;;  %v3104_v20 = vld [vmem:[%s8451_s19 + $0x330] sm:$0xff] }
0x1317   : > { %v4518_v6 = vmax.f32 %v4226_v63, 0.0  ;;  %v4520_v19 = vmax.f32 %v4267_v0, 0.0  ;;  %v4533_v37 = vpack.c.bf16 %v4517_v12, %v4517_v12  ;;  %v4535_v27 = vpack.c.bf16 %v4519_v14, %v4519_v14  ;;  %v3123_v12 = vld [vmem:[%s8451_s19 + $0x3c8] sm:$0xff]  ;;  %v3105_v45 = vld [vmem:[%s8451_s19 + $0x338] sm:$0xff]  ;;  %v3084_v1 = vld [vmem:[%s8451_s19 + $0x290] sm:$0xff] }
0x1318   : > { %v4228_v24 = vpop.f32.mrf.mxu0  ;;  %v4269_v48 = vpop.f32.mrf.mxu1  ;;  %v4586_v17 = vpack.c.bf16 %v3077_v57, %v3076_v36  ;;  %v4602_v54 = vpack.c.bf16 %v3109_v61, %v3108_v60 }
0x1319   : > { %v4534_v30 = vpack.c.bf16 %v4518_v6, %v4518_v6  ;;  %v4536_v31 = vpack.c.bf16 %v4520_v19, %v4520_v19  ;;  %v3074_v6 = vld [vmem:[%s8451_s19 + $0x240] sm:$0xff]  ;;  %v3075_v19 = vld [vmem:[%s8451_s19 + $0x248] sm:$0xff]  ;;  %v4609_v24 = vpack.c.bf16 %v3123_v12, %v3122_v2  ;;  %v3085_v12 = vld [vmem:[%s8451_s19 + $0x298] sm:$0xff] }
0x131a   : > { %v7802_v39 = vpop.f32.mrf.mxu0  ;;  %v7804_v38 = vpop.f32.mrf.mxu1  ;;  %v3106_v48 = vld [vmem:[%s8451_s19 + $0x340] sm:$0xff] }
0x131b   : > { %4715 = vmatprep.mubr.bf16.mxu0 %v4534_v30  ;;  %4755 = vmatprep.mubr.bf16.mxu1 %v4536_v31  ;;  %v3089_v30 = vld [vmem:[%s8451_s19 + $0x2b8] sm:$0xff]  ;;  %v3120_v31 = vld [vmem:[%s8451_s19 + $0x3b0] sm:$0xff] }
0x131c   : > { %v4307_v46 = vpop.f32.mrf.mxu0  ;;  %v4348_v47 = vpop.f32.mrf.mxu1  ;;  %4716 = vmatmul.mubr.bf16.vlgmr.msra.gmra.mxu0 %v4533_v37  ;;  %4756 = vmatmul.mubr.bf16.vlgmr.msra.gmra.mxu1 %v4535_v27  ;;  %v4585_v37 = vpack.c.bf16 %v3075_v19, %v3074_v6  ;;  %v3068_v19 = vld [vmem:[%s8451_s19 + $0x210] sm:$0xff] }
0x131d   : > { %v4308_v34 = vadd.f32 %v4307_v46, %v4129_v26  ;;  %v4349_v55 = vadd.f32 %v4348_v47, %v4137_v51  ;;  %5476 = vmatpush3.bf16.msra.mxu0 %v4588_v28  ;;  %5498 = vmatpush3.bf16.msra.mxu1 %v4604_v33  ;;  %v3107_v26 = vld [vmem:[%s8451_s19 + $0x348] sm:$0xff]  ;;  %v3088_v28 = vld [vmem:[%s8451_s19 + $0x2b0] sm:$0xff]  ;;  %v3121_v51 = vld [vmem:[%s8451_s19 + $0x3b8] sm:$0xff]  ;;  %v4165_v47 = vrot.slane %v7883_v35, %v6676_v50 }
0x131e   : > { %v4309_v32 = vpop.f32.mrf.mxu0  ;;  %v4350_v58 = vpop.f32.mrf.mxu1  ;;  %5477 = vmatprep.subr.bf16.mxu0 %v4595_v41  ;;  %5499 = vmatprep.subr.bf16.mxu1 %v4611_v42  ;;  %v4601_v27 = vpack.c.bf16 %v3107_v26, %v3106_v48  ;;  %v3072_v41 = vld [vmem:[%s8451_s19 + $0x230] sm:$0xff]  ;;  %v3073_v42 = vld [vmem:[%s8451_s19 + $0x238] sm:$0xff]  ;;  %v4592_v7 = vpack.c.bf16 %v3089_v30, %v3088_v28  ;;  %v4608_v44 = vpack.c.bf16 %v3121_v51, %v3120_v31  ;;  %v3086_v46 = vld [vmem:[%s8451_s19 + $0x2a0] sm:$0xff] }
0x131f   : > { %v4522_v63 = vmax.f32 %v4308_v34, 0.0  ;;  %v4524_v0 = vmax.f32 %v4349_v55, 0.0  ;;  %v3118_v34 = vld [vmem:[%s8451_s19 + $0x3a0] sm:$0xff]  ;;  %v3119_v55 = vld [vmem:[%s8451_s19 + $0x3a8] sm:$0xff]  ;;  %v4584_v57 = vpack.c.bf16 %v3073_v42, %v3072_v41  ;;  %v4600_v32 = vpack.c.bf16 %v3105_v45, %v3104_v20  ;;  %v3101_v51 = vld [vmem:[%s8451_s19 + $0x318] sm:$0xff] }
0x1320   : > { %v4310_v14 = vpop.f32.mrf.mxu0  ;;  %v4351_v16 = vpop.f32.mrf.mxu1  ;;  %v3070_v58 = vld [vmem:[%s8451_s19 + $0x220] sm:$0xff]  ;;  %v4607_v62 = vpack.c.bf16 %v3119_v55, %v3118_v34  ;;  %v4133_v48 = vrot.slane %v7758_v9, %v6676_v50  ;;  %v4590_v30 = vpack.c.bf16 %v3085_v12, %v3084_v1  ;;  %v4145_v50 = vrot.slane %v7883_v35, %v6544_v10  ;;  %v3115_v41 = vld [vmem:[%s8451_s19 + $0x388] sm:$0xff]  ;;  %v3160_v55 = vld [vmem:[%s8451_s19 + $0x4f0] sm:$0xff] }
0x1321   : > { %v4538_v18 = vpack.c.bf16 %v4522_v63, %v4522_v63  ;;  %v4540_v53 = vpack.c.bf16 %v4524_v0, %v4524_v0  ;;  %5478 = vmatpush3.bf16.msra.mxu0 %v4587_v52  ;;  %5500 = vmatpush3.bf16.msra.mxu1 %v4603_v29  ;;  %v3087_v52 = vld [vmem:[%s8451_s19 + $0x2a8] sm:$0xff]  ;;  %v3102_v63 = vld [vmem:[%s8451_s19 + $0x320] sm:$0xff]  ;;  %v3116_v14 = vld [vmem:[%s8451_s19 + $0x390] sm:$0xff]  ;;  %v4153_v42 = vrot.slane %v7883_v35, %v6547_v11 }
0x1322   : > { %v7854_v21 = vpop.f32.mrf.mxu0  ;;  %v7856_v23 = vpop.f32.mrf.mxu1  ;;  %5479 = vmatprep.subr.bf16.mxu0 %v4594_v59  ;;  %5501 = vmatprep.subr.bf16.mxu1 %v4610_v13  ;;  %v3071_v59 = vld [vmem:[%s8451_s19 + $0x228] sm:$0xff]  ;;  %v4591_v61 = vpack.c.bf16 %v3087_v52, %v3086_v46  ;;  %v3117_v16 = vld [vmem:[%s8451_s19 + $0x398] sm:$0xff]  ;;  %v3066_v10 = vld [vmem:[%s8451_s19 + $0x200] sm:$0xff] }
0x1323   : > { %4795 = vmatprep.mubr.bf16.mxu0 %v4538_v18  ;;  %4835 = vmatprep.mubr.bf16.mxu1 %v4540_v53  ;;  %v3103_v0 = vld [vmem:[%s8451_s19 + $0x328] sm:$0xff]  ;;  %v4125_v53 = vrot.slane %v7758_v9, %v6710_v15  ;;  %v4606_v31 = vpack.c.bf16 %v3117_v16, %v3116_v14  ;;  %v3114_v9 = vld [vmem:[%s8451_s19 + $0x380] sm:$0xff]  ;;  %v3177_v1 = vld [vmem:[%s8451_s19 + $0x578] sm:$0xff] }
0x1324   : > { %v7876_v33 = vpop.f32.mrf.mxu0  ;;  %v7878_v49 = vpop.f32.mrf.mxu1  ;;  %v4599_v6 = vpack.c.bf16 %v3103_v0, %v3102_v63  ;;  %v3067_v45 = vld [vmem:[%s8451_s19 + $0x208] sm:$0xff]  ;;  %v4605_v11 = vpack.c.bf16 %v3115_v41, %v3114_v9  ;;  %v3098_v52 = vld [vmem:[%s8451_s19 + $0x300] sm:$0xff]  ;;  %v3145_v63 = vld [vmem:[%s8451_s19 + $0x478] sm:$0xff] }
0x1325   : > { %5480 = vmatpush3.bf16.msra.mxu0 %v4586_v17  ;;  %5502 = vmatpush3.bf16.msra.mxu1 %v4602_v54  ;;  %v4583_v54 = vpack.c.bf16 %v3071_v59, %v3070_v58  ;;  %v4306_v46 = vadd.f32 %v7802_v39, %v4125_v53  ;;  %v3099_v34 = vld [vmem:[%s8451_s19 + $0x308] sm:$0xff]  ;;  %v3161_v39 = vld [vmem:[%s8451_s19 + $0x4f8] sm:$0xff]  ;;  %v3158_v12 = vld [vmem:[%s8451_s19 + $0x4e0] sm:$0xff] }
0x1326   : > { %v4391_v43 = vpop.f32.mrf.mxu0  ;;  %v4432_v40 = vpop.f32.mrf.mxu1  ;;  %5481 = vmatprep.subr.bf16.mxu0 %v4593_v4  ;;  %5503 = vmatprep.subr.bf16.mxu1 %v4609_v24  ;;  %v3069_v4 = vld [vmem:[%s8451_s19 + $0x218] sm:$0xff]  ;;  %v3100_v24 = vld [vmem:[%s8451_s19 + $0x310] sm:$0xff]  ;;  %v4597_v58 = vpack.c.bf16 %v3099_v34, %v3098_v52  ;;  %v3159_v16 = vld [vmem:[%s8451_s19 + $0x4e8] sm:$0xff] }
0x1327   : > { %v4521_v59 = vmax.f32 %v4306_v46, 0.0  ;;  %v3190_v53 = vld [vmem:[%s8451_s19 + $0x5e0] sm:$0xff]  ;;  %v3188_v41 = vld [vmem:[%s8451_s19 + $0x5d0] sm:$0xff]  ;;  %v3173_v46 = vld [vmem:[%s8451_s19 + $0x558] sm:$0xff] }
0x1328   : > { %v4392_v29 = vpop.f32.mrf.mxu0  ;;  %v4433_v36 = vpop.f32.mrf.mxu1  ;;  %v3186_v52 = vld [vmem:[%s8451_s19 + $0x5c0] sm:$0xff]  ;;  %v3187_v34 = vld [vmem:[%s8451_s19 + $0x5c8] sm:$0xff] }
0x1329   : > { %5482 = vmatpush3.bf16.msra.mxu0 %v4585_v37  ;;  %5504 = vmatpush3.bf16.msra.mxu1 %v4601_v27  ;;  %v3082_v37 = vld [vmem:[%s8451_s19 + $0x280] sm:$0xff]  ;;  %v3083_v27 = vld [vmem:[%s8451_s19 + $0x288] sm:$0xff]  ;;  %v4390_v29 = vadd.f32 %v7876_v33, %v4145_v50  ;;  %v3193_v36 = vld [vmem:[%s8451_s19 + $0x5f8] sm:$0xff] }
0x132a   : > { %v7917_v13 = vpop.f32.mrf.mxu0  ;;  %v4510_v60 = vpop.f32.mrf.mxu1  ;;  %5483 = vmatprep.subr.bf16.mxu0 %v4592_v7  ;;  %5505 = vmatprep.subr.bf16.mxu1 %v4608_v44  ;;  %v4582_v7 = vpack.c.bf16 %v3069_v4, %v3068_v19  ;;  %v4598_v44 = vpack.c.bf16 %v3101_v51, %v3100_v24  ;;  %v4589_v20 = vpack.c.bf16 %v3083_v27, %v3082_v37  ;;  %v3175_v37 = vld [vmem:[%s8451_s19 + $0x568] sm:$0xff]  ;;  %v3156_v27 = vld [vmem:[%s8451_s19 + $0x4d0] sm:$0xff]  ;;  %v3157_v50 = vld [vmem:[%s8451_s19 + $0x4d8] sm:$0xff] }
0x132b   : > { %v7928_v2 = vadd.f32 %v4510_v60, %v4165_v47  ;;  %v4347_v47 = vadd.f32 %v7804_v38, %v4133_v48  ;;  %v3192_v38 = vld [vmem:[%s8451_s19 + $0x5f0] sm:$0xff]  ;;  %v4628_v60 = vpack.c.bf16 %v3161_v39, %v3160_v55  ;;  %v4526_v0 = vmax.f32 %v4390_v29, 0.0  ;;  %v3142_v48 = vld [vmem:[%s8451_s19 + $0x460] sm:$0xff] }
0x132c   : > { %v7939_v17 = vpop.f32.mrf.mxu0  ;;  %v7941_v18 = vpop.f32.mrf.mxu1  ;;  %v4537_v19 = vpack.c.bf16 %v4521_v59, %v4521_v59  ;;  %v3152_v59 = vld [vmem:[%s8451_s19 + $0x4b0] sm:$0xff] }
0x132d   : > { %5484 = vmatpush3.bf16.msra.mxu0 %v4584_v57  ;;  %5506 = vmatpush3.bf16.msra.mxu1 %v4600_v32  ;;  %v4431_v57 = vadd.f32 %v7878_v49, %v4153_v42  ;;  %v4581_v32 = vpack.c.bf16 %v3067_v45, %v3066_v10  ;;  %v4523_v33 = vmax.f32 %v4347_v47, 0.0  ;;  %v3176_v49 = vld [vmem:[%s8451_s19 + $0x570] sm:$0xff]  ;;  %v3189_v42 = vld [vmem:[%s8451_s19 + $0x5d8] sm:$0xff]  ;;  %v3154_v47 = vld [vmem:[%s8451_s19 + $0x4c0] sm:$0xff] }
0x132e   : > { %v4473_v26 = vpop.f32.mrf.mxu0  ;;  %v4514_v28 = vpop.f32.mrf.mxu1  ;;  %5485 = vmatprep.subr.bf16.mxu0 %v4591_v61  ;;  %5507 = vmatprep.subr.bf16.mxu1 %v4607_v62  ;;  %v4644_v61 = vpack.c.bf16 %v3193_v36, %v3192_v38  ;;  %v3144_v62 = vld [vmem:[%s8451_s19 + $0x470] sm:$0xff]  ;;  %v4636_v24 = vpack.c.bf16 %v3177_v1, %v3176_v49  ;;  %v4642_v45 = vpack.c.bf16 %v3189_v42, %v3188_v41  ;;  %v3138_v38 = vld [vmem:[%s8451_s19 + $0x440] sm:$0xff]  ;;  %v3139_v36 = vld [vmem:[%s8451_s19 + $0x448] sm:$0xff] }
0x132f   : > { %v4528_v14 = vmax.f32 %v4431_v57, 0.0  ;;  %v4539_v4 = vpack.c.bf16 %v4523_v33, %v4523_v33  ;;  %v3143_v26 = vld [vmem:[%s8451_s19 + $0x468] sm:$0xff]  ;;  %v3174_v28 = vld [vmem:[%s8451_s19 + $0x560] sm:$0xff]  ;;  %v3172_v10 = vld [vmem:[%s8451_s19 + $0x550] sm:$0xff]  ;;  %v4141_v42 = vrot.slane %v7883_v35, %v6533_v5 }
0x1330   : > { %v4474_v43 = vpop.f32.mrf.mxu0  ;;  %v4515_v40 = vpop.f32.mrf.mxu1  ;;  %v4634_v29 = vpack.c.bf16 %v3173_v46, %v3172_v10  ;;  %v3170_v57 = vld [vmem:[%s8451_s19 + $0x540] sm:$0xff]  ;;  %v3153_v33 = vld [vmem:[%s8451_s19 + $0x4b8] sm:$0xff]  ;;  %v3136_v49 = vld [vmem:[%s8451_s19 + $0x430] sm:$0xff]  ;;  %v4149_v10 = vrot.slane %v7883_v35, %v6536_v8 }
0x1331   : > { %5486 = vmatpush3.bf16.msra.mxu0 %v4583_v54  ;;  %5508 = vmatpush3.bf16.msra.mxu1 %v4599_v6  ;;  %v3191_v54 = vld [vmem:[%s8451_s19 + $0x5e8] sm:$0xff]  ;;  %v4620_v6 = vpack.c.bf16 %v3145_v63, %v3144_v62  ;;  %v4544_v9 = vpack.c.bf16 %v4528_v14, %v4528_v14  ;;  %v4619_v43 = vpack.c.bf16 %v3143_v26, %v3142_v48  ;;  %v3137_v1 = vld [vmem:[%s8451_s19 + $0x438] sm:$0xff]  ;;  %v3134_v26 = vld [vmem:[%s8451_s19 + $0x420] sm:$0xff] }
0x1332   : > { %5487 = vmatprep.subr.bf16.mxu0 %v4590_v30  ;;  %5509 = vmatprep.subr.bf16.mxu1 %v4606_v31  ;;  %v4542_v30 = vpack.c.bf16 %v4526_v0, %v4526_v0  ;;  %v4627_v31 = vpack.c.bf16 %v3159_v16, %v3158_v12  ;;  %v4643_v51 = vpack.c.bf16 %v3191_v54, %v3190_v53  ;;  %v3168_v12 = vld [vmem:[%s8451_s19 + $0x530] sm:$0xff]  ;;  %v3169_v16 = vld [vmem:[%s8451_s19 + $0x538] sm:$0xff]  ;;  %v3150_v53 = vld [vmem:[%s8451_s19 + $0x4a0] sm:$0xff] }
0x1333   : > { %v4635_v40 = vpack.c.bf16 %v3175_v37, %v3174_v28  ;;  %v4617_v62 = vpack.c.bf16 %v3139_v36, %v3138_v38  ;;  %v4624_v0 = vpack.c.bf16 %v3153_v33, %v3152_v59  ;;  %v3151_v54 = vld [vmem:[%s8451_s19 + $0x4a8] sm:$0xff]  ;;  %v3148_v37 = vld [vmem:[%s8451_s19 + $0x490] sm:$0xff]  ;;  %v3146_v46 = vld [vmem:[%s8451_s19 + $0x480] sm:$0xff] }
0x1334   : > { %v4623_v48 = vpack.c.bf16 %v3151_v54, %v3150_v53  ;;  %v3135_v28 = vld [vmem:[%s8451_s19 + $0x428] sm:$0xff]  ;;  %v3178_v8 = vld [vmem:[%s8451_s19 + $0x580] sm:$0xff]  ;;  %v3225_v59 = vld [vmem:[%s8451_s19 + $0x6f8] sm:$0xff] }
0x1335   : > { %5488 = vmatpush3.bf16.msra.mxu0 %v4582_v7  ;;  %5510 = vmatpush3.bf16.msra.mxu1 %v4598_v44  ;;  %v4626_v7 = vpack.c.bf16 %v3157_v50, %v3156_v27  ;;  %v3140_v44 = vld [vmem:[%s8451_s19 + $0x450] sm:$0xff]  ;;  %v3149_v27 = vld [vmem:[%s8451_s19 + $0x498] sm:$0xff]  ;;  %v4615_v41 = vpack.c.bf16 %v3135_v28, %v3134_v26  ;;  %v3131_v36 = vld [vmem:[%s8451_s19 + $0x408] sm:$0xff] }
0x1336   : > { %5489 = vmatprep.subr.bf16.mxu0 %v4589_v20  ;;  %5511 = vmatprep.subr.bf16.mxu1 %v4605_v11  ;;  %v3141_v20 = vld [vmem:[%s8451_s19 + $0x458] sm:$0xff]  ;;  %v3155_v11 = vld [vmem:[%s8451_s19 + $0x4c8] sm:$0xff]  ;;  %v3180_v50 = vld [vmem:[%s8451_s19 + $0x590] sm:$0xff] }
0x1337   : > { %v4618_v55 = vpack.c.bf16 %v3141_v20, %v3140_v44  ;;  %v4625_v39 = vpack.c.bf16 %v3155_v11, %v3154_v47  ;;  %v3133_v44 = vld [vmem:[%s8451_s19 + $0x418] sm:$0xff]  ;;  %v3164_v20 = vld [vmem:[%s8451_s19 + $0x510] sm:$0xff]  ;;  %v3147_v47 = vld [vmem:[%s8451_s19 + $0x488] sm:$0xff]  ;;  %v4161_v11 = vrot.slane %v7883_v35, %v6558_v22 }
0x1338   : > { %v4621_v38 = vpack.c.bf16 %v3147_v47, %v3146_v46  ;;  %v3130_v22 = vld [vmem:[%s8451_s19 + $0x400] sm:$0xff]  ;;  %v3205_v46 = vld [vmem:[%s8451_s19 + $0x658] sm:$0xff]  ;;  %v3236_v47 = vld [vmem:[%s8451_s19 + $0x750] sm:$0xff] }
0x1339   : > { %5490 = vmatpush3.bf16.msra.mxu0 %v4581_v32  ;;  %5512 = vmatpush3.bf16.msra.mxu1 %v4597_v58  ;;  %v4641_v32 = vpack.c.bf16 %v3187_v34, %v3186_v52  ;;  %v3171_v58 = vld [vmem:[%s8451_s19 + $0x548] sm:$0xff]  ;;  %v4169_v34 = vrot.slane %v7883_v35, %v6561_v25  ;;  %v3162_v25 = vld [vmem:[%s8451_s19 + $0x500] sm:$0xff]  ;;  %v4472_v33 = vadd.f32 %v7939_v17, %v4161_v11  ;;  %v3208_v17 = vld [vmem:[%s8451_s19 + $0x670] sm:$0xff] }
0x133a   : > { %5519 = vmatprep.subr.bf16.mxu0 %v4628_v60  ;;  %5541 = vmatprep.subr.bf16.mxu1 %v4644_v61  ;;  %v3184_v60 = vld [vmem:[%s8451_s19 + $0x5b0] sm:$0xff]  ;;  %v3185_v61 = vld [vmem:[%s8451_s19 + $0x5b8] sm:$0xff]  ;;  %v4633_v63 = vpack.c.bf16 %v3171_v58, %v3170_v57  ;;  %v3179_v52 = vld [vmem:[%s8451_s19 + $0x588] sm:$0xff]  ;;  %v4429_v57 = vadd.f32 %v7856_v23, %v4149_v10 }
0x133b   : > { %v4640_v14 = vpack.c.bf16 %v3185_v61, %v3184_v60  ;;  %v3224_v58 = vld [vmem:[%s8451_s19 + $0x6f0] sm:$0xff]  ;;  %v3257_v60 = vld [vmem:[%s8451_s19 + $0x7f8] sm:$0xff]  ;;  %v4513_v61 = vadd.f32 %v7941_v18, %v4169_v34  ;;  %v4530_v53 = vmax.f32 %v4472_v33, 0.0  ;;  %v3222_v54 = vld [vmem:[%s8451_s19 + $0x6e0] sm:$0xff] }
0x133c   : > { %4796 = vmatmul.mubr.bf16.vlgmr.msra.gmra.mxu0 %v4537_v19  ;;  %4836 = vmatmul.mubr.bf16.vlgmr.msra.gmra.mxu1 %v4539_v4  ;;  %v3183_v19 = vld [vmem:[%s8451_s19 + $0x5a8] sm:$0xff]  ;;  %v4616_v4 = vpack.c.bf16 %v3137_v1, %v3136_v49  ;;  %v3256_v23 = vld [vmem:[%s8451_s19 + $0x7f0] sm:$0xff]  ;;  %v4660_v49 = vpack.c.bf16 %v3225_v59, %v3224_v58  ;;  %v3209_v1 = vld [vmem:[%s8451_s19 + $0x678] sm:$0xff] }
0x133d   : > { %5520 = vmatpush3.bf16.msra.mxu0 %v4620_v6  ;;  %4875 = vmatprep.mubr.bf16.mxu0 %v4542_v30  ;;  %v3182_v6 = vld [vmem:[%s8451_s19 + $0x5a0] sm:$0xff]  ;;  %v3240_v18 = vld [vmem:[%s8451_s19 + $0x770] sm:$0xff]  ;;  %v3219_v34 = vld [vmem:[%s8451_s19 + $0x6c8] sm:$0xff] }
0x133e   : > { %5542 = vmatpush3.bf16.msra.mxu1 %v4636_v24  ;;  %4915 = vmatprep.mubr.bf16.mxu1 %v4544_v9  ;;  %v4632_v24 = vpack.c.bf16 %v3169_v16, %v3168_v12  ;;  %v3166_v30 = vld [vmem:[%s8451_s19 + $0x520] sm:$0xff]  ;;  %v3181_v9 = vld [vmem:[%s8451_s19 + $0x598] sm:$0xff]  ;;  %v4527_v12 = vmax.f32 %v4429_v57, 0.0  ;;  %v3216_v58 = vld [vmem:[%s8451_s19 + $0x6b0] sm:$0xff] }
0x133f   : > { %5521 = vmatprep.subr.bf16.mxu0 %v4627_v31  ;;  %5543 = vmatprep.subr.bf16.mxu1 %v4643_v51  ;;  %v4639_v31 = vpack.c.bf16 %v3183_v19, %v3182_v6  ;;  %v3167_v51 = vld [vmem:[%s8451_s19 + $0x528] sm:$0xff]  ;;  %v4638_v5 = vpack.c.bf16 %v3181_v9, %v3180_v50  ;;  %v3241_v16 = vld [vmem:[%s8451_s19 + $0x778] sm:$0xff]  ;;  %v4532_v19 = vmax.f32 %v4513_v61, 0.0  ;;  %v3220_v9 = vld [vmem:[%s8451_s19 + $0x6d0] sm:$0xff] }
0x1340   : > { %v3223_v6 = vld [vmem:[%s8451_s19 + $0x6e8] sm:$0xff]  ;;  %v4668_v28 = vpack.c.bf16 %v3241_v16, %v3240_v18  ;;  %v3234_v57 = vld [vmem:[%s8451_s19 + $0x740] sm:$0xff]  ;;  %v3217_v59 = vld [vmem:[%s8451_s19 + $0x6b8] sm:$0xff] }
0x1341   : > { %5522 = vmatpush3.bf16.msra.mxu0 %v4619_v43  ;;  %v4631_v43 = vpack.c.bf16 %v3167_v51, %v3166_v30  ;;  %v3206_v30 = vld [vmem:[%s8451_s19 + $0x660] sm:$0xff]  ;;  %v3239_v50 = vld [vmem:[%s8451_s19 + $0x768] sm:$0xff]  ;;  %v3248_v33 = vld [vmem:[%s8451_s19 + $0x7b0] sm:$0xff] }
0x1342   : > { %5544 = vmatpush3.bf16.msra.mxu1 %v4635_v40  ;;  %5523 = vmatprep.subr.bf16.mxu0 %v4626_v7  ;;  %v4622_v40 = vpack.c.bf16 %v3149_v27, %v3148_v37  ;;  %v3132_v7 = vld [vmem:[%s8451_s19 + $0x410] sm:$0xff]  ;;  %v3238_v51 = vld [vmem:[%s8451_s19 + $0x760] sm:$0xff]  ;;  %v4543_v37 = vpack.c.bf16 %v4527_v12, %v4527_v12  ;;  %v4659_v27 = vpack.c.bf16 %v3223_v6, %v3222_v54  ;;  %v3247_v16 = vld [vmem:[%s8451_s19 + $0x7a8] sm:$0xff] }
0x1343   : > { %5545 = vmatprep.subr.bf16.mxu1 %v4642_v45  ;;  %v3165_v45 = vld [vmem:[%s8451_s19 + $0x518] sm:$0xff]  ;;  %v4667_v10 = vpack.c.bf16 %v3239_v50, %v3238_v51  ;;  %v3214_v12 = vld [vmem:[%s8451_s19 + $0x6a0] sm:$0xff] }
0x1344   : > { %v3246_v18 = vld [vmem:[%s8451_s19 + $0x7a0] sm:$0xff]  ;;  %v3245_v51 = vld [vmem:[%s8451_s19 + $0x798] sm:$0xff] }
0x1345   : > { %5524 = vmatpush3.bf16.msra.mxu0 %v4618_v55  ;;  %v4614_v55 = vpack.c.bf16 %v3133_v44, %v3132_v7  ;;  %v3253_v7 = vld [vmem:[%s8451_s19 + $0x7d8] sm:$0xff]  ;;  %v4548_v44 = vpack.c.bf16 %v4532_v19, %v4532_v19  ;;  %v3198_v19 = vld [vmem:[%s8451_s19 + $0x620] sm:$0xff] }
0x1346   : > { %5546 = vmatpush3.bf16.msra.mxu1 %v4634_v29  ;;  %5525 = vmatprep.subr.bf16.mxu0 %v4625_v39  ;;  %v4388_v29 = vadd.f32 %v7854_v21, %v4141_v42  ;;  %v4630_v39 = vpack.c.bf16 %v3165_v45, %v3164_v20  ;;  %v4637_v21 = vpack.c.bf16 %v3179_v52, %v3178_v8  ;;  %v3204_v45 = vld [vmem:[%s8451_s19 + $0x650] sm:$0xff]  ;;  %v3237_v8 = vld [vmem:[%s8451_s19 + $0x758] sm:$0xff]  ;;  %v3218_v52 = vld [vmem:[%s8451_s19 + $0x6c0] sm:$0xff] }
0x1347   : > { %5547 = vmatprep.subr.bf16.mxu1 %v4641_v32  ;;  %v3163_v32 = vld [vmem:[%s8451_s19 + $0x508] sm:$0xff]  ;;  %v4546_v42 = vpack.c.bf16 %v4530_v53, %v4530_v53 }
0x1349   : > { %5526 = vmatpush3.bf16.msra.mxu0 %v4617_v62  ;;  %v4613_v62 = vpack.c.bf16 %v3131_v36, %v3130_v22  ;;  %v4657_v22 = vpack.c.bf16 %v3219_v34, %v3218_v52  ;;  %v3202_v36 = vld [vmem:[%s8451_s19 + $0x640] sm:$0xff] }
0x134a   : > { %5548 = vmatpush3.bf16.msra.mxu1 %v4633_v63  ;;  %5527 = vmatprep.subr.bf16.mxu0 %v4624_v0  ;;  %v4525_v63 = vmax.f32 %v4388_v29, 0.0  ;;  %v4629_v0 = vpack.c.bf16 %v3163_v32, %v3162_v25  ;;  %v3251_v29 = vld [vmem:[%s8451_s19 + $0x7c8] sm:$0xff]  ;;  %v3226_v52 = vld [vmem:[%s8451_s19 + $0x700] sm:$0xff] }
0x134b   : > { %5549 = vmatprep.subr.bf16.mxu1 %v4640_v14  ;;  %v4676_v14 = vpack.c.bf16 %v3257_v60, %v3256_v23  ;;  %v3203_v25 = vld [vmem:[%s8451_s19 + $0x648] sm:$0xff]  ;;  %v3249_v23 = vld [vmem:[%s8451_s19 + $0x7b8] sm:$0xff] }
0x134c   : > { %v4541_v26 = vpack.c.bf16 %v4525_v63, %v4525_v63  ;;  %v3235_v32 = vld [vmem:[%s8451_s19 + $0x748] sm:$0xff]  ;;  %v4649_v60 = vpack.c.bf16 %v3203_v25, %v3202_v36  ;;  %v3200_v63 = vld [vmem:[%s8451_s19 + $0x630] sm:$0xff] }
0x134d   : > { %5528 = vmatpush3.bf16.msra.mxu0 %v4616_v4  ;;  %v4652_v4 = vpack.c.bf16 %v3209_v1, %v3208_v17  ;;  %v4665_v61 = vpack.c.bf16 %v3235_v32, %v3234_v57  ;;  %v4672_v17 = vpack.c.bf16 %v3249_v23, %v3248_v33  ;;  %v3233_v1 = vld [vmem:[%s8451_s19 + $0x738] sm:$0xff]  ;;  %v5204_v57 = vld [vmem:[%s8452_s20] ss:$0 sm:$0xff] }
0x134e   : > { %5550 = vmatpush3.bf16.msra.mxu1 %v4632_v24  ;;  %5529 = vmatprep.subr.bf16.mxu0 %v4623_v48  ;;  %v3254_v24 = vld [vmem:[%s8451_s19 + $0x7e0] sm:$0xff]  ;;  %v3255_v48 = vld [vmem:[%s8451_s19 + $0x7e8] sm:$0xff] }
0x134f   : > { %5551 = vmatprep.subr.bf16.mxu1 %v4639_v31  ;;  %v3207_v31 = vld [vmem:[%s8451_s19 + $0x668] sm:$0xff] }
0x1350   : > { %v4651_v20 = vpack.c.bf16 %v3207_v31, %v3206_v30  ;;  %v3213_v30 = vld [vmem:[%s8451_s19 + $0x698] sm:$0xff]  ;;  %v3244_v31 = vld [vmem:[%s8451_s19 + $0x790] sm:$0xff] }
0x1351   : > { %5530 = vmatpush3.bf16.msra.mxu0 %v4615_v41  ;;  %v3221_v41 = vld [vmem:[%s8451_s19 + $0x6d8] sm:$0xff] }
0x1352   : > { %5552 = vmatpush3.bf16.msra.mxu1 %v4631_v43  ;;  %5531 = vmatprep.subr.bf16.mxu0 %v4622_v40  ;;  %v4675_v43 = vpack.c.bf16 %v3255_v48, %v3254_v24  ;;  %v3252_v40 = vld [vmem:[%s8451_s19 + $0x7d0] sm:$0xff]  ;;  %v3230_v24 = vld [vmem:[%s8451_s19 + $0x720] sm:$0xff]  ;;  %v4671_v48 = vpack.c.bf16 %v3247_v16, %v3246_v18 }
0x1353   : > { %5553 = vmatprep.subr.bf16.mxu1 %v4638_v5  ;;  %v4658_v5 = vpack.c.bf16 %v3221_v41, %v3220_v9  ;;  %v4674_v11 = vpack.c.bf16 %v3253_v7, %v3252_v40  ;;  %v3196_v41 = vld [vmem:[%s8451_s19 + $0x610] sm:$0xff]  ;;  %v4670_v40 = vpack.c.bf16 %v3245_v51, %v3244_v31  ;;  %v3211_v7 = vld [vmem:[%s8451_s19 + $0x688] sm:$0xff] }
0x1355   : > { %5532 = vmatpush3.bf16.msra.mxu0 %v4614_v55  ;;  %v3250_v55 = vld [vmem:[%s8451_s19 + $0x7c0] sm:$0xff] }
0x1356   : > { %5554 = vmatpush3.bf16.msra.mxu1 %v4630_v39  ;;  %5533 = vmatprep.subr.bf16.mxu0 %v4621_v38  ;;  %v4650_v39 = vpack.c.bf16 %v3205_v46, %v3204_v45  ;;  %v4666_v38 = vpack.c.bf16 %v3237_v8, %v3236_v47  ;;  %v3194_v47 = vld [vmem:[%s8451_s19 + $0x600] sm:$0xff] }
0x1357   : > { %5555 = vmatprep.subr.bf16.mxu1 %v4637_v21  ;;  %v4673_v21 = vpack.c.bf16 %v3251_v29, %v3250_v55 }
0x1359   : > { %5534 = vmatpush3.bf16.msra.mxu0 %v4613_v62  ;;  %v4656_v62 = vpack.c.bf16 %v3217_v59, %v3216_v58 }
0x135a   : > { %5556 = vmatpush3.bf16.msra.mxu1 %v4629_v0  ;;  %5563 = vmatprep.subr.bf16.mxu0 %v4660_v49  ;;  %v3201_v0 = vld [vmem:[%s8451_s19 + $0x638] sm:$0xff]  ;;  %v3232_v49 = vld [vmem:[%s8451_s19 + $0x730] sm:$0xff] }
0x135b   : > { %5585 = vmatprep.subr.bf16.mxu1 %v4676_v14  ;;  %v3215_v14 = vld [vmem:[%s8451_s19 + $0x6a8] sm:$0xff]  ;;  %v4648_v53 = vpack.c.bf16 %v3201_v0, %v3200_v63  ;;  %v4664_v54 = vpack.c.bf16 %v3233_v1, %v3232_v49 }
0x135c   : > { %4876 = vmatmul.mubr.bf16.vlgmr.msra.gmra.mxu0 %v4541_v26  ;;  %v4655_v6 = vpack.c.bf16 %v3215_v14, %v3214_v12  ;;  %v3231_v26 = vld [vmem:[%s8451_s19 + $0x728] sm:$0xff] }
0x135d   : > { %4916 = vmatmul.mubr.bf16.vlgmr.msra.gmra.mxu1 %v4543_v37  ;;  %5564 = vmatpush3.bf16.msra.mxu0 %v4652_v4  ;;  %v3199_v4 = vld [vmem:[%s8451_s19 + $0x628] sm:$0xff]  ;;  %v4663_v50 = vpack.c.bf16 %v3231_v26, %v3230_v24 }
0x135e   : > { %4955 = vmatprep.mubr.bf16.mxu0 %v4546_v42  ;;  %5586 = vmatpush3.bf16.msra.mxu1 %v4668_v28  ;;  %v3212_v28 = vld [vmem:[%s8451_s19 + $0x690] sm:$0xff]  ;;  %v4647_v37 = vpack.c.bf16 %v3199_v4, %v3198_v19  ;;  %v3197_v42 = vld [vmem:[%s8451_s19 + $0x618] sm:$0xff] }
0x135f   : > { %4995 = vmatprep.mubr.bf16.mxu1 %v4548_v44  ;;  %5565 = vmatprep.subr.bf16.mxu0 %v4659_v27  ;;  %v4157_v27 = vrot.slane %v7883_v35, %v6710_v15  ;;  %v4654_v9 = vpack.c.bf16 %v3213_v30, %v3212_v28  ;;  %v3229_v15 = vld [vmem:[%s8451_s19 + $0x718] sm:$0xff]  ;;  %v3210_v35 = vld [vmem:[%s8451_s19 + $0x680] sm:$0xff] }
0x1360   : > { %5587 = vmatprep.subr.bf16.mxu1 %v4675_v43  ;;  %v3228_v43 = vld [vmem:[%s8451_s19 + $0x710] sm:$0xff]  ;;  %v3242_v44 = vld [vmem:[%s8451_s19 + $0x780] sm:$0xff]  ;;  %v4653_v46 = vpack.c.bf16 %v3211_v7, %v3210_v35 }
0x1361   : > { %5566 = vmatpush3.bf16.msra.mxu0 %v4651_v20  ;;  %v3243_v20 = vld [vmem:[%s8451_s19 + $0x788] sm:$0xff]  ;;  %v4662_v45 = vpack.c.bf16 %v3229_v15, %v3228_v43 }
0x1362   : > { %5588 = vmatpush3.bf16.msra.mxu1 %v4667_v10  ;;  %5567 = vmatprep.subr.bf16.mxu0 %v4658_v5  ;;  %v4646_v10 = vpack.c.bf16 %v3197_v42, %v3196_v41  ;;  %v4470_v5 = vadd.f32 %v7917_v13, %v4157_v27  ;;  %v4669_v8 = vpack.c.bf16 %v3243_v20, %v3242_v44  ;;  %v3227_v13 = vld [vmem:[%s8451_s19 + $0x708] sm:$0xff] }
0x1363   : > { %5589 = vmatprep.subr.bf16.mxu1 %v4674_v11  ;;  %v3195_v11 = vld [vmem:[%s8451_s19 + $0x608] sm:$0xff]  ;;  %v4661_v29 = vpack.c.bf16 %v3227_v13, %v3226_v52 }
0x1364   : > { %v4645_v34 = vpack.c.bf16 %v3195_v11, %v3194_v47  ;;  %v4529_v55 = vmax.f32 %v4470_v5, 0.0 }
0x1365   : > { %5568 = vmatpush3.bf16.msra.mxu0 %v4650_v39  ;;  %v4531_v39 = vmax.f32 %v7928_v2, 0.0 }
0x1366   : > { %5590 = vmatpush3.bf16.msra.mxu1 %v4666_v38  ;;  %5569 = vmatprep.subr.bf16.mxu0 %v4657_v22  ;;  %v4545_v38 = vpack.c.bf16 %v4529_v55, %v4529_v55  ;;  %v5034_v55 = vld [vmem:[%s8457_s25 + $0x18] sm:$0xff] }
0x1367   : > { %5591 = vmatprep.subr.bf16.mxu1 %v4673_v21  ;;  %v4547_v22 = vpack.c.bf16 %v4531_v39, %v4531_v39  ;;  %v5032_v39 = vld [vmem:[%s8457_s25 + $0x8] sm:$0xff] }
0x1369   : > { %5570 = vmatpush3.bf16.msra.mxu0 %v4649_v60 }
0x136a   : > { %5592 = vmatpush3.bf16.msra.mxu1 %v4665_v61  ;;  %5571 = vmatprep.subr.bf16.mxu0 %v4656_v62 }
0x136b   : > { %5593 = vmatprep.subr.bf16.mxu1 %v4672_v17 }
0x136d   : > { %5572 = vmatpush3.bf16.msra.mxu0 %v4648_v53 }
0x136e   : > { %5594 = vmatpush3.bf16.msra.mxu1 %v4664_v54  ;;  %5573 = vmatprep.subr.bf16.mxu0 %v4655_v6 }
0x136f   : > { %5595 = vmatprep.subr.bf16.mxu1 %v4671_v48 }
0x1371   : > { %5574 = vmatpush3.bf16.msra.mxu0 %v4647_v37 }
0x1372   : > { %5596 = vmatpush3.bf16.msra.mxu1 %v4663_v50  ;;  %5575 = vmatprep.subr.bf16.mxu0 %v4654_v9 }
0x1373   : > { %5597 = vmatprep.subr.bf16.mxu1 %v4670_v40 }
0x1375   : > { %5576 = vmatpush3.bf16.msra.mxu0 %v4646_v10 }
0x1376   : > { %5598 = vmatpush3.bf16.msra.mxu1 %v4662_v45  ;;  %5577 = vmatprep.subr.bf16.mxu0 %v4653_v46 }
0x1377   : > { %5599 = vmatprep.subr.bf16.mxu1 %v4669_v8 }
0x1379   : > { %5578 = vmatpush3.bf16.msra.mxu0 %v4645_v34  ;;  %v5033_v34 = vld [vmem:[%s8457_s25 + $0x10] sm:$0xff] }
0x137a   : > { %5600 = vmatpush3.bf16.msra.mxu1 %v4661_v29  ;;  %5722 = vmatprep.subr.bf16.mxu0 %v5803_v3  ;;  %v5038_v29 = vpack.c.bf16 %v5034_v55, %v5033_v34 }
0x137c   : > { %4956 = vmatmul.mubr.bf16.vlgmr.msra.gmra.mxu0 %v4545_v38 }
0x137d   : > { %4996 = vmatmul.mubr.bf16.vlgmr.msra.gmra.mxu1 %v4547_v22  ;;  %5726 = vmatprep.mubr.msk.bf16.mxu0 %vm5804_vm0, %v5803_v3 }
0x137e   : > { %5723 = vmatpush3.bf16.msra.mxu0 %v5038_v29 }
0x137f   : > { %5724 = vmatprep.subr.bf16.mxu0 %v5803_v3  ;;  %v5207_v3 = vld [vmem:[%s8458_s26] ss:$0 sm:$0xff] }
0x13dc   : > { %v5447_v36 = vpop.f32.mrf.mxu0  ;;  %v5469_v25 = vpop.f32.mrf.mxu1 }
0x13de   : > { %v5448_v21 = vpop.f32.mrf.mxu0  ;;  %v5470_v2 = vpop.f32.mrf.mxu1 }
0x13df   : > { %v5449_v32 = vadd.f32 %v5448_v21, %v5447_v36  ;;  %v5471_v58 = vadd.f32 %v5470_v2, %v5469_v25  ;;  %v5205_v21 = vld [vmem:[%s8455_s23] ss:$0 sm:$0xff] }
0x13e0   : > { %v5450_v59 = vpop.f32.mrf.mxu0  ;;  %v5472_v33 = vpop.f32.mrf.mxu1 }
0x13e1   : > { %v4718_v23 = vadd.f32 %v5449_v32, %v5204_v57  ;;  %v5206_v32 = vld [vmem:[%s8456_s24] ss:$0 sm:$0xff] }
0x13e2   : > { %v5451_v60 = vpop.f32.mrf.mxu0  ;;  %v5473_v61 = vpop.f32.mrf.mxu1 }
0x13e3   : > { %v4758_v62 = vadd.f32 %v5471_v58, %v4718_v23 }
0x13fc   : > { %v5491_v63 = vpop.f32.mrf.mxu0  ;;  %v5513_v0 = vpop.f32.mrf.mxu1 }
0x13fe   : > { %v5492_v49 = vpop.f32.mrf.mxu0  ;;  %v5514_v17 = vpop.f32.mrf.mxu1 }
0x13ff   : > { %v5493_v26 = vadd.f32 %v5492_v49, %v5491_v63  ;;  %v5515_v30 = vadd.f32 %v5514_v17, %v5513_v0 }
0x1400   : > { %v5494_v1 = vpop.f32.mrf.mxu0  ;;  %v5516_v12 = vpop.f32.mrf.mxu1 }
0x1401   : > { %v4798_v28 = vadd.f32 %v5493_v26, %v4758_v62 }
0x1402   : > { %v5495_v14 = vpop.f32.mrf.mxu0  ;;  %v5517_v18 = vpop.f32.mrf.mxu1 }
0x1403   : > { %v4838_v51 = vadd.f32 %v5515_v30, %v4798_v28 }
0x141c   : > { %v5535_v16 = vpop.f32.mrf.mxu0 }
0x141d   : > { %v5557_v53 = vpop.f32.mrf.mxu1 }
0x141e   : > { %v5536_v54 = vpop.f32.mrf.mxu0 }
0x141f   : > { %v5558_v6 = vpop.f32.mrf.mxu1  ;;  %v5537_v31 = vadd.f32 %v5536_v54, %v5535_v16 }
0x1420   : > { %v5538_v19 = vpop.f32.mrf.mxu0  ;;  %v5559_v50 = vadd.f32 %v5558_v6, %v5557_v53 }
0x1421   : > { %v5560_v4 = vpop.f32.mrf.mxu1  ;;  %v4878_v37 = vadd.f32 %v5537_v31, %v4838_v51 }
0x1422   : > { %v5539_v24 = vpop.f32.mrf.mxu0 }
0x1423   : > { %v5561_v48 = vpop.f32.mrf.mxu1  ;;  %v4918_v42 = vadd.f32 %v5559_v50, %v4878_v37 }
0x143c   : > { %v5579_v27 = vpop.f32.mrf.mxu0 }
0x143d   : > { %v5601_v9 = vpop.f32.mrf.mxu1 }
0x143e   : > { %v5580_v41 = vpop.f32.mrf.mxu0 }
0x143f   : > { %v5581_v43 = vadd.f32 %v5580_v41, %v5579_v27  ;;  %v5602_v40 = vpop.f32.mrf.mxu1 }
0x1440   : > { %v5582_v15 = vpop.f32.mrf.mxu0  ;;  %v5603_v7 = vadd.f32 %v5602_v40, %v5601_v9 }
0x1441   : > { %v4958_v35 = vadd.f32 %v5581_v43, %v4918_v42  ;;  %v5604_v44 = vpop.f32.mrf.mxu1 }
0x1442   : > { %v5583_v20 = vpop.f32.mrf.mxu0 }
0x1443   : > { %v4998_v10 = vadd.f32 %v5603_v7, %v4958_v35  ;;  %v5605_v5 = vpop.f32.mrf.mxu1 }
0x1445   : > { %v5003_v45 = vadd.f32 %v4998_v10, %v7415_v56  ;;  %v5031_v56 = vld [vmem:[%s8457_s25] sm:$0xff] }
0x1446   : > { %v5037_v38 = vpack.c.bf16 %v5032_v39, %v5031_v56 }
0x1447   : > { %v5004_v46 = vsel %vm1162_vm1, %v5003_v45, 0.0 }
0x1448   : > { %5005 = vadd.xlane.f32.xlu0 %v5004_v46  ;;  %5725 = vmatpush3.bf16.msra.mxu0 %v5037_v38 }
0x14d1   : > { %v5006_v47 = vpop.xlane.xlu0 %5005 }
0x14d2   : > { %v5007_v11 = vmul.f32 0.03125, %v5006_v47 }
0x14d4   : > { %v5008_v8 = vsub.f32 %v5003_v45, %v5007_v11 }
0x14d6   : > { %v5009_v52 = vmul.f32 %v5008_v8, %v5008_v8 }
0x14d8   : > { %v5010_v13 = vsel %vm1162_vm1, %v5009_v52, 0.0 }
0x14d9   : > { %5011 = vadd.xlane.f32.xlu0 %v5010_v13 }
0x1562   : > { %v5012_v22 = vpop.xlane.xlu0 %5011 }
0x1563   : > { %v5013_v36 = vmul.f32 0.03125, %v5012_v22 }
0x1565   : > { %v5014_v25 = vadd.f32 1e-05, %v5013_v36 }
0x1567   : > { %5793 = vrsqrt.f32 %v5014_v25 }
0x1574   : > { %v5794_v57 = vpop.eup %5793 }
0x1575   : > { %v5016_v2 = vmul.f32 %v5794_v57, %v5008_v8 }
0x1577   : > { %v5023_v58 = vmul.f32 %v5205_v21, %v5016_v2 }
0x1579   : > { %v5030_v59 = vadd.f32 %v5206_v32, %v5023_v58 }
0x157b   : > { %v5036_v33 = vpack.c.bf16 %v5030_v59, %v5030_v59 }
0x157d   : > { %5727 = vmatmul.mubr.msk.bf16.vlgmr.msra.gmra.mxu0 %vm1162_vm1, %v5036_v33 }
0x163d   : > { %v5082_v23 = vpop.f32.mrf.mxu0 }
0x163e   : > { %v5083_v60 = vadd.f32 %v5207_v3, %v5082_v23 }
0x163f   : > { %v5728_v61 = vpop.f32.mrf.mxu0 }
0x1640   : > { %5088 = vst.msk [vmem:[%s813_s11] sm:$0xff] %vm1881_vm3, %v5083_v60 }
0x1641   : > { %v5085_v62 = vpop.f32.mrf.mxu0 }
0x1643   : > { %v5729_v63 = vpop.f32.mrf.mxu0 }
0x1644 PF: > { %s8524_s0 = sld [smem:[#allocation2_spill]] }
0x164a   : > { %s37_s7 = sadd.s32 1, %s8524_s0  }
0x164b   : > { %p34_p4 = scmp.ge.s32.totalorder %s37_s7, 4  }
0x164d   :  { %36 = sbr.rel (!%p34_p4) target bundleno = 13 (0xd), region = 158 }

</bundles_post_ra>
